<compile_context>
chip_gen: v7x
topology: tpu7x:2x2x1
jax: 0.10.0
libtpu: 0.0.40
codegen_flags: <defaults>
</compile_context>

<pallas_src>
import jax
import jax.numpy as jnp
from jax.experimental import pallas as pl
from jax.experimental.pallas import tpu as pltpu


D_IN, D_H1, D_H2, D_H3, D_OUT = 1, 1000, 1000, 5, 1
D_H1P, D_H2P = 1024, 1024          # hidden dims zero-padded to full lane tiles
MAX_TB = 1024                      # tile cap so activations fit v7x's 64 MiB VMEM


def simple_nn_kernel(x_ref,
                     w1_ref, b1_ref,
                     w2_ref, b2_ref,
                     w3_ref, b3_ref,
                     w4t_ref, b4_ref,
                     o_ref):
    # Layer 1 (Linear(1,1000) + ReLU). K=1 matmul is an outer product: do it on
    # the VPU as a broadcast multiply instead of paying an MXU fill/drain.
    h1 = jnp.maximum(x_ref[...] * w1_ref[...] + b1_ref[...], 0.0)     # [TB,1024] f32

    # Layer 2 (Linear(1000,1000) + ReLU) on the MXU. Weight is bf16 (halves the
    # dominant HBM->VMEM DMA); accumulate in f32.
    h2 = jnp.dot(h1.astype(jnp.bfloat16), w2_ref[...],
                 preferred_element_type=jnp.float32)
    h2 = jnp.maximum(h2 + b2_ref[...], 0.0)                            # [TB,1024] f32

    # Layer 3 (Linear(1000,5) + ReLU) on the MXU (K=1024 is real MXU work).
    h3 = jnp.dot(h2.astype(jnp.bfloat16), w3_ref[...],
                 preferred_element_type=jnp.float32)
    h3 = jnp.maximum(h3 + b3_ref[...], 0.0)                            # [TB,5] f32

    # Output layer (Linear(5,1), no activation). Computed as a Q·Kᵀ-style
    # dot_general (contract the 5-wide minor dims) so the result lands as a
    # lane-dense [1, TB] row -> full-vreg stores instead of masked 1-lane stores.
    out_row = jax.lax.dot_general(
        w4t_ref[...], h3, (((1,), (1,)), ((), ())),
        preferred_element_type=jnp.float32) + b4_ref[...]              # [1, TB]
    o_ref[0] = out_row.astype(o_ref.dtype)


def _round_up(x, m):
    return ((x + m - 1) // m) * m


def _resident_spec(shape):
    # Constant index_map -> block is fetched once and stays VMEM-resident;
    # Buffered(1) avoids double-buffering a block that never changes.
    return pl.BlockSpec(shape, lambda i: (0,) * len(shape),
                        pipeline_mode=pl.Buffered(1))


def simple_nn_forward(x, params, *, batch_tile=1024):
    """x: [B, 1] float32.  params: dict from init_params()."""
    B = x.shape[0]
    # Batch tile: multiple of 8 sublanes, capped at 1024 rows (v7x VMEM budget).
    batch_tile = min(_round_up(max(int(batch_tile), 8), 8), MAX_TB)

    Bp = _round_up(B, 8)
    if Bp < 16:
        TB = Bp                                    # one tiny tile
    elif Bp <= 2 * batch_tile:
        # Split into two tiles so ("parallel",) can use both v7x TensorCores.
        TB = _round_up(pl.cdiv(Bp, 2), 8)
    else:
        TB = batch_tile
    Bp = _round_up(B, TB)
    grid_n = Bp // TB
    if Bp != B:
        x = jnp.pad(x, ((0, Bp - B), (0, 0)))

    param_bytes = sum(int(v.size) * v.dtype.itemsize for v in params.values())
    cost = pl.CostEstimate(
        flops=2 * Bp * (D_IN * D_H1P + D_H1P * D_H2P + D_H2P * D_H3 + D_H3 * D_OUT),
        transcendentals=0,
        bytes_accessed=param_bytes + Bp * (D_IN + D_OUT) * 4,
    )

    out = pl.pallas_call(
        simple_nn_kernel,
        out_shape=jax.ShapeDtypeStruct((grid_n, 1, TB), jnp.float32),
        grid=(grid_n,),
        in_specs=[
            pl.BlockSpec((TB, D_IN), lambda i: (i, 0)),   # x    (batch-tiled)
            _resident_spec((D_IN, D_H1P)),                # w1   (VMEM-resident)
            _resident_spec((1, D_H1P)),                   # b1
            _resident_spec((D_H1P, D_H2P)),               # w2   (bf16, resident)
            _resident_spec((1, D_H2P)),                   # b2
            _resident_spec((D_H2P, D_H3)),                # w3   (bf16, resident)
            _resident_spec((1, D_H3)),                    # b3
            _resident_spec((1, D_H3)),                    # w4t  ([1,5] row)
            _resident_spec((1, D_OUT)),                   # b4
        ],
        out_specs=pl.BlockSpec((1, 1, TB), lambda i: (i, 0, 0)),
        compiler_params=pltpu.CompilerParams(
            # Batch tiles are independent -> shard across v7x's two TensorCores.
            dimension_semantics=("parallel",),
            # ~16-18 MB live at TB=1024; portable to v7x's 64 MiB physical VMEM.
            vmem_limit_bytes=32 << 20,
        ),
        cost_estimate=cost,
    )(x,
      params["w1"], params["b1"],
      params["w2"], params["b2"],
      params["w3"], params["b3"],
      params["w4t"], params["b4"])
    return out.reshape(Bp, 1)[:B]


def init_params(key):
    """Deterministic PyTorch-style (Kaiming-uniform-ish) init, kernel layout.

    Weights pre-transposed to [in, out]; hidden dims zero-padded 1000 -> 1024
    (padded rows/cols are exactly zero, so results are unchanged); w2/w3 stored
    bf16 (matmuls accumulate in f32); biases are [1, out] f32; last-layer weight
    kept as a [1, 5] row for the lane-dense dot_general.
    """
    dims = [(D_IN, D_H1), (D_H1, D_H2), (D_H2, D_H3), (D_H3, D_OUT)]
    raw = {}
    for idx, (fan_in, fan_out) in enumerate(dims, start=1):
        key, kw, kb = jax.random.split(key, 3)
        bound = 1.0 / float(fan_in) ** 0.5
        raw[f"w{idx}"] = jax.random.uniform(
            kw, (fan_in, fan_out), jnp.float32, minval=-bound, maxval=bound)
        raw[f"b{idx}"] = jax.random.uniform(
            kb, (1, fan_out), jnp.float32, minval=-bound, maxval=bound)

    def pad_to(a, shape):
        return jnp.pad(a, [(0, t - s) for s, t in zip(a.shape, shape)])

    return {
        "w1": pad_to(raw["w1"], (D_IN, D_H1P)),
        "b1": pad_to(raw["b1"], (1, D_H1P)),
        # TODO(synk): on v7x the MXU takes fp8 natively; w2 could be stored e4m3
        # (scale folded into b2) to halve the dominant weight DMA. Keep bf16 here.
        "w2": pad_to(raw["w2"], (D_H1P, D_H2P)).astype(jnp.bfloat16),
        "b2": pad_to(raw["b2"], (1, D_H2P)),
        "w3": pad_to(raw["w3"], (D_H2P, D_H3)).astype(jnp.bfloat16),
        "b3": raw["b3"],
        "w4t": raw["w4"].reshape(1, D_H3),
        "b4": raw["b4"],
    }


def reference_forward(x, params):
    """Pure-JAX reference with the same precision path as the kernel."""
    h1 = jnp.maximum(x * params["w1"] + params["b1"], 0.0)
    h2 = jnp.dot(h1.astype(jnp.bfloat16), params["w2"],
                 preferred_element_type=jnp.float32)
    h2 = jnp.maximum(h2 + params["b2"], 0.0)
    h3 = jnp.dot(h2.astype(jnp.bfloat16), params["w3"],
                 preferred_element_type=jnp.float32)
    h3 = jnp.maximum(h3 + params["b3"], 0.0)
    return jnp.sum(h3 * params["w4t"], axis=-1, keepdims=True) + params["b4"]


if __name__ == "__main__":
    key = jax.random.PRNGKey(0)
    key, kx = jax.random.split(key)

    B = 8
    x = jax.random.normal(kx, (B, D_IN), dtype=jnp.float32)
    params = init_params(key)

    out = jax.block_until_ready(simple_nn_forward(x, params))
    ref = reference_forward(x, params)

    assert out.shape == (B, D_OUT), out.shape
    assert jnp.allclose(out, ref, atol=1e-3, rtol=1e-3), "mismatch vs reference"

    print("KERNEL_OK")
</pallas_src>

<mosaic_0001>
module attributes {stable_mosaic.version = 11 : i64} {
  func.func @simple_nn_kernel(%arg0: i32, %arg1: memref<8x1xf32, #tpu.memory_space<vmem>>, %arg2: memref<1x1024xf32, #tpu.memory_space<vmem>>, %arg3: memref<1x1024xf32, #tpu.memory_space<vmem>>, %arg4: memref<1024x1024xbf16, #tpu.memory_space<vmem>>, %arg5: memref<1x1024xf32, #tpu.memory_space<vmem>>, %arg6: memref<1024x5xbf16, #tpu.memory_space<vmem>>, %arg7: memref<1x5xf32, #tpu.memory_space<vmem>>, %arg8: memref<1x5xf32, #tpu.memory_space<vmem>>, %arg9: memref<1x1xf32, #tpu.memory_space<vmem>>, %arg10: memref<1x1x8xf32, #tpu.memory_space<vmem>>) attributes {dimension_semantics = [#tpu.dimension_semantics<parallel>], iteration_bounds = array<i64: 1>, scalar_prefetch = 0 : i64, scratch_operands = 0 : i64, tpu.core_type = #tpu.core_type<tc>, window_params = [{transform_indices = @transform_0, window_bounds = array<i64: 8, 1>}, {pipeline_mode = #tpu.pipeline_mode<synchronous>, transform_indices = @transform_1, window_bounds = array<i64: 1, 1024>}, {pipeline_mode = #tpu.pipeline_mode<synchronous>, transform_indices = @transform_2, window_bounds = array<i64: 1, 1024>}, {pipeline_mode = #tpu.pipeline_mode<synchronous>, transform_indices = @transform_3, window_bounds = array<i64: 1024, 1024>}, {pipeline_mode = #tpu.pipeline_mode<synchronous>, transform_indices = @transform_4, window_bounds = array<i64: 1, 1024>}, {pipeline_mode = #tpu.pipeline_mode<synchronous>, transform_indices = @transform_5, window_bounds = array<i64: 1024, 5>}, {pipeline_mode = #tpu.pipeline_mode<synchronous>, transform_indices = @transform_6, window_bounds = array<i64: 1, 5>}, {pipeline_mode = #tpu.pipeline_mode<synchronous>, transform_indices = @transform_7, window_bounds = array<i64: 1, 5>}, {pipeline_mode = #tpu.pipeline_mode<synchronous>, transform_indices = @transform_8, window_bounds = array<i64: 1, 1>}, {transform_indices = @transform_9, window_bounds = array<i64: 1, 1, 8>}]} {
    %c0 = arith.constant 0 : index
    %c0_0 = arith.constant 0 : index
    %0 = vector.load %arg1[%c0, %c0_0] : memref<8x1xf32, #tpu.memory_space<vmem>>, vector<8x1xf32>
    %c0_1 = arith.constant 0 : index
    %c0_2 = arith.constant 0 : index
    %1 = vector.load %arg2[%c0_1, %c0_2] : memref<1x1024xf32, #tpu.memory_space<vmem>>, vector<1x1024xf32>
    %2 = vector.broadcast %0 : vector<8x1xf32> to vector<8x1024xf32>
    %3 = vector.broadcast %1 : vector<1x1024xf32> to vector<8x1024xf32>
    %4 = arith.mulf %2, %3 : vector<8x1024xf32>
    %c0_3 = arith.constant 0 : index
    %c0_4 = arith.constant 0 : index
    %5 = vector.load %arg3[%c0_3, %c0_4] : memref<1x1024xf32, #tpu.memory_space<vmem>>, vector<1x1024xf32>
    %6 = vector.broadcast %5 : vector<1x1024xf32> to vector<8x1024xf32>
    %7 = arith.addf %4, %6 : vector<8x1024xf32>
    %cst = arith.constant 0.000000e+00 : f32
    %8 = vector.broadcast %cst : f32 to vector<8x1024xf32>
    %9 = arith.maximumf %7, %8 : vector<8x1024xf32>
    %10 = arith.truncf %9 : vector<8x1024xf32> to vector<8x1024xbf16>
    %c0_5 = arith.constant 0 : index
    %c0_6 = arith.constant 0 : index
    %11 = vector.load %arg4[%c0_5, %c0_6] : memref<1024x1024xbf16, #tpu.memory_space<vmem>>, vector<1024x1024xbf16>
    %cst_7 = arith.constant dense<0.000000e+00> : vector<8x1024xf32>
    %12 = tpu.matmul %10, %11, %cst_7 {dimension_numbers = #tpu.dot_dimension_numbers<[1], [0], [0], [1], [0, 0, 1, 1], [], []>} : vector<8x1024xbf16>, vector<1024x1024xbf16>, vector<8x1024xf32> -> vector<8x1024xf32>
    %c0_8 = arith.constant 0 : index
    %c0_9 = arith.constant 0 : index
    %13 = vector.load %arg5[%c0_8, %c0_9] : memref<1x1024xf32, #tpu.memory_space<vmem>>, vector<1x1024xf32>
    %14 = vector.broadcast %13 : vector<1x1024xf32> to vector<8x1024xf32>
    %15 = arith.addf %12, %14 : vector<8x1024xf32>
    %cst_10 = arith.constant 0.000000e+00 : f32
    %16 = vector.broadcast %cst_10 : f32 to vector<8x1024xf32>
    %17 = arith.maximumf %15, %16 : vector<8x1024xf32>
    %18 = arith.truncf %17 : vector<8x1024xf32> to vector<8x1024xbf16>
    %c0_11 = arith.constant 0 : index
    %c0_12 = arith.constant 0 : index
    %19 = vector.load %arg6[%c0_11, %c0_12] : memref<1024x5xbf16, #tpu.memory_space<vmem>>, vector<1024x5xbf16>
    %cst_13 = arith.constant dense<0.000000e+00> : vector<8x5xf32>
    %20 = tpu.matmul %18, %19, %cst_13 {dimension_numbers = #tpu.dot_dimension_numbers<[1], [0], [0], [1], [0, 0, 1, 1], [], []>} : vector<8x1024xbf16>, vector<1024x5xbf16>, vector<8x5xf32> -> vector<8x5xf32>
    %c0_14 = arith.constant 0 : index
    %c0_15 = arith.constant 0 : index
    %21 = vector.load %arg7[%c0_14, %c0_15] : memref<1x5xf32, #tpu.memory_space<vmem>>, vector<1x5xf32>
    %22 = vector.broadcast %21 : vector<1x5xf32> to vector<8x5xf32>
    %23 = arith.addf %20, %22 : vector<8x5xf32>
    %cst_16 = arith.constant 0.000000e+00 : f32
    %24 = vector.broadcast %cst_16 : f32 to vector<8x5xf32>
    %25 = arith.maximumf %23, %24 : vector<8x5xf32>
    %c0_17 = arith.constant 0 : index
    %c0_18 = arith.constant 0 : index
    %26 = vector.load %arg8[%c0_17, %c0_18] : memref<1x5xf32, #tpu.memory_space<vmem>>, vector<1x5xf32>
    %cst_19 = arith.constant dense<0.000000e+00> : vector<1x8xf32>
    %27 = tpu.matmul %26, %25, %cst_19 {dimension_numbers = #tpu.dot_dimension_numbers<[1], [1], [0], [0], [0, 0, 1, 0], [], []>} : vector<1x5xf32>, vector<8x5xf32>, vector<1x8xf32> -> vector<1x8xf32>
    %c0_20 = arith.constant 0 : index
    %c0_21 = arith.constant 0 : index
    %28 = vector.load %arg9[%c0_20, %c0_21] : memref<1x1xf32, #tpu.memory_space<vmem>>, vector<1x1xf32>
    %29 = vector.broadcast %28 : vector<1x1xf32> to vector<1x8xf32>
    %30 = arith.addf %27, %29 : vector<1x8xf32>
    %c0_22 = arith.constant 0 : index
    %c0_23 = arith.constant 0 : index
    %c0_24 = arith.constant 0 : index
    %31 = vector.load %arg10[%c0_22, %c0_23, %c0_24] : memref<1x1x8xf32, #tpu.memory_space<vmem>>, vector<1x1x8xf32>
    %32 = vector.shape_cast %31 : vector<1x1x8xf32> to vector<1x8xf32>
    %33 = vector.shape_cast %30 : vector<1x8xf32> to vector<1x1x8xf32>
    tpu.vector_store %arg10[%c0_22, %c0_23, %c0_24], %33 {strides = array<i32>} : memref<1x1x8xf32, #tpu.memory_space<vmem>>, vector<1x1x8xf32>,
    return
  }
  func.func @transform_0(%arg0: i32) -> (i32, i32) {
    %c0_i32 = arith.constant 0 : i32
    %c0_i32_0 = arith.constant 0 : i32
    return %arg0, %c0_i32 : i32, i32
  }
  func.func @transform_1(%arg0: i32) -> (i32, i32) {
    %c0_i32 = arith.constant 0 : i32
    %c0_i32_0 = arith.constant 0 : i32
    %c0_i32_1 = arith.constant 0 : i32
    return %c0_i32, %c0_i32_0 : i32, i32
  }
  func.func @transform_2(%arg0: i32) -> (i32, i32) {
    %c0_i32 = arith.constant 0 : i32
    %c0_i32_0 = arith.constant 0 : i32
    %c0_i32_1 = arith.constant 0 : i32
    return %c0_i32, %c0_i32_0 : i32, i32
  }
  func.func @transform_3(%arg0: i32) -> (i32, i32) {
    %c0_i32 = arith.constant 0 : i32
    %c0_i32_0 = arith.constant 0 : i32
    %c0_i32_1 = arith.constant 0 : i32
    return %c0_i32, %c0_i32_0 : i32, i32
  }
  func.func @transform_4(%arg0: i32) -> (i32, i32) {
    %c0_i32 = arith.constant 0 : i32
    %c0_i32_0 = arith.constant 0 : i32
    %c0_i32_1 = arith.constant 0 : i32
    return %c0_i32, %c0_i32_0 : i32, i32
  }
  func.func @transform_5(%arg0: i32) -> (i32, i32) {
    %c0_i32 = arith.constant 0 : i32
    %c0_i32_0 = arith.constant 0 : i32
    %c0_i32_1 = arith.constant 0 : i32
    return %c0_i32, %c0_i32_0 : i32, i32
  }
  func.func @transform_6(%arg0: i32) -> (i32, i32) {
    %c0_i32 = arith.constant 0 : i32
    %c0_i32_0 = arith.constant 0 : i32
    %c0_i32_1 = arith.constant 0 : i32
    return %c0_i32, %c0_i32_0 : i32, i32
  }
  func.func @transform_7(%arg0: i32) -> (i32, i32) {
    %c0_i32 = arith.constant 0 : i32
    %c0_i32_0 = arith.constant 0 : i32
    %c0_i32_1 = arith.constant 0 : i32
    return %c0_i32, %c0_i32_0 : i32, i32
  }
  func.func @transform_8(%arg0: i32) -> (i32, i32) {
    %c0_i32 = arith.constant 0 : i32
    %c0_i32_0 = arith.constant 0 : i32
    %c0_i32_1 = arith.constant 0 : i32
    return %c0_i32, %c0_i32_0 : i32, i32
  }
  func.func @transform_9(%arg0: i32) -> (i32, i32, i32) {
    %c0_i32 = arith.constant 0 : i32
    %c0_i32_0 = arith.constant 0 : i32
    %c0_i32_1 = arith.constant 0 : i32
    return %arg0, %c0_i32, %c0_i32_0 : i32, i32, i32
  }
}

</mosaic_0001>

<bundles_post_ra>
// kernel: tpu_custom_call.1
= control target key start
LH: loop header
LB: loop body
LE: loop exit
PB: predicated region body
PF: predicated region fallthrough
CT: control target
= control target key end

     0   :  { %s6274_s0 = inlined_call_operand.vmem [shape: f32[8,1], index: 0, kind: input, shape index: {}]   ;;  %s6275_s1 = inlined_call_operand.hbm [shape: f32[1,1024], index: 1, kind: input, shape index: {}]   ;;  %s6276_s2 = inlined_call_operand.hbm [shape: f32[1,1024], index: 2, kind: input, shape index: {}]   ;;  %s6277_s3 = inlined_call_operand.hbm [shape: bf16[1024,1024], index: 3, kind: input, shape index: {}]   ;;  %s6278_s4 = inlined_call_operand.hbm [shape: f32[1,1024], index: 4, kind: input, shape index: {}]   ;;  %s6279_s5 = inlined_call_operand.vmem [shape: bf16[1024,5], index: 5, kind: input, shape index: {}]   ;;  %s6280_s6 = inlined_call_operand.hbm [shape: f32[1,5], index: 6, kind: input, shape index: {}]   ;;  %s6281_s7 = inlined_call_operand.hbm [shape: f32[1,5], index: 7, kind: input, shape index: {}]   ;;  %s6282_s8 = inlined_call_operand.<no memory space> [shape: f32[1,1], index: 8, kind: input, shape index: {}]   ;;  %s6283_s9 = inlined_call_operand.hbm [shape: f32[1,1,8], index: 9, kind: output, shape index: {}]  }
   0x1   :  { %v14_v0 = vstv %s6282_s8 }
   0x2   :  { %15 = vst [vmem:[#allocation2] sm:$0x1] %v14_v0 }
   0x3   :  { %16 = vsyncpa [#allocation4], 0 }
   0x4   :  { %17 = vsyncpa [#allocation7], 0 }
   0x5   :  { %18 = vsyncpa [#allocation10], 0 }
   0x6   :  { %19 = vsyncpa [#allocation13], 0 }
   0x7   :  { %20 = vsyncpa [#allocation5], 0  ;;  %s5775_s11 = smov [#allocation6]   ;;  %s5776_s13 = smov [#allocation9]  }
   0x8   :  { %s39_s12 = sshll.u32 %s5775_s11, 4  ;;  %s61_s14 = sshll.u32 %s5776_s13, 4  ;;  %s40_s12 = int_to_ptr.vmem [resolvable:$true] %s39_s12  ;;  %s62_s14 = int_to_ptr.vmem [resolvable:$true] %s61_s14 }
   0x9   :  { %s5611_s17 = scalar_lea.hbm %s6276_s2, 128 }
   0xa   :  { %p5612_p0 = scmp.ne.s32.totalorder %s6276_s2, %s5611_s17  ;;  %p5615_p1 = scmp.lt.u32.totalorder %s5611_s17, %s6276_s2 }
   0xc   :  { %p5617_p2 = pnand %p5615_p1, %p5612_p0 }
   0xe   :  { %5620 = shalt.err (!%p5617_p2)
}
   0xf   :  { %s5621_s21 = scalar_lea.vmem %s40_s12, 128  ;;  %p5626_p4 = scmp.lt.s32.totalorder %s40_s12, %s40_s12 }
  0x10   :  { %p5622_p3 = scmp.ne.s32.totalorder %s40_s12, %s5621_s21  ;;  %p5627_p5 = scmp.lt.s32.totalorder %s5621_s21, %s5621_s21 }
  0x12   :  { %p5628_p6 = por %p5627_p5, %p5626_p4 }
  0x14   :  { %p5629_p7 = pnand %p5628_p6, %p5622_p3 }
  0x16   :  { %5632 = shalt.err (!%p5629_p7)
}
  0x17   :  { %42 = dma.hbm_to_vmem [thread:$0]  %s6276_s2, 128, %s40_s12, [#allocation7]  }
  0x18   :  { %s5633_s26 = scalar_lea.hbm %s6278_s4, 128 }
  0x19   :  { %p5634_p8 = scmp.ne.s32.totalorder %s6278_s4, %s5633_s26  ;;  %p5637_p9 = scmp.lt.u32.totalorder %s5633_s26, %s6278_s4 }
  0x1b   :  { %p5639_p10 = pnand %p5637_p9, %p5634_p8 }
  0x1d   :  { %5642 = shalt.err (!%p5639_p10)
}
  0x1e   :  { %s5643_s10 = scalar_lea.vmem %s62_s14, 128  ;;  %p5648_p12 = scmp.lt.s32.totalorder %s62_s14, %s62_s14 }
  0x1f   :  { %p5644_p11 = scmp.ne.s32.totalorder %s62_s14, %s5643_s10  ;;  %p5649_p13 = scmp.lt.s32.totalorder %s5643_s10, %s5643_s10 }
  0x21   :  { %p5650_p0 = por %p5649_p13, %p5648_p12 }
  0x23   :  { %p5651_p1 = pnand %p5650_p0, %p5644_p11 }
  0x25   :  { %5654 = shalt.err (!%p5651_p1)
}
  0x26   :  { %64 = dma.hbm_to_vmem [thread:$0]  %s6278_s4, 128, %s62_s14, [#allocation10]  }
  0x27   :  { %s5777_s12 = smov [#allocation3]   ;;  %s5778_s15 = smov [#allocation8]  }
  0x28   :  { %s29_s13 = sshll.u32 %s5777_s12, 4  ;;  %s48_s16 = sshll.u32 %s5778_s15, 4  ;;  %s30_s13 = int_to_ptr.vmem [resolvable:$true] %s29_s13  ;;  %s5864_s16 = int_to_ptr.vmem [resolvable:$true] %s48_s16 }
  0x29   :  { %s5655_s19 = scalar_lea.hbm %s6275_s1, 128 }
  0x2a   :  { %p5656_p2 = scmp.ne.s32.totalorder %s6275_s1, %s5655_s19  ;;  %p5659_p3 = scmp.lt.u32.totalorder %s5655_s19, %s6275_s1 }
  0x2c   :  { %p5661_p4 = pnand %p5659_p3, %p5656_p2 }
  0x2e   :  { %5664 = shalt.err (!%p5661_p4)
}
  0x2f   :  { %s5665_s4 = scalar_lea.vmem %s30_s13, 128  ;;  %p5670_p6 = scmp.lt.s32.totalorder %s30_s13, %s30_s13 }
  0x30   :  { %p5666_p5 = scmp.ne.s32.totalorder %s30_s13, %s5665_s4  ;;  %p5671_p7 = scmp.lt.s32.totalorder %s5665_s4, %s5665_s4 }
  0x32   :  { %p5672_p8 = por %p5671_p7, %p5670_p6 }
  0x34   :  { %p5673_p9 = pnand %p5672_p8, %p5666_p5 }
  0x36   :  { %5676 = shalt.err (!%p5673_p9)
}
  0x37   :  { %32 = dma.hbm_to_vmem [thread:$0]  %s6275_s1, 128, %s30_s13, [#allocation4]  }
  0x38   :  { %s5677_s26 = scalar_lea.hbm %s6277_s3, 65536 }
  0x39   :  { %p5678_p10 = scmp.ne.s32.totalorder %s6277_s3, %s5677_s26  ;;  %p5681_p11 = scmp.lt.u32.totalorder %s5677_s26, %s6277_s3 }
  0x3b   :  { %p5683_p12 = pnand %p5681_p11, %p5678_p10 }
  0x3d   :  { %5686 = shalt.err (!%p5683_p12)
}
  0x3e   :  { %s5687_s10 = scalar_lea.vmem %s5864_s16, 65536  ;;  %p5692_p0 = scmp.lt.s32.totalorder %s5864_s16, %s5864_s16 }
  0x3f   :  { %p5688_p13 = scmp.ne.s32.totalorder %s5864_s16, %s5687_s10  ;;  %p5693_p1 = scmp.lt.s32.totalorder %s5687_s10, %s5687_s10 }
  0x41   :  { %p5694_p2 = por %p5693_p1, %p5692_p0 }
  0x43   :  { %p5695_p3 = pnand %p5694_p2, %p5688_p13 }
  0x45   :  { %5698 = shalt.err (!%p5695_p3)
}
  0x46   :  { %s5779_s1 = smov 512   ;;  %s5780_s2 = smov 32  }
  0x47   :  { %54 = dma.hbm_to_vmem [thread:$0]  %s6277_s3, 65536, %s5864_s16, [#allocation7], %s5779_s1, %s5779_s1, %s5780_s2  }
  0x48   :  { %s5781_s13 = smov [#allocation11]   ;;  %s5782_s17 = smov [#allocation12]  }
  0x49   :  { %s73_s15 = sshll.u32 %s5781_s13, 4  ;;  %s83_s18 = sshll.u32 %s5782_s17, 4  ;;  %s74_s15 = int_to_ptr.vmem [resolvable:$true] %s73_s15  ;;  %s84_s18 = int_to_ptr.vmem [resolvable:$true] %s83_s18 }
  0x4a   :  { %s5699_s20 = scalar_lea.hbm %s6280_s6, 16 }
  0x4b   :  { %p5700_p4 = scmp.ne.s32.totalorder %s6280_s6, %s5699_s20  ;;  %p5703_p5 = scmp.lt.u32.totalorder %s5699_s20, %s6280_s6 }
  0x4d   :  { %p5705_p6 = pnand %p5703_p5, %p5700_p4 }
  0x4f   :  { %5708 = shalt.err (!%p5705_p6)
}
  0x50   :  { %s5709_s3 = scalar_lea.vmem %s74_s15, 16  ;;  %s5713_s16 = scalar_lea.vmem %s74_s15, 32 }
  0x51   :  { %p5710_p7 = scmp.ne.s32.totalorder %s74_s15, %s5709_s3  ;;  %p5714_p8 = scmp.lt.s32.totalorder %s74_s15, %s74_s15 }
  0x52   :  { %p5715_p9 = scmp.lt.s32.totalorder %s5713_s16, %s5709_s3 }
  0x54   :  { %p5716_p10 = por %p5715_p9, %p5714_p8 }
  0x56   :  { %p5717_p11 = pnand %p5716_p10, %p5710_p7 }
  0x58   :  { %5720 = shalt.err (!%p5717_p11)
}
  0x59   :  { %76 = dma.hbm_to_vmem [thread:$0]  %s6280_s6, 16, %s74_s15, [#allocation10]  }
  0x5a   :  { %s5721_s27 = scalar_lea.hbm %s6281_s7, 16 }
  0x5b   :  { %p5722_p12 = scmp.ne.s32.totalorder %s6281_s7, %s5721_s27  ;;  %p5725_p13 = scmp.lt.u32.totalorder %s5721_s27, %s6281_s7 }
  0x5d   :  { %p5727_p0 = pnand %p5725_p13, %p5722_p12 }
  0x5f   :  { %5730 = shalt.err (!%p5727_p0)
}
  0x60   :  { %s5731_s1 = scalar_lea.vmem %s84_s18, 16  ;;  %s5735_s2 = scalar_lea.vmem %s84_s18, 32 }
  0x61   :  { %p5732_p1 = scmp.ne.s32.totalorder %s84_s18, %s5731_s1  ;;  %p5736_p2 = scmp.lt.s32.totalorder %s84_s18, %s84_s18 }
  0x62   :  { %p5737_p3 = scmp.lt.s32.totalorder %s5735_s2, %s5731_s1 }
  0x64   :  { %p5738_p4 = por %p5737_p3, %p5736_p2 }
  0x66   :  { %p5739_p5 = pnand %p5738_p4, %p5732_p1 }
  0x68   :  { %5742 = shalt.err (!%p5739_p5)
}
  0x69   :  { %86 = dma.hbm_to_vmem [thread:$0]  %s6281_s7, 16, %s84_s18, [#allocation13]  }
  0x6a   :  { %5765 = dma.done.wait [#allocation4], 128  }
  0x6b   :  { %5766 = vsyncadd [#allocation4], 4294967168 }
  0x6c   :  { %5767 = dma.done.wait [#allocation7], 65664  }
  0x6d   :  { %5768 = vsyncadd [#allocation7], 4294901632 }
  0x6e   :  { %5769 = dma.done.wait [#allocation10], 144  }
  0x6f   :  { %5770 = vsyncadd [#allocation10], 4294967152 }
  0x70   :  { %5771 = dma.done.wait [#allocation13], 16  }
  0x71   :  { %5772 = vsyncadd [#allocation13], 4294967280  ;;  %v5783_v1 = vmov 0   ;;  %v108_v2 = vld [vmem:[%s6274_s0] sm:$0xff]  ;;  %v230_v4 = vld [vmem:[#allocation8] sm:$0xff]  ;;  %vm5785_vm0 = vmmov 0  }
  0x72   :  { %5546 = vset.pattern.permute.xlu0 %v5783_v1  ;;  %v4697_v3 = vld [vmem:[#allocation2] sm:$0x1]  ;;  %v234_v5 = vld [vmem:[#allocation8 + $0x20] sm:$0xff]  ;;  %vm4707_vm1 = vcmask 39936   ;;  %vm4784_vm2 = vcmask 57344  }
  0x73   :  { %112 = vperm.xlu0 %5546, %v108_v2   ;;  %v231_v6 = vld [vmem:[#allocation8 + $0x8] sm:$0xff]  ;;  %v4805_v8 = vcombine.high %v230_v4, %v234_v5  ;;  %v4804_v10 = vcombine.low %v230_v4, %v234_v5  ;;  %v238_v12 = vld [vmem:[#allocation8 + $0x40] sm:$0xff] }
  0x74   :  { %v235_v7 = vld [vmem:[#allocation8 + $0x28] sm:$0xff]  ;;  %v242_v13 = vld [vmem:[#allocation8 + $0x60] sm:$0xff] }
  0x75   :  { %v4807_v9 = vcombine.high %v231_v6, %v235_v7  ;;  %v4806_v11 = vcombine.low %v231_v6, %v235_v7  ;;  %v239_v14 = vld [vmem:[#allocation8 + $0x48] sm:$0xff]  ;;  %v4813_v15 = vcombine.high %v238_v12, %v242_v13  ;;  %v246_v17 = vld [vmem:[#allocation8 + $0x80] sm:$0xff]  ;;  %3344 = vmatprep.subr.bf16.mxu0 %v4805_v8  ;;  %v4812_v22 = vcombine.low %v238_v12, %v242_v13 }
  0x76   :  { %v243_v16 = vld [vmem:[#allocation8 + $0x68] sm:$0xff]  ;;  %v250_v18 = vld [vmem:[#allocation8 + $0xa0] sm:$0xff]  ;;  %3345 = vmatpush1.bf16.msra.mxu0 %v4804_v10 }
  0x77   :  { %3508 = vmatprep.subr.bf16.mxu1 %v4807_v9  ;;  %v4815_v19 = vcombine.high %v239_v14, %v243_v16  ;;  %v247_v20 = vld [vmem:[#allocation8 + $0x88] sm:$0xff]  ;;  %4700 = vperm.xlu0 %5546, %v4697_v3   ;;  %v4814_v23 = vcombine.low %v239_v14, %v243_v16  ;;  %v4821_v24 = vcombine.high %v246_v17, %v250_v18  ;;  %v254_v26 = vld [vmem:[#allocation8 + $0xc0] sm:$0xff] }
  0x78   :  { %v251_v21 = vld [vmem:[#allocation8 + $0xa8] sm:$0xff]  ;;  %3509 = vmatpush1.bf16.msra.mxu1 %v4806_v11  ;;  %3346 = vmatprep.subr.bf16.mxu0 %v4813_v15  ;;  %v258_v27 = vld [vmem:[#allocation8 + $0xe0] sm:$0xff]  ;;  %v4820_v30 = vcombine.low %v246_v17, %v250_v18 }
  0x79   :  { %3510 = vmatprep.subr.bf16.mxu1 %v4815_v19  ;;  %v4823_v25 = vcombine.high %v247_v20, %v251_v21  ;;  %v255_v28 = vld [vmem:[#allocation8 + $0xc8] sm:$0xff]  ;;  %v4822_v31 = vcombine.low %v247_v20, %v251_v21  ;;  %v4829_v32 = vcombine.high %v254_v26, %v258_v27  ;;  %v262_v34 = vld [vmem:[#allocation8 + $0x100] sm:$0xff]  ;;  %v4828_v38 = vcombine.low %v254_v26, %v258_v27 }
  0x7a   :  { %v259_v29 = vld [vmem:[#allocation8 + $0xe8] sm:$0xff]  ;;  %3347 = vmatpush1.bf16.msra.mxu0 %v4812_v22  ;;  %v266_v35 = vld [vmem:[#allocation8 + $0x120] sm:$0xff] }
  0x7b   :  { %3348 = vmatprep.subr.bf16.mxu0 %v4821_v24  ;;  %v4831_v33 = vcombine.high %v255_v28, %v259_v29  ;;  %v263_v36 = vld [vmem:[#allocation8 + $0x108] sm:$0xff]  ;;  %v4830_v39 = vcombine.low %v255_v28, %v259_v29  ;;  %v4837_v40 = vcombine.high %v262_v34, %v266_v35  ;;  %v270_v42 = vld [vmem:[#allocation8 + $0x140] sm:$0xff]  ;;  %v4836_v46 = vcombine.low %v262_v34, %v266_v35 }
  0x7c   :  { %3511 = vmatpush1.bf16.msra.mxu1 %v4814_v23  ;;  %v267_v37 = vld [vmem:[#allocation8 + $0x128] sm:$0xff]  ;;  %v274_v43 = vld [vmem:[#allocation8 + $0x160] sm:$0xff] }
  0x7d   :  { %3512 = vmatprep.subr.bf16.mxu1 %v4823_v25  ;;  %v4839_v41 = vcombine.high %v263_v36, %v267_v37  ;;  %v271_v44 = vld [vmem:[#allocation8 + $0x148] sm:$0xff]  ;;  %v4838_v47 = vcombine.low %v263_v36, %v267_v37  ;;  %v4845_v48 = vcombine.high %v270_v42, %v274_v43  ;;  %v278_v50 = vld [vmem:[#allocation8 + $0x180] sm:$0xff]  ;;  %v4844_v54 = vcombine.low %v270_v42, %v274_v43 }
  0x7e   :  { %3349 = vmatpush1.bf16.msra.mxu0 %v4820_v30  ;;  %v275_v45 = vld [vmem:[#allocation8 + $0x168] sm:$0xff]  ;;  %v282_v51 = vld [vmem:[#allocation8 + $0x1a0] sm:$0xff] }
  0x7f   :  { %3350 = vmatprep.subr.bf16.mxu0 %v4829_v32  ;;  %v4847_v49 = vcombine.high %v271_v44, %v275_v45  ;;  %v279_v52 = vld [vmem:[#allocation8 + $0x188] sm:$0xff]  ;;  %v4846_v55 = vcombine.low %v271_v44, %v275_v45  ;;  %v4853_v56 = vcombine.high %v278_v50, %v282_v51  ;;  %v286_v57 = vld [vmem:[#allocation8 + $0x1c0] sm:$0xff]  ;;  %v4852_v4 = vcombine.low %v278_v50, %v282_v51 }
  0x80   :  { %3513 = vmatpush1.bf16.msra.mxu1 %v4822_v31  ;;  %v283_v53 = vld [vmem:[#allocation8 + $0x1a8] sm:$0xff]  ;;  %v290_v58 = vld [vmem:[#allocation8 + $0x1e0] sm:$0xff] }
  0x81   :  { %3514 = vmatprep.subr.bf16.mxu1 %v4831_v33  ;;  %v5922_v59 = vld [vmem:[#allocation8 + $0x400] sm:$0xff]  ;;  %v4855_v60 = vcombine.high %v279_v52, %v283_v53  ;;  %v5926_v62 = vld [vmem:[#allocation8 + $0x408] sm:$0xff]  ;;  %v4854_v5 = vcombine.low %v279_v52, %v283_v53  ;;  %v4861_v6 = vcombine.high %v286_v57, %v290_v58  ;;  %v4860_v12 = vcombine.low %v286_v57, %v290_v58 }
  0x82   :  { %3351 = vmatpush1.bf16.msra.mxu0 %v4828_v38  ;;  %v5924_v61 = vld [vmem:[#allocation8 + $0x420] sm:$0xff]  ;;  %v5928_v63 = vld [vmem:[#allocation8 + $0x428] sm:$0xff] }
  0x83   :  { %3352 = vmatprep.subr.bf16.mxu0 %v4837_v40  ;;  %v287_v0 = vld [vmem:[#allocation8 + $0x1c8] sm:$0xff]  ;;  %v4932_v2 = vcombine.low %v5922_v59, %v5924_v61  ;;  %v4934_v3 = vcombine.low %v5926_v62, %v5928_v63  ;;  %v294_v8 = vld [vmem:[#allocation8 + $0x200] sm:$0xff] }
  0x84   :  { %3515 = vmatpush1.bf16.msra.mxu1 %v4830_v39  ;;  %v291_v1 = vld [vmem:[#allocation8 + $0x1e8] sm:$0xff]  ;;  %v298_v9 = vld [vmem:[#allocation8 + $0x220] sm:$0xff] }
  0x85   :  { %3516 = vmatprep.subr.bf16.mxu1 %v4839_v41  ;;  %v4863_v7 = vcombine.high %v287_v0, %v291_v1  ;;  %v295_v10 = vld [vmem:[#allocation8 + $0x208] sm:$0xff]  ;;  %v4862_v13 = vcombine.low %v287_v0, %v291_v1  ;;  %v4869_v14 = vcombine.high %v294_v8, %v298_v9  ;;  %v302_v16 = vld [vmem:[#allocation8 + $0x240] sm:$0xff]  ;;  %v4868_v20 = vcombine.low %v294_v8, %v298_v9 }
  0x86   :  { %3353 = vmatpush1.bf16.msra.mxu0 %v4836_v46  ;;  %v299_v11 = vld [vmem:[#allocation8 + $0x228] sm:$0xff]  ;;  %v306_v17 = vld [vmem:[#allocation8 + $0x260] sm:$0xff] }
  0x87   :  { %3354 = vmatprep.subr.bf16.mxu0 %v4845_v48  ;;  %v4871_v15 = vcombine.high %v295_v10, %v299_v11  ;;  %v303_v18 = vld [vmem:[#allocation8 + $0x248] sm:$0xff]  ;;  %v4870_v21 = vcombine.low %v295_v10, %v299_v11  ;;  %v4877_v22 = vcombine.high %v302_v16, %v306_v17  ;;  %v310_v24 = vld [vmem:[#allocation8 + $0x280] sm:$0xff]  ;;  %v4876_v28 = vcombine.low %v302_v16, %v306_v17 }
  0x88   :  { %3517 = vmatpush1.bf16.msra.mxu1 %v4838_v47  ;;  %v307_v19 = vld [vmem:[#allocation8 + $0x268] sm:$0xff]  ;;  %v314_v25 = vld [vmem:[#allocation8 + $0x2a0] sm:$0xff]  ;;  %v4933_v16 = vcombine.high %v5922_v59, %v5924_v61  ;;  %v4935_v17 = vcombine.high %v5926_v62, %v5928_v63 }
  0x89   :  { %3518 = vmatprep.subr.bf16.mxu1 %v4847_v49  ;;  %v4879_v23 = vcombine.high %v303_v18, %v307_v19  ;;  %v311_v26 = vld [vmem:[#allocation8 + $0x288] sm:$0xff]  ;;  %v4878_v29 = vcombine.low %v303_v18, %v307_v19  ;;  %v4885_v30 = vcombine.high %v310_v24, %v314_v25  ;;  %v318_v32 = vld [vmem:[#allocation8 + $0x2c0] sm:$0xff]  ;;  %v4884_v36 = vcombine.low %v310_v24, %v314_v25  ;;  %v109_v24 = vld [vmem:[#allocation3] sm:$0xff] }
  0x8a   :  { %3355 = vmatpush1.bf16.msra.mxu0 %v4844_v54  ;;  %v315_v27 = vld [vmem:[#allocation8 + $0x2a8] sm:$0xff]  ;;  %v322_v33 = vld [vmem:[#allocation8 + $0x2e0] sm:$0xff]  ;;  %v116_v18 = vlaneseq }
  0x8b   :  { %3356 = vmatprep.subr.bf16.mxu0 %v4853_v56  ;;  %v4887_v31 = vcombine.high %v311_v26, %v315_v27  ;;  %v319_v34 = vld [vmem:[#allocation8 + $0x2c8] sm:$0xff]  ;;  %v4886_v37 = vcombine.low %v311_v26, %v315_v27  ;;  %v4893_v38 = vcombine.high %v318_v32, %v322_v33  ;;  %v326_v40 = vld [vmem:[#allocation8 + $0x300] sm:$0xff]  ;;  %v4892_v44 = vcombine.low %v318_v32, %v322_v33  ;;  %v164_v26 = vld [vmem:[#allocation6] sm:$0xff] }
  0x8c   :  { %3519 = vmatpush1.bf16.msra.mxu1 %v4846_v55  ;;  %v323_v35 = vld [vmem:[#allocation8 + $0x2e8] sm:$0xff]  ;;  %v330_v41 = vld [vmem:[#allocation8 + $0x320] sm:$0xff]  ;;  %v117_v19 = vshrl.u32 %v116_v18, 7 }
  0x8d   :  { %3520 = vmatprep.subr.bf16.mxu1 %v4855_v60  ;;  %v4895_v39 = vcombine.high %v319_v34, %v323_v35  ;;  %v327_v42 = vld [vmem:[#allocation8 + $0x308] sm:$0xff]  ;;  %v4894_v45 = vcombine.low %v319_v34, %v323_v35  ;;  %v4901_v46 = vcombine.high %v326_v40, %v330_v41  ;;  %v334_v48 = vld [vmem:[#allocation8 + $0x340] sm:$0xff]  ;;  %v4900_v52 = vcombine.low %v326_v40, %v330_v41 }
  0x8e   :  { %3357 = vmatpush1.bf16.msra.mxu0 %v4852_v4  ;;  %v331_v43 = vld [vmem:[#allocation8 + $0x328] sm:$0xff]  ;;  %v338_v49 = vld [vmem:[#allocation8 + $0x360] sm:$0xff]  ;;  %v5946_v25 = vsub.s32 5, %v117_v19  ;;  %v5948_v27 = vsub.s32 4, %v117_v19 }
  0x8f   :  { %3358 = vmatprep.subr.bf16.mxu0 %v4861_v6  ;;  %v4903_v47 = vcombine.high %v327_v42, %v331_v43  ;;  %v335_v50 = vld [vmem:[#allocation8 + $0x348] sm:$0xff]  ;;  %v4902_v53 = vcombine.low %v327_v42, %v331_v43  ;;  %v4909_v54 = vcombine.high %v334_v48, %v338_v49  ;;  %v342_v56 = vld [vmem:[#allocation8 + $0x380] sm:$0xff]  ;;  %v4908_v0 = vcombine.low %v334_v48, %v338_v49 }
  0x90   :  { %3521 = vmatpush1.bf16.msra.mxu1 %v4854_v5  ;;  %v339_v51 = vld [vmem:[#allocation8 + $0x368] sm:$0xff]  ;;  %v346_v57 = vld [vmem:[#allocation8 + $0x3a0] sm:$0xff]  ;;  %v139_v33 = vrot.slane %v109_v24, %v5946_v25  ;;  %v135_v40 = vrot.slane %v109_v24, %v5948_v27  ;;  %v5964_v42 = vsub.s32 6, %v117_v19 }
  0x91   :  { %3522 = vmatprep.subr.bf16.mxu1 %v4863_v7  ;;  %v4911_v55 = vcombine.high %v335_v50, %v339_v51  ;;  %v343_v58 = vld [vmem:[#allocation8 + $0x388] sm:$0xff]  ;;  %v4910_v1 = vcombine.low %v335_v50, %v339_v51  ;;  %v4917_v4 = vcombine.high %v342_v56, %v346_v57  ;;  %v350_v6 = vld [vmem:[#allocation8 + $0x3c0] sm:$0xff]  ;;  %v4916_v10 = vcombine.low %v342_v56, %v346_v57 }
  0x92   :  { %3359 = vmatpush1.bf16.msra.mxu0 %v4860_v12  ;;  %v347_v60 = vld [vmem:[#allocation8 + $0x3a8] sm:$0xff]  ;;  %v354_v7 = vld [vmem:[#allocation8 + $0x3e0] sm:$0xff] }
  0x93   :  { %3360 = vmatprep.subr.bf16.mxu0 %v4869_v14  ;;  %v4919_v5 = vcombine.high %v343_v58, %v347_v60  ;;  %v351_v8 = vld [vmem:[#allocation8 + $0x3c8] sm:$0xff]  ;;  %v4918_v11 = vcombine.low %v343_v58, %v347_v60  ;;  %v4925_v12 = vcombine.high %v350_v6, %v354_v7  ;;  %v4924_v14 = vcombine.low %v350_v6, %v354_v7  ;;  %v366_v58 = vld [vmem:[#allocation8 + $0x440] sm:$0xff] }
  0x94   :  { %3523 = vmatpush1.bf16.msra.mxu1 %v4862_v13  ;;  %v355_v9 = vld [vmem:[#allocation8 + $0x3e8] sm:$0xff]  ;;  %v370_v60 = vld [vmem:[#allocation8 + $0x460] sm:$0xff] }
  0x95   :  { %3524 = vmatprep.subr.bf16.mxu1 %v4871_v15  ;;  %v4927_v13 = vcombine.high %v351_v8, %v355_v9  ;;  %v4926_v15 = vcombine.low %v351_v8, %v355_v9  ;;  %v371_v6 = vld [vmem:[#allocation8 + $0x468] sm:$0xff]  ;;  %v193_v9 = vrot.slane %v164_v26, %v5964_v42 }
  0x96   :  { %3361 = vmatpush1.bf16.msra.mxu0 %v4868_v20  ;;  %v5938_v20 = vsub.s32 0, %v117_v19  ;;  %v383_v59 = vld [vmem:[#allocation8 + $0x4c8] sm:$0xff] }
  0x97   :  { %3362 = vmatprep.subr.bf16.mxu0 %v4877_v22  ;;  %v5942_v22 = vsub.s32 3, %v117_v19  ;;  %v387_v61 = vld [vmem:[#allocation8 + $0x4e8] sm:$0xff] }
  0x98   :  { %3525 = vmatpush1.bf16.msra.mxu1 %v4870_v21  ;;  %v5940_v21 = vsub.s32 1, %v117_v19  ;;  %v169_v35 = vrot.slane %v164_v26, %v5938_v20 }
  0x99   :  { %3526 = vmatprep.subr.bf16.mxu1 %v4879_v23  ;;  %v5944_v23 = vsub.s32 2, %v117_v19 }
  0x9a   :  { %3363 = vmatpush1.bf16.msra.mxu0 %v4876_v28  ;;  %v5950_v28 = vsub.s32 7, %v117_v19  ;;  %v173_v34 = vrot.slane %v164_v26, %v5940_v21 }
  0x9b   :  { %3364 = vmatprep.subr.bf16.mxu0 %v4885_v30  ;;  %v119_v30 = vrot.slane %v109_v24, %v5938_v20  ;;  %v127_v32 = vrot.slane %v109_v24, %v5944_v23 }
  0x9c   :  { %3527 = vmatpush1.bf16.msra.mxu1 %v4878_v29  ;;  %v123_v29 = vrot.slane %v109_v24, %v5940_v21  ;;  %v147_v41 = vrot.slane %v109_v24, %v5950_v28 }
  0x9d   :  { %3528 = vmatprep.subr.bf16.mxu1 %v4887_v31  ;;  %v131_v31 = vrot.slane %v109_v24, %v5942_v22 }
  0x9e   :  { %3365 = vmatpush1.bf16.msra.mxu0 %v4884_v36  ;;  %v181_v36 = vrot.slane %v164_v26, %v5942_v22 }
  0x9f   :  { %3366 = vmatprep.subr.bf16.mxu0 %v4893_v38 }
  0xa0   :  { %3529 = vmatpush1.bf16.msra.mxu1 %v4886_v37  ;;  %v177_v37 = vrot.slane %v164_v26, %v5944_v23 }
  0xa1   :  { %3530 = vmatprep.subr.bf16.mxu1 %v4895_v39  ;;  %v189_v39 = vrot.slane %v164_v26, %v5946_v25 }
  0xa2   :  { %3367 = vmatpush1.bf16.msra.mxu0 %v4892_v44 }
  0xa3   :  { %3368 = vmatprep.subr.bf16.mxu0 %v4901_v46 }
  0xa4   :  { %3531 = vmatpush1.bf16.msra.mxu1 %v4894_v45 }
  0xa5   :  { %3532 = vmatprep.subr.bf16.mxu1 %v4903_v47 }
  0xa6   :  { %3369 = vmatpush1.bf16.msra.mxu0 %v4900_v52 }
  0xa7   :  { %3370 = vmatprep.subr.bf16.mxu0 %v4909_v54  ;;  %v185_v54 = vrot.slane %v164_v26, %v5948_v27 }
  0xa8   :  { %3533 = vmatpush1.bf16.msra.mxu1 %v4902_v53 }
  0xa9   :  { %3534 = vmatprep.subr.bf16.mxu1 %v4911_v55 }
  0xaa   :  { %3371 = vmatpush1.bf16.msra.mxu0 %v4908_v0  ;;  %v197_v0 = vrot.slane %v164_v26, %v5950_v28 }
  0xab   :  { %3372 = vmatprep.subr.bf16.mxu0 %v4917_v4 }
  0xac   :  { %3535 = vmatpush1.bf16.msra.mxu1 %v4910_v1  ;;  %v143_v1 = vrot.slane %v109_v24, %v5964_v42  ;;  %v4940_v24 = vcombine.low %v366_v58, %v370_v60 }
  0xad   :  { %3536 = vmatprep.subr.bf16.mxu1 %v4919_v5  ;;  %v367_v5 = vld [vmem:[#allocation8 + $0x448] sm:$0xff] }
  0xae   :  { %3373 = vmatpush1.bf16.msra.mxu0 %v4916_v10  ;;  %v4941_v10 = vcombine.high %v366_v58, %v370_v60  ;;  %v4942_v26 = vcombine.low %v367_v5, %v371_v6 }
  0xaf   :  { %3374 = vmatprep.subr.bf16.mxu0 %v4925_v12 }
  0xb0   :  { %3537 = vmatpush1.bf16.msra.mxu1 %v4918_v11  ;;  %v374_v11 = vld [vmem:[#allocation8 + $0x480] sm:$0xff] }
  0xb1   :  { %3538 = vmatprep.subr.bf16.mxu1 %v4927_v13  ;;  %v4943_v13 = vcombine.high %v367_v5, %v371_v6  ;;  %v415_v5 = vld [vmem:[#allocation8 + $0x5c8] sm:$0xff] }
  0xb2   :  { %3375 = vmatpush1.bf16.msra.mxu0 %v4924_v14  ;;  %v378_v14 = vld [vmem:[#allocation8 + $0x4a0] sm:$0xff]  ;;  %v419_v6 = vld [vmem:[#allocation8 + $0x5e8] sm:$0xff] }
  0xb3   :  { %3385 = vmatprep.subr.bf16.mxu0 %v4933_v16  ;;  %v379_v16 = vld [vmem:[#allocation8 + $0x4a8] sm:$0xff]  ;;  %v4948_v62 = vcombine.low %v374_v11, %v378_v14 }
  0xb4   :  { %3539 = vmatpush1.bf16.msra.mxu1 %v4926_v15  ;;  %v375_v15 = vld [vmem:[#allocation8 + $0x488] sm:$0xff] }
  0xb5   :  { %3549 = vmatprep.subr.bf16.mxu1 %v4935_v17  ;;  %v4950_v63 = vcombine.low %v375_v15, %v379_v16 }
  0xf2   :  { %v113_v38 = vpop.permute.xlu0 %112 }
  0xf3   :  { %v157_v43 = vmul.f32 %v123_v29, %v113_v38  ;;  %v156_v44 = vmul.f32 %v119_v30, %v113_v38  ;;  %v159_v45 = vmul.f32 %v131_v31, %v113_v38  ;;  %v158_v46 = vmul.f32 %v127_v32, %v113_v38  ;;  %v382_v32 = vld [vmem:[#allocation8 + $0x4c0] sm:$0xff] }
  0xf4   :  { %v161_v47 = vmul.f32 %v139_v33, %v113_v38  ;;  %v160_v53 = vmul.f32 %v135_v40, %v113_v38  ;;  %v163_v55 = vmul.f32 %v147_v41, %v113_v38  ;;  %v162_v18 = vmul.f32 %v143_v1, %v113_v38  ;;  %v386_v33 = vld [vmem:[#allocation8 + $0x4e0] sm:$0xff] }
  0xf5   :  { %v207_v48 = vadd.f32 %v173_v34, %v157_v43  ;;  %v206_v49 = vadd.f32 %v169_v35, %v156_v44  ;;  %v209_v50 = vadd.f32 %v181_v36, %v159_v45  ;;  %v5966_v51 = vadd.f32 %v177_v37, %v158_v46  ;;  %v390_v34 = vld [vmem:[#allocation8 + $0x500] sm:$0xff]  ;;  %v391_v36 = vld [vmem:[#allocation8 + $0x508] sm:$0xff] }
  0xf6   :  { %v5968_v52 = vadd.f32 %v189_v39, %v161_v47  ;;  %v5978_v12 = vadd.f32 %v185_v54, %v160_v53  ;;  %v5982_v17 = vadd.f32 %v197_v0, %v163_v55  ;;  %v5994_v29 = vadd.f32 %v193_v9, %v162_v18  ;;  %v394_v35 = vld [vmem:[#allocation8 + $0x520] sm:$0xff]  ;;  %v395_v37 = vld [vmem:[#allocation8 + $0x528] sm:$0xff] }
  0xf7   :  { %v215_v56 = vmax.f32 %v207_v48, 0.0  ;;  %v214_v57 = vmax.f32 %v206_v49, 0.0  ;;  %v217_v4 = vmax.f32 %v209_v50, 0.0  ;;  %v4949_v30 = vcombine.high %v374_v11, %v378_v14  ;;  %v398_v43 = vld [vmem:[#allocation8 + $0x540] sm:$0xff]  ;;  %v399_v45 = vld [vmem:[#allocation8 + $0x548] sm:$0xff] }
  0xf8   :  { %v4951_v31 = vcombine.high %v375_v15, %v379_v16  ;;  %v4956_v38 = vcombine.low %v382_v32, %v386_v33  ;;  %v4958_v39 = vcombine.low %v383_v59, %v387_v61  ;;  %v4965_v40 = vcombine.high %v390_v34, %v394_v35  ;;  %v402_v44 = vld [vmem:[#allocation8 + $0x560] sm:$0xff]  ;;  %v403_v46 = vld [vmem:[#allocation8 + $0x568] sm:$0xff] }
  0xf9   :  { %v5973_v7 = vpack.c.bf16 %v215_v56, %v215_v56  ;;  %v5975_v8 = vpack.c.bf16 %v214_v57, %v214_v57  ;;  %v5986_v19 = vpack.c.bf16 %v217_v4, %v217_v4  ;;  %v4967_v41 = vcombine.high %v391_v36, %v395_v37  ;;  %v406_v53 = vld [vmem:[#allocation8 + $0x580] sm:$0xff]  ;;  %v407_v55 = vld [vmem:[#allocation8 + $0x588] sm:$0xff] }
  0xfa   :  { %v4964_v47 = vcombine.low %v390_v34, %v394_v35  ;;  %v4966_v48 = vcombine.low %v391_v36, %v395_v37  ;;  %v4973_v49 = vcombine.high %v398_v43, %v402_v44  ;;  %v4975_v50 = vcombine.high %v399_v45, %v403_v46  ;;  %v410_v54 = vld [vmem:[#allocation8 + $0x5a0] sm:$0xff]  ;;  %v411_v56 = vld [vmem:[#allocation8 + $0x5a8] sm:$0xff] }
  0xfb   :  { %3376 = vmatprep.mubr.bf16.mxu0 %v5973_v7  ;;  %3540 = vmatprep.mubr.bf16.mxu1 %v5973_v7  ;;  %v4972_v57 = vcombine.low %v398_v43, %v402_v44  ;;  %v4974_v58 = vcombine.low %v399_v45, %v403_v46  ;;  %v4981_v60 = vcombine.high %v406_v53, %v410_v54  ;;  %v414_v1 = vld [vmem:[#allocation8 + $0x5c0] sm:$0xff]  ;;  %v423_v16 = vld [vmem:[#allocation8 + $0x608] sm:$0xff] }
  0xfc   :  { %3377 = vmatmul.mubr.bf16.vlgmr.msra.gmra.mrb[0].mxu0 %v5975_v8  ;;  %3541 = vmatmul.mubr.bf16.vlgmr.msra.gmra.mrb[0].mxu1 %v5975_v8  ;;  %v4983_v0 = vcombine.high %v407_v55, %v411_v56  ;;  %v418_v4 = vld [vmem:[#allocation8 + $0x5e0] sm:$0xff]  ;;  %v4980_v9 = vcombine.low %v406_v53, %v410_v54  ;;  %v427_v18 = vld [vmem:[#allocation8 + $0x628] sm:$0xff] }
  0xfd   :  { %3386 = vmatpush1.bf16.msra.mxu0 %v4932_v2  ;;  %3550 = vmatpush1.bf16.msra.mxu1 %v4934_v3  ;;  %v4957_v2 = vcombine.high %v382_v32, %v386_v33  ;;  %v4959_v3 = vcombine.high %v383_v59, %v387_v61  ;;  %v4989_v11 = vcombine.high %v414_v1, %v418_v4  ;;  %v422_v14 = vld [vmem:[#allocation8 + $0x600] sm:$0xff]  ;;  %v431_v59 = vld [vmem:[#allocation8 + $0x648] sm:$0xff] }
  0xfe   :  { %3417 = vmatprep.mubr.bf16.mxu0 %v5986_v19  ;;  %3581 = vmatprep.mubr.bf16.mxu1 %v5986_v19  ;;  %v426_v15 = vld [vmem:[#allocation8 + $0x620] sm:$0xff]  ;;  %v435_v61 = vld [vmem:[#allocation8 + $0x668] sm:$0xff] }
  0xff   :  { %3387 = vmatprep.subr.bf16.mxu0 %v4941_v10  ;;  %3551 = vmatprep.subr.bf16.mxu1 %v4943_v13  ;;  %v4982_v10 = vcombine.low %v407_v55, %v411_v56  ;;  %v4991_v13 = vcombine.high %v415_v5, %v419_v6  ;;  %v430_v32 = vld [vmem:[#allocation8 + $0x640] sm:$0xff]  ;;  %v439_v36 = vld [vmem:[#allocation8 + $0x688] sm:$0xff] }
 0x100   :  { %v434_v33 = vld [vmem:[#allocation8 + $0x660] sm:$0xff]  ;;  %v443_v37 = vld [vmem:[#allocation8 + $0x6a8] sm:$0xff] }
 0x101   :  { %3388 = vmatpush1.bf16.msra.mxu0 %v4940_v24  ;;  %3552 = vmatpush1.bf16.msra.mxu1 %v4942_v26  ;;  %v4988_v24 = vcombine.low %v414_v1, %v418_v4  ;;  %v4990_v26 = vcombine.low %v415_v5, %v419_v6  ;;  %v438_v34 = vld [vmem:[#allocation8 + $0x680] sm:$0xff]  ;;  %v447_v45 = vld [vmem:[#allocation8 + $0x6c8] sm:$0xff] }
 0x102   :  { %3389 = vmatprep.subr.bf16.mxu0 %v4949_v30  ;;  %3553 = vmatprep.subr.bf16.mxu1 %v4951_v31  ;;  %v4997_v30 = vcombine.high %v422_v14, %v426_v15  ;;  %v4999_v31 = vcombine.high %v423_v16, %v427_v18  ;;  %v442_v35 = vld [vmem:[#allocation8 + $0x6a0] sm:$0xff]  ;;  %v451_v46 = vld [vmem:[#allocation8 + $0x6e8] sm:$0xff] }
 0x103   :  { %v446_v43 = vld [vmem:[#allocation8 + $0x6c0] sm:$0xff]  ;;  %v455_v55 = vld [vmem:[#allocation8 + $0x708] sm:$0xff] }
 0x104   :  { %v450_v44 = vld [vmem:[#allocation8 + $0x6e0] sm:$0xff]  ;;  %v459_v56 = vld [vmem:[#allocation8 + $0x728] sm:$0xff] }
 0x105   :  { %3390 = vmatpush1.bf16.msra.mxu0 %v4948_v62  ;;  %3554 = vmatpush1.bf16.msra.mxu1 %v4950_v63  ;;  %v4996_v62 = vcombine.low %v422_v14, %v426_v15  ;;  %v4998_v63 = vcombine.low %v423_v16, %v427_v18  ;;  %v454_v53 = vld [vmem:[#allocation8 + $0x700] sm:$0xff]  ;;  %v463_v5 = vld [vmem:[#allocation8 + $0x748] sm:$0xff] }
 0x106   :  { %3391 = vmatprep.subr.bf16.mxu0 %v4957_v2  ;;  %3555 = vmatprep.subr.bf16.mxu1 %v4959_v3  ;;  %v5005_v2 = vcombine.high %v430_v32, %v434_v33  ;;  %v5007_v3 = vcombine.high %v431_v59, %v435_v61  ;;  %v458_v54 = vld [vmem:[#allocation8 + $0x720] sm:$0xff]  ;;  %v467_v6 = vld [vmem:[#allocation8 + $0x768] sm:$0xff] }
 0x107   :  { %v462_v1 = vld [vmem:[#allocation8 + $0x740] sm:$0xff]  ;;  %v471_v16 = vld [vmem:[#allocation8 + $0x788] sm:$0xff] }
 0x108   :  { %v466_v4 = vld [vmem:[#allocation8 + $0x760] sm:$0xff]  ;;  %v475_v18 = vld [vmem:[#allocation8 + $0x7a8] sm:$0xff] }
 0x109   :  { %3392 = vmatpush1.bf16.msra.mxu0 %v4956_v38  ;;  %3556 = vmatpush1.bf16.msra.mxu1 %v4958_v39  ;;  %v5004_v38 = vcombine.low %v430_v32, %v434_v33  ;;  %v5006_v39 = vcombine.low %v431_v59, %v435_v61  ;;  %v470_v14 = vld [vmem:[#allocation8 + $0x780] sm:$0xff]  ;;  %v479_v59 = vld [vmem:[#allocation8 + $0x7c8] sm:$0xff] }
 0x10a   :  { %3393 = vmatprep.subr.bf16.mxu0 %v4965_v40  ;;  %3557 = vmatprep.subr.bf16.mxu1 %v4967_v41  ;;  %v5013_v40 = vcombine.high %v438_v34, %v442_v35  ;;  %v5015_v41 = vcombine.high %v439_v36, %v443_v37  ;;  %v474_v15 = vld [vmem:[#allocation8 + $0x7a0] sm:$0xff]  ;;  %v483_v61 = vld [vmem:[#allocation8 + $0x7e8] sm:$0xff] }
 0x10b   :  { %v478_v32 = vld [vmem:[#allocation8 + $0x7c0] sm:$0xff] }
 0x10c   :  { %v482_v33 = vld [vmem:[#allocation8 + $0x7e0] sm:$0xff] }
 0x10d   :  { %3394 = vmatpush1.bf16.msra.mxu0 %v4964_v47  ;;  %3558 = vmatpush1.bf16.msra.mxu1 %v4966_v48  ;;  %v5012_v47 = vcombine.low %v438_v34, %v442_v35  ;;  %v5014_v48 = vcombine.low %v439_v36, %v443_v37  ;;  %v486_v34 = vld [vmem:[#allocation8 + $0x800] sm:$0xff]  ;;  %v487_v36 = vld [vmem:[#allocation8 + $0x808] sm:$0xff] }
 0x10e   :  { %3395 = vmatprep.subr.bf16.mxu0 %v4973_v49  ;;  %3559 = vmatprep.subr.bf16.mxu1 %v4975_v50  ;;  %v5021_v49 = vcombine.high %v446_v43, %v450_v44  ;;  %v5023_v50 = vcombine.high %v447_v45, %v451_v46  ;;  %v490_v35 = vld [vmem:[#allocation8 + $0x820] sm:$0xff]  ;;  %v491_v37 = vld [vmem:[#allocation8 + $0x828] sm:$0xff] }
 0x111   :  { %3396 = vmatpush1.bf16.msra.mxu0 %v4972_v57  ;;  %3560 = vmatpush1.bf16.msra.mxu1 %v4974_v58  ;;  %v5020_v57 = vcombine.low %v446_v43, %v450_v44  ;;  %v5022_v58 = vcombine.low %v447_v45, %v451_v46  ;;  %v5063_v43 = vcombine.high %v487_v36, %v491_v37  ;;  %v219_v44 = vmax.f32 %v5968_v52, 0.0  ;;  %v494_v45 = vld [vmem:[#allocation8 + $0x840] sm:$0xff]  ;;  %v503_v52 = vld [vmem:[#allocation8 + $0x888] sm:$0xff] }
 0x112   :  { %3397 = vmatprep.subr.bf16.mxu0 %v4981_v60  ;;  %3561 = vmatprep.subr.bf16.mxu1 %v4983_v0  ;;  %v5029_v60 = vcombine.high %v454_v53, %v458_v54  ;;  %v5031_v0 = vcombine.high %v455_v55, %v459_v56  ;;  %v498_v46 = vld [vmem:[#allocation8 + $0x860] sm:$0xff] }
 0x115   :  { %3398 = vmatpush1.bf16.msra.mxu0 %v4980_v9  ;;  %3562 = vmatpush1.bf16.msra.mxu1 %v4982_v10  ;;  %v5028_v9 = vcombine.low %v454_v53, %v458_v54  ;;  %v5030_v10 = vcombine.low %v455_v55, %v459_v56  ;;  %v5062_v53 = vcombine.low %v487_v36, %v491_v37  ;;  %v502_v56 = vld [vmem:[#allocation8 + $0x880] sm:$0xff] }
 0x116   :  { %3399 = vmatprep.subr.bf16.mxu0 %v4989_v11  ;;  %3563 = vmatprep.subr.bf16.mxu1 %v4991_v13  ;;  %v5037_v11 = vcombine.high %v462_v1, %v466_v4  ;;  %v5039_v13 = vcombine.high %v463_v5, %v467_v6  ;;  %v6002_v54 = vpack.c.bf16 %v219_v44, %v219_v44  ;;  %v534_v36 = vld [vmem:[#allocation8 + $0x980] sm:$0xff] }
 0x117   :  { %v5069_v55 = vcombine.high %v494_v45, %v498_v46  ;;  %v538_v37 = vld [vmem:[#allocation8 + $0x9a0] sm:$0xff] }
 0x119   :  { %3400 = vmatpush1.bf16.msra.mxu0 %v4988_v24  ;;  %3564 = vmatpush1.bf16.msra.mxu1 %v4990_v26  ;;  %v5036_v24 = vcombine.low %v462_v1, %v466_v4  ;;  %v5038_v26 = vcombine.low %v463_v5, %v467_v6  ;;  %v510_v5 = vld [vmem:[#allocation8 + $0x8c0] sm:$0xff] }
 0x11a   :  { %3401 = vmatprep.subr.bf16.mxu0 %v4997_v30  ;;  %3565 = vmatprep.subr.bf16.mxu1 %v4999_v31  ;;  %v5045_v30 = vcombine.high %v470_v14, %v474_v15  ;;  %v5047_v31 = vcombine.high %v471_v16, %v475_v18  ;;  %v514_v6 = vld [vmem:[#allocation8 + $0x8e0] sm:$0xff] }
 0x11d   :  { %3402 = vmatpush1.bf16.msra.mxu0 %v4996_v62  ;;  %3566 = vmatpush1.bf16.msra.mxu1 %v4998_v63  ;;  %v5044_v62 = vcombine.low %v470_v14, %v474_v15  ;;  %v5046_v63 = vcombine.low %v471_v16, %v475_v18  ;;  %v5085_v14 = vcombine.high %v510_v5, %v514_v6  ;;  %v518_v16 = vld [vmem:[#allocation8 + $0x900] sm:$0xff] }
 0x11e   :  { %3403 = vmatprep.subr.bf16.mxu0 %v5005_v2  ;;  %3567 = vmatprep.subr.bf16.mxu1 %v5007_v3  ;;  %v5053_v2 = vcombine.high %v478_v32, %v482_v33  ;;  %v5055_v3 = vcombine.high %v479_v59, %v483_v61  ;;  %v522_v18 = vld [vmem:[#allocation8 + $0x920] sm:$0xff] }
 0x121   :  { %3404 = vmatpush1.bf16.msra.mxu0 %v5004_v38  ;;  %3568 = vmatpush1.bf16.msra.mxu1 %v5006_v39  ;;  %v5052_v38 = vcombine.low %v478_v32, %v482_v33  ;;  %v5054_v39 = vcombine.low %v479_v59, %v483_v61  ;;  %v5093_v32 = vcombine.high %v518_v16, %v522_v18  ;;  %v526_v59 = vld [vmem:[#allocation8 + $0x940] sm:$0xff] }
 0x122   :  { %3405 = vmatprep.subr.bf16.mxu0 %v5013_v40  ;;  %3569 = vmatprep.subr.bf16.mxu1 %v5015_v41  ;;  %v216_v40 = vmax.f32 %v5966_v51, 0.0  ;;  %v5061_v41 = vcombine.high %v486_v34, %v490_v35  ;;  %v530_v61 = vld [vmem:[#allocation8 + $0x960] sm:$0xff] }
 0x125   :  { %3406 = vmatpush1.bf16.msra.mxu0 %v5012_v47  ;;  %3570 = vmatpush1.bf16.msra.mxu1 %v5014_v48  ;;  %v495_v47 = vld [vmem:[#allocation8 + $0x848] sm:$0xff] }
 0x126   :  { %3407 = vmatprep.subr.bf16.mxu0 %v5021_v49  ;;  %3571 = vmatprep.subr.bf16.mxu1 %v5023_v50  ;;  %v499_v48 = vld [vmem:[#allocation8 + $0x868] sm:$0xff]  ;;  %v5060_v49 = vcombine.low %v486_v34, %v490_v35  ;;  %v6000_v50 = vpack.c.bf16 %v216_v40, %v216_v40  ;;  %v5101_v34 = vcombine.high %v526_v59, %v530_v61 }
 0x127   :  { %v5071_v51 = vcombine.high %v495_v47, %v499_v48  ;;  %v5100_v40 = vcombine.low %v526_v59, %v530_v61  ;;  %v574_v59 = vld [vmem:[#allocation8 + $0xac0] sm:$0xff] }
 0x128   :  { %v578_v61 = vld [vmem:[#allocation8 + $0xae0] sm:$0xff] }
 0x129   :  { %3408 = vmatpush1.bf16.msra.mxu0 %v5020_v57  ;;  %3572 = vmatpush1.bf16.msra.mxu1 %v5022_v58  ;;  %v506_v57 = vld [vmem:[#allocation8 + $0x8a0] sm:$0xff]  ;;  %v507_v58 = vld [vmem:[#allocation8 + $0x8a8] sm:$0xff] }
 0x12a   :  { %3409 = vmatprep.subr.bf16.mxu0 %v5029_v60  ;;  %3573 = vmatprep.subr.bf16.mxu1 %v5031_v0  ;;  %v5068_v60 = vcombine.low %v494_v45, %v498_v46  ;;  %v5070_v0 = vcombine.low %v495_v47, %v499_v48  ;;  %v5077_v1 = vcombine.high %v502_v56, %v506_v57  ;;  %v542_v45 = vld [vmem:[#allocation8 + $0x9c0] sm:$0xff]  ;;  %v543_v47 = vld [vmem:[#allocation8 + $0x9c8] sm:$0xff] }
 0x12b   :  { %v5079_v4 = vcombine.high %v503_v52, %v507_v58  ;;  %v546_v46 = vld [vmem:[#allocation8 + $0x9e0] sm:$0xff]  ;;  %v547_v48 = vld [vmem:[#allocation8 + $0x9e8] sm:$0xff] }
 0x12d   :  { %3410 = vmatpush1.bf16.msra.mxu0 %v5028_v9  ;;  %3574 = vmatpush1.bf16.msra.mxu1 %v5030_v10  ;;  %v511_v9 = vld [vmem:[#allocation8 + $0x8c8] sm:$0xff] }
 0x12e   :  { %3411 = vmatprep.subr.bf16.mxu0 %v5037_v11  ;;  %3575 = vmatprep.subr.bf16.mxu1 %v5039_v13  ;;  %v515_v10 = vld [vmem:[#allocation8 + $0x8e8] sm:$0xff]  ;;  %v5076_v11 = vcombine.low %v502_v56, %v506_v57  ;;  %v5078_v13 = vcombine.low %v503_v52, %v507_v58  ;;  %v550_v56 = vld [vmem:[#allocation8 + $0xa00] sm:$0xff] }
 0x12f   :  { %v5087_v15 = vcombine.high %v511_v9, %v515_v10  ;;  %v554_v57 = vld [vmem:[#allocation8 + $0xa20] sm:$0xff]  ;;  %v551_v52 = vld [vmem:[#allocation8 + $0xa08] sm:$0xff] }
 0x130   :  { %v555_v58 = vld [vmem:[#allocation8 + $0xa28] sm:$0xff] }
 0x131   :  { %3412 = vmatpush1.bf16.msra.mxu0 %v5036_v24  ;;  %3576 = vmatpush1.bf16.msra.mxu1 %v5038_v26  ;;  %v519_v24 = vld [vmem:[#allocation8 + $0x908] sm:$0xff] }
 0x132   :  { %3413 = vmatprep.subr.bf16.mxu0 %v5045_v30  ;;  %3577 = vmatprep.subr.bf16.mxu1 %v5047_v31  ;;  %v523_v26 = vld [vmem:[#allocation8 + $0x928] sm:$0xff]  ;;  %v5084_v30 = vcombine.low %v510_v5, %v514_v6  ;;  %v5086_v31 = vcombine.low %v511_v9, %v515_v10  ;;  %v558_v5 = vld [vmem:[#allocation8 + $0xa40] sm:$0xff] }
 0x133   :  { %v5095_v33 = vcombine.high %v519_v24, %v523_v26  ;;  %v562_v6 = vld [vmem:[#allocation8 + $0xa60] sm:$0xff]  ;;  %v559_v9 = vld [vmem:[#allocation8 + $0xa48] sm:$0xff] }
 0x134   :  { %v563_v10 = vld [vmem:[#allocation8 + $0xa68] sm:$0xff] }
 0x135   :  { %3414 = vmatpush1.bf16.msra.mxu0 %v5044_v62  ;;  %3578 = vmatpush1.bf16.msra.mxu1 %v5046_v63  ;;  %v527_v62 = vld [vmem:[#allocation8 + $0x948] sm:$0xff] }
 0x136   :  { %3415 = vmatprep.subr.bf16.mxu0 %v5053_v2  ;;  %3579 = vmatprep.subr.bf16.mxu1 %v5055_v3  ;;  %v531_v63 = vld [vmem:[#allocation8 + $0x968] sm:$0xff]  ;;  %v5092_v2 = vcombine.low %v518_v16, %v522_v18  ;;  %v5094_v3 = vcombine.low %v519_v24, %v523_v26  ;;  %v566_v16 = vld [vmem:[#allocation8 + $0xa80] sm:$0xff] }
 0x137   :  { %v5103_v35 = vcombine.high %v527_v62, %v531_v63  ;;  %v570_v18 = vld [vmem:[#allocation8 + $0xaa0] sm:$0xff]  ;;  %v567_v24 = vld [vmem:[#allocation8 + $0xa88] sm:$0xff] }
 0x138   :  { %v571_v26 = vld [vmem:[#allocation8 + $0xaa8] sm:$0xff] }
 0x139   :  { %3416 = vmatpush1.bf16.msra.mxu0 %v5052_v38  ;;  %3580 = vmatpush1.bf16.msra.mxu1 %v5054_v39  ;;  %v535_v38 = vld [vmem:[#allocation8 + $0x988] sm:$0xff] }
 0x13a   :  { %3426 = vmatprep.subr.bf16.mxu0 %v5061_v41  ;;  %3590 = vmatprep.subr.bf16.mxu1 %v5063_v43  ;;  %v539_v39 = vld [vmem:[#allocation8 + $0x9a8] sm:$0xff]  ;;  %v5102_v41 = vcombine.low %v527_v62, %v531_v63  ;;  %v5109_v43 = vcombine.high %v534_v36, %v538_v37 }
 0x13b   :  { %v5111_v44 = vcombine.high %v535_v38, %v539_v39  ;;  %v575_v62 = vld [vmem:[#allocation8 + $0xac8] sm:$0xff] }
 0x13c   :  { %3418 = vmatmul.mubr.bf16.vlgmr.msra.gmra.mrb[0].mxu0 %v6000_v50  ;;  %3582 = vmatmul.mubr.bf16.vlgmr.msra.gmra.mrb[0].mxu1 %v6000_v50  ;;  %v579_v63 = vld [vmem:[#allocation8 + $0xae8] sm:$0xff] }
 0x13d   :  { %3427 = vmatpush1.bf16.msra.mxu0 %v5060_v49  ;;  %3458 = vmatprep.mubr.bf16.mxu0 %v6002_v54  ;;  %v5108_v49 = vcombine.low %v534_v36, %v538_v37  ;;  %v582_v36 = vld [vmem:[#allocation8 + $0xb00] sm:$0xff] }
 0x13e   :  { %3591 = vmatpush1.bf16.msra.mxu1 %v5062_v53  ;;  %3622 = vmatprep.mubr.bf16.mxu1 %v6002_v54  ;;  %v5110_v53 = vcombine.low %v535_v38, %v539_v39  ;;  %v586_v37 = vld [vmem:[#allocation8 + $0xb20] sm:$0xff]  ;;  %v583_v38 = vld [vmem:[#allocation8 + $0xb08] sm:$0xff] }
 0x13f   :  { %3428 = vmatprep.subr.bf16.mxu0 %v5069_v55  ;;  %3592 = vmatprep.subr.bf16.mxu1 %v5071_v51  ;;  %v5117_v55 = vcombine.high %v542_v45, %v546_v46  ;;  %v5119_v51 = vcombine.high %v543_v47, %v547_v48  ;;  %v587_v39 = vld [vmem:[#allocation8 + $0xb28] sm:$0xff] }
 0x141   :  { %3429 = vmatpush1.bf16.msra.mxu0 %v5068_v60  ;;  %v5116_v60 = vcombine.low %v542_v45, %v546_v46  ;;  %v590_v45 = vld [vmem:[#allocation8 + $0xb40] sm:$0xff] }
 0x142   :  { %3593 = vmatpush1.bf16.msra.mxu1 %v5070_v0  ;;  %3430 = vmatprep.subr.bf16.mxu0 %v5077_v1  ;;  %v5118_v0 = vcombine.low %v543_v47, %v547_v48  ;;  %v5125_v1 = vcombine.high %v550_v56, %v554_v57  ;;  %v594_v46 = vld [vmem:[#allocation8 + $0xb60] sm:$0xff]  ;;  %v591_v47 = vld [vmem:[#allocation8 + $0xb48] sm:$0xff] }
 0x143   :  { %3594 = vmatprep.subr.bf16.mxu1 %v5079_v4  ;;  %v5127_v4 = vcombine.high %v551_v52, %v555_v58  ;;  %v595_v48 = vld [vmem:[#allocation8 + $0xb68] sm:$0xff] }
 0x145   :  { %3431 = vmatpush1.bf16.msra.mxu0 %v5076_v11  ;;  %v5124_v11 = vcombine.low %v550_v56, %v554_v57  ;;  %v598_v56 = vld [vmem:[#allocation8 + $0xb80] sm:$0xff] }
 0x146   :  { %3595 = vmatpush1.bf16.msra.mxu1 %v5078_v13  ;;  %3432 = vmatprep.subr.bf16.mxu0 %v5085_v14  ;;  %v5126_v13 = vcombine.low %v551_v52, %v555_v58  ;;  %v5133_v14 = vcombine.high %v558_v5, %v562_v6  ;;  %v602_v57 = vld [vmem:[#allocation8 + $0xba0] sm:$0xff]  ;;  %v599_v52 = vld [vmem:[#allocation8 + $0xb88] sm:$0xff] }
 0x147   :  { %3596 = vmatprep.subr.bf16.mxu1 %v5087_v15  ;;  %v5135_v15 = vcombine.high %v559_v9, %v563_v10  ;;  %v603_v58 = vld [vmem:[#allocation8 + $0xba8] sm:$0xff] }
 0x149   :  { %3433 = vmatpush1.bf16.msra.mxu0 %v5084_v30  ;;  %v5132_v30 = vcombine.low %v558_v5, %v562_v6  ;;  %v606_v5 = vld [vmem:[#allocation8 + $0xbc0] sm:$0xff] }
 0x14a   :  { %3597 = vmatpush1.bf16.msra.mxu1 %v5086_v31  ;;  %3434 = vmatprep.subr.bf16.mxu0 %v5093_v32  ;;  %v5134_v31 = vcombine.low %v559_v9, %v563_v10  ;;  %v5141_v32 = vcombine.high %v566_v16, %v570_v18  ;;  %v610_v6 = vld [vmem:[#allocation8 + $0xbe0] sm:$0xff]  ;;  %v607_v9 = vld [vmem:[#allocation8 + $0xbc8] sm:$0xff] }
 0x14b   :  { %3598 = vmatprep.subr.bf16.mxu1 %v5095_v33  ;;  %v5143_v33 = vcombine.high %v567_v24, %v571_v26  ;;  %v611_v10 = vld [vmem:[#allocation8 + $0xbe8] sm:$0xff] }
 0x14d   :  { %3435 = vmatpush1.bf16.msra.mxu0 %v5092_v2  ;;  %v5140_v2 = vcombine.low %v566_v16, %v570_v18  ;;  %v614_v16 = vld [vmem:[#allocation8 + $0xc00] sm:$0xff] }
 0x14e   :  { %3599 = vmatpush1.bf16.msra.mxu1 %v5094_v3  ;;  %3436 = vmatprep.subr.bf16.mxu0 %v5101_v34  ;;  %v5142_v3 = vcombine.low %v567_v24, %v571_v26  ;;  %v5149_v34 = vcombine.high %v574_v59, %v578_v61  ;;  %v618_v18 = vld [vmem:[#allocation8 + $0xc20] sm:$0xff]  ;;  %v615_v24 = vld [vmem:[#allocation8 + $0xc08] sm:$0xff] }
 0x14f   :  { %3600 = vmatprep.subr.bf16.mxu1 %v5103_v35  ;;  %v5151_v35 = vcombine.high %v575_v62, %v579_v63  ;;  %v619_v26 = vld [vmem:[#allocation8 + $0xc28] sm:$0xff] }
 0x151   :  { %3437 = vmatpush1.bf16.msra.mxu0 %v5100_v40  ;;  %v5148_v40 = vcombine.low %v574_v59, %v578_v61  ;;  %v5191_v59 = vcombine.high %v615_v24, %v619_v26  ;;  %v221_v61 = vmax.f32 %v5982_v17, 0.0 }
 0x152   :  { %3601 = vmatpush1.bf16.msra.mxu1 %v5102_v41  ;;  %3438 = vmatprep.subr.bf16.mxu0 %v5109_v43  ;;  %v5150_v41 = vcombine.low %v575_v62, %v579_v63  ;;  %v5157_v43 = vcombine.high %v582_v36, %v586_v37  ;;  %v622_v62 = vld [vmem:[#allocation8 + $0xc40] sm:$0xff] }
 0x153   :  { %3602 = vmatprep.subr.bf16.mxu1 %v5111_v44  ;;  %v5159_v44 = vcombine.high %v583_v38, %v587_v39  ;;  %v626_v63 = vld [vmem:[#allocation8 + $0xc60] sm:$0xff] }
 0x155   :  { %3439 = vmatpush1.bf16.msra.mxu0 %v5108_v49  ;;  %v5156_v49 = vcombine.low %v582_v36, %v586_v37  ;;  %v5190_v36 = vcombine.low %v615_v24, %v619_v26  ;;  %v5197_v37 = vcombine.high %v622_v62, %v626_v63  ;;  %v662_v24 = vld [vmem:[#allocation8 + $0xd80] sm:$0xff] }
 0x156   :  { %3603 = vmatpush1.bf16.msra.mxu1 %v5110_v53  ;;  %3440 = vmatprep.subr.bf16.mxu0 %v5117_v55  ;;  %v5158_v53 = vcombine.low %v583_v38, %v587_v39  ;;  %v5165_v55 = vcombine.high %v590_v45, %v594_v46  ;;  %v630_v38 = vld [vmem:[#allocation8 + $0xc80] sm:$0xff]  ;;  %v6013_v39 = vpack.c.bf16 %v221_v61, %v221_v61 }
 0x157   :  { %3604 = vmatprep.subr.bf16.mxu1 %v5119_v51  ;;  %v5167_v51 = vcombine.high %v591_v47, %v595_v48  ;;  %v666_v26 = vld [vmem:[#allocation8 + $0xda0] sm:$0xff] }
 0x159   :  { %3441 = vmatpush1.bf16.msra.mxu0 %v5116_v60  ;;  %v5164_v60 = vcombine.low %v590_v45, %v594_v46 }
 0x15a   :  { %3605 = vmatpush1.bf16.msra.mxu1 %v5118_v0  ;;  %3442 = vmatprep.subr.bf16.mxu0 %v5125_v1  ;;  %v5166_v0 = vcombine.low %v591_v47, %v595_v48  ;;  %v5173_v1 = vcombine.high %v598_v56, %v602_v57  ;;  %v638_v47 = vld [vmem:[#allocation8 + $0xcc0] sm:$0xff] }
 0x15b   :  { %3606 = vmatprep.subr.bf16.mxu1 %v5127_v4  ;;  %v5175_v4 = vcombine.high %v599_v52, %v603_v58  ;;  %v642_v48 = vld [vmem:[#allocation8 + $0xce0] sm:$0xff] }
 0x15d   :  { %3443 = vmatpush1.bf16.msra.mxu0 %v5124_v11  ;;  %v5172_v11 = vcombine.low %v598_v56, %v602_v57  ;;  %v5213_v56 = vcombine.high %v638_v47, %v642_v48 }
 0x15e   :  { %3607 = vmatpush1.bf16.msra.mxu1 %v5126_v13  ;;  %3444 = vmatprep.subr.bf16.mxu0 %v5133_v14  ;;  %v5174_v13 = vcombine.low %v599_v52, %v603_v58  ;;  %v5181_v14 = vcombine.high %v606_v5, %v610_v6  ;;  %v646_v52 = vld [vmem:[#allocation8 + $0xd00] sm:$0xff] }
 0x15f   :  { %3608 = vmatprep.subr.bf16.mxu1 %v5135_v15  ;;  %v5183_v15 = vcombine.high %v607_v9, %v611_v10  ;;  %v650_v58 = vld [vmem:[#allocation8 + $0xd20] sm:$0xff] }
 0x161   :  { %3445 = vmatpush1.bf16.msra.mxu0 %v5132_v30  ;;  %v5180_v30 = vcombine.low %v606_v5, %v610_v6  ;;  %v5221_v5 = vcombine.high %v646_v52, %v650_v58 }
 0x162   :  { %3609 = vmatpush1.bf16.msra.mxu1 %v5134_v31  ;;  %3446 = vmatprep.subr.bf16.mxu0 %v5141_v32  ;;  %v5182_v31 = vcombine.low %v607_v9, %v611_v10  ;;  %v218_v32 = vmax.f32 %v5978_v12, 0.0  ;;  %v634_v12 = vld [vmem:[#allocation8 + $0xca0] sm:$0xff] }
 0x163   :  { %3610 = vmatprep.subr.bf16.mxu1 %v5143_v33  ;;  %v5189_v33 = vcombine.high %v614_v16, %v618_v18  ;;  %v5205_v45 = vcombine.high %v630_v38, %v634_v12  ;;  %v654_v9 = vld [vmem:[#allocation8 + $0xd40] sm:$0xff] }
 0x164   :  { %v658_v10 = vld [vmem:[#allocation8 + $0xd60] sm:$0xff] }
 0x165   :  { %3447 = vmatpush1.bf16.msra.mxu0 %v5140_v2  ;;  %v5188_v2 = vcombine.low %v614_v16, %v618_v18  ;;  %v5229_v16 = vcombine.high %v654_v9, %v658_v10 }
 0x166   :  { %3611 = vmatpush1.bf16.msra.mxu1 %v5142_v3  ;;  %3448 = vmatprep.subr.bf16.mxu0 %v5149_v34  ;;  %v623_v3 = vld [vmem:[#allocation8 + $0xc48] sm:$0xff] }
 0x167   :  { %3612 = vmatprep.subr.bf16.mxu1 %v5151_v35  ;;  %v627_v34 = vld [vmem:[#allocation8 + $0xc68] sm:$0xff]  ;;  %v6010_v35 = vpack.c.bf16 %v218_v32, %v218_v32  ;;  %v5228_v32 = vcombine.low %v654_v9, %v658_v10  ;;  %v702_v9 = vld [vmem:[#allocation8 + $0xec0] sm:$0xff] }
 0x168   :  { %v5199_v17 = vcombine.high %v623_v3, %v627_v34  ;;  %v706_v10 = vld [vmem:[#allocation8 + $0xee0] sm:$0xff] }
 0x169   :  { %3449 = vmatpush1.bf16.msra.mxu0 %v5148_v40  ;;  %v631_v40 = vld [vmem:[#allocation8 + $0xc88] sm:$0xff] }
 0x16a   :  { %3613 = vmatpush1.bf16.msra.mxu1 %v5150_v41  ;;  %3450 = vmatprep.subr.bf16.mxu0 %v5157_v43  ;;  %v635_v41 = vld [vmem:[#allocation8 + $0xca8] sm:$0xff]  ;;  %v5196_v43 = vcombine.low %v622_v62, %v626_v63  ;;  %v670_v62 = vld [vmem:[#allocation8 + $0xdc0] sm:$0xff] }
 0x16b   :  { %3614 = vmatprep.subr.bf16.mxu1 %v5159_v44  ;;  %v5198_v44 = vcombine.low %v623_v3, %v627_v34  ;;  %v5207_v46 = vcombine.high %v631_v40, %v635_v41  ;;  %v674_v63 = vld [vmem:[#allocation8 + $0xde0] sm:$0xff]  ;;  %v675_v3 = vld [vmem:[#allocation8 + $0xde8] sm:$0xff]  ;;  %v5236_v34 = vcombine.low %v662_v24, %v666_v26 }
 0x16d   :  { %3451 = vmatpush1.bf16.msra.mxu0 %v5156_v49  ;;  %v639_v49 = vld [vmem:[#allocation8 + $0xcc8] sm:$0xff] }
 0x16e   :  { %3615 = vmatpush1.bf16.msra.mxu1 %v5158_v53  ;;  %3452 = vmatprep.subr.bf16.mxu0 %v5165_v55  ;;  %v643_v53 = vld [vmem:[#allocation8 + $0xce8] sm:$0xff]  ;;  %v5204_v55 = vcombine.low %v630_v38, %v634_v12  ;;  %v678_v12 = vld [vmem:[#allocation8 + $0xe00] sm:$0xff] }
 0x16f   :  { %3616 = vmatprep.subr.bf16.mxu1 %v5167_v51  ;;  %v5206_v51 = vcombine.low %v631_v40, %v635_v41  ;;  %v5215_v57 = vcombine.high %v639_v49, %v643_v53  ;;  %v679_v40 = vld [vmem:[#allocation8 + $0xe08] sm:$0xff] }
 0x170   :  { %v683_v41 = vld [vmem:[#allocation8 + $0xe28] sm:$0xff] }
 0x171   :  { %3453 = vmatpush1.bf16.msra.mxu0 %v5164_v60  ;;  %v647_v60 = vld [vmem:[#allocation8 + $0xd08] sm:$0xff] }
 0x172   :  { %3617 = vmatpush1.bf16.msra.mxu1 %v5166_v0  ;;  %3454 = vmatprep.subr.bf16.mxu0 %v5173_v1  ;;  %v651_v0 = vld [vmem:[#allocation8 + $0xd28] sm:$0xff]  ;;  %v5212_v1 = vcombine.low %v638_v47, %v642_v48  ;;  %v686_v47 = vld [vmem:[#allocation8 + $0xe40] sm:$0xff] }
 0x173   :  { %3618 = vmatprep.subr.bf16.mxu1 %v5175_v4  ;;  %v5214_v4 = vcombine.low %v639_v49, %v643_v53  ;;  %v5223_v6 = vcombine.high %v647_v60, %v651_v0  ;;  %v690_v48 = vld [vmem:[#allocation8 + $0xe60] sm:$0xff]  ;;  %v687_v49 = vld [vmem:[#allocation8 + $0xe48] sm:$0xff] }
 0x174   :  { %v691_v53 = vld [vmem:[#allocation8 + $0xe68] sm:$0xff] }
 0x175   :  { %3455 = vmatpush1.bf16.msra.mxu0 %v5172_v11  ;;  %v655_v11 = vld [vmem:[#allocation8 + $0xd48] sm:$0xff] }
 0x176   :  { %3619 = vmatpush1.bf16.msra.mxu1 %v5174_v13  ;;  %3456 = vmatprep.subr.bf16.mxu0 %v5181_v14  ;;  %v659_v13 = vld [vmem:[#allocation8 + $0xd68] sm:$0xff]  ;;  %v5220_v14 = vcombine.low %v646_v52, %v650_v58  ;;  %v694_v52 = vld [vmem:[#allocation8 + $0xe80] sm:$0xff] }
 0x177   :  { %3620 = vmatprep.subr.bf16.mxu1 %v5183_v15  ;;  %v5222_v15 = vcombine.low %v647_v60, %v651_v0  ;;  %v5231_v18 = vcombine.high %v655_v11, %v659_v13  ;;  %v698_v58 = vld [vmem:[#allocation8 + $0xea0] sm:$0xff]  ;;  %v695_v60 = vld [vmem:[#allocation8 + $0xe88] sm:$0xff] }
 0x178   :  { %v699_v0 = vld [vmem:[#allocation8 + $0xea8] sm:$0xff] }
 0x179   :  { %3457 = vmatpush1.bf16.msra.mxu0 %v5180_v30  ;;  %v663_v30 = vld [vmem:[#allocation8 + $0xd88] sm:$0xff] }
 0x17a   :  { %3621 = vmatpush1.bf16.msra.mxu1 %v5182_v31  ;;  %3467 = vmatprep.subr.bf16.mxu0 %v5189_v33  ;;  %v667_v31 = vld [vmem:[#allocation8 + $0xda8] sm:$0xff]  ;;  %v5230_v33 = vcombine.low %v655_v11, %v659_v13 }
 0x17b   :  { %3631 = vmatprep.subr.bf16.mxu1 %v5191_v59  ;;  %v5237_v59 = vcombine.high %v662_v24, %v666_v26  ;;  %v5239_v61 = vcombine.high %v663_v30, %v667_v31  ;;  %v703_v11 = vld [vmem:[#allocation8 + $0xec8] sm:$0xff]  ;;  %v710_v24 = vld [vmem:[#allocation8 + $0xf00] sm:$0xff] }
 0x17c   :  { %3459 = vmatmul.mubr.bf16.vlgmr.msra.gmra.mrb[0].mxu0 %v6010_v35  ;;  %v707_v13 = vld [vmem:[#allocation8 + $0xee8] sm:$0xff]  ;;  %v714_v26 = vld [vmem:[#allocation8 + $0xf20] sm:$0xff] }
 0x17d   :  { %3623 = vmatmul.mubr.bf16.vlgmr.msra.gmra.mrb[0].mxu1 %v6010_v35  ;;  %3468 = vmatpush1.bf16.msra.mxu0 %v5188_v2  ;;  %v671_v2 = vld [vmem:[#allocation8 + $0xdc8] sm:$0xff] }
 0x17e   :  { %3499 = vmatprep.mubr.bf16.mxu0 %v6013_v39  ;;  %3632 = vmatpush1.bf16.msra.mxu1 %v5190_v36  ;;  %v5238_v36 = vcombine.low %v663_v30, %v667_v31  ;;  %v5247_v38 = vcombine.high %v671_v2, %v675_v3  ;;  %v711_v30 = vld [vmem:[#allocation8 + $0xf08] sm:$0xff] }
 0x17f   :  { %3663 = vmatprep.mubr.bf16.mxu1 %v6013_v39  ;;  %3469 = vmatprep.subr.bf16.mxu0 %v5197_v37  ;;  %v5245_v37 = vcombine.high %v670_v62, %v674_v63  ;;  %v715_v31 = vld [vmem:[#allocation8 + $0xf28] sm:$0xff] }
 0x180   :  { %3633 = vmatprep.subr.bf16.mxu1 %v5199_v17  ;;  %v682_v17 = vld [vmem:[#allocation8 + $0xe20] sm:$0xff] }
 0x181   :  { %3470 = vmatpush1.bf16.msra.mxu0 %v5196_v43  ;;  %v5244_v43 = vcombine.low %v670_v62, %v674_v63  ;;  %v718_v62 = vld [vmem:[#allocation8 + $0xf40] sm:$0xff] }
 0x182   :  { %3634 = vmatpush1.bf16.msra.mxu1 %v5198_v44  ;;  %3471 = vmatprep.subr.bf16.mxu0 %v5205_v45  ;;  %v5246_v44 = vcombine.low %v671_v2, %v675_v3  ;;  %v5253_v45 = vcombine.high %v678_v12, %v682_v17  ;;  %v722_v63 = vld [vmem:[#allocation8 + $0xf60] sm:$0xff]  ;;  %v719_v2 = vld [vmem:[#allocation8 + $0xf48] sm:$0xff] }
 0x183   :  { %3635 = vmatprep.subr.bf16.mxu1 %v5207_v46  ;;  %v5255_v46 = vcombine.high %v679_v40, %v683_v41  ;;  %v723_v3 = vld [vmem:[#allocation8 + $0xf68] sm:$0xff] }
 0x185   :  { %3472 = vmatpush1.bf16.msra.mxu0 %v5204_v55  ;;  %v5252_v55 = vcombine.low %v678_v12, %v682_v17  ;;  %v726_v12 = vld [vmem:[#allocation8 + $0xf80] sm:$0xff] }
 0x186   :  { %3636 = vmatpush1.bf16.msra.mxu1 %v5206_v51  ;;  %3473 = vmatprep.subr.bf16.mxu0 %v5213_v56  ;;  %v5254_v51 = vcombine.low %v679_v40, %v683_v41  ;;  %v5261_v56 = vcombine.high %v686_v47, %v690_v48  ;;  %v730_v17 = vld [vmem:[#allocation8 + $0xfa0] sm:$0xff]  ;;  %v727_v40 = vld [vmem:[#allocation8 + $0xf88] sm:$0xff] }
 0x187   :  { %3637 = vmatprep.subr.bf16.mxu1 %v5215_v57  ;;  %v5263_v57 = vcombine.high %v687_v49, %v691_v53  ;;  %v731_v41 = vld [vmem:[#allocation8 + $0xfa8] sm:$0xff] }
 0x189   :  { %3474 = vmatpush1.bf16.msra.mxu0 %v5212_v1  ;;  %v5260_v1 = vcombine.low %v686_v47, %v690_v48  ;;  %v734_v47 = vld [vmem:[#allocation8 + $0xfc0] sm:$0xff] }
 0x18a   :  { %3638 = vmatpush1.bf16.msra.mxu1 %v5214_v4  ;;  %3475 = vmatprep.subr.bf16.mxu0 %v5221_v5  ;;  %v5262_v4 = vcombine.low %v687_v49, %v691_v53  ;;  %v5269_v5 = vcombine.high %v694_v52, %v698_v58  ;;  %v738_v48 = vld [vmem:[#allocation8 + $0xfe0] sm:$0xff]  ;;  %v735_v49 = vld [vmem:[#allocation8 + $0xfc8] sm:$0xff] }
 0x18b   :  { %3639 = vmatprep.subr.bf16.mxu1 %v5223_v6  ;;  %v5271_v6 = vcombine.high %v695_v60, %v699_v0  ;;  %v739_v53 = vld [vmem:[#allocation8 + $0xfe8] sm:$0xff] }
 0x18d   :  { %3476 = vmatpush1.bf16.msra.mxu0 %v5220_v14  ;;  %v5268_v14 = vcombine.low %v694_v52, %v698_v58  ;;  %v232_v52 = vld [vmem:[#allocation8 + $0x10] sm:$0xff] }
 0x18e   :  { %3640 = vmatpush1.bf16.msra.mxu1 %v5222_v15  ;;  %3477 = vmatprep.subr.bf16.mxu0 %v5229_v16  ;;  %v5270_v15 = vcombine.low %v695_v60, %v699_v0  ;;  %v5277_v16 = vcombine.high %v702_v9, %v706_v10  ;;  %v236_v58 = vld [vmem:[#allocation8 + $0x30] sm:$0xff]  ;;  %v233_v60 = vld [vmem:[#allocation8 + $0x18] sm:$0xff] }
 0x18f   :  { %3641 = vmatprep.subr.bf16.mxu1 %v5231_v18  ;;  %v5279_v18 = vcombine.high %v703_v11, %v707_v13  ;;  %v237_v0 = vld [vmem:[#allocation8 + $0x38] sm:$0xff] }
 0x191   :  { %3478 = vmatpush1.bf16.msra.mxu0 %v5228_v32  ;;  %v5276_v32 = vcombine.low %v702_v9, %v706_v10  ;;  %v4811_v9 = vcombine.high %v233_v60, %v237_v0  ;;  %v240_v10 = vld [vmem:[#allocation8 + $0x50] sm:$0xff] }
 0x192   :  { %3642 = vmatpush1.bf16.msra.mxu1 %v5230_v33  ;;  %3479 = vmatprep.subr.bf16.mxu0 %v5237_v59  ;;  %v5278_v33 = vcombine.low %v703_v11, %v707_v13  ;;  %v5285_v59 = vcombine.high %v710_v24, %v714_v26  ;;  %v244_v11 = vld [vmem:[#allocation8 + $0x70] sm:$0xff]  ;;  %v4808_v13 = vcombine.low %v232_v52, %v236_v58 }
 0x193   :  { %3643 = vmatprep.subr.bf16.mxu1 %v5239_v61  ;;  %v5287_v61 = vcombine.high %v711_v30, %v715_v31 }
 0x195   :  { %3480 = vmatpush1.bf16.msra.mxu0 %v5236_v34  ;;  %v5284_v34 = vcombine.low %v710_v24, %v714_v26  ;;  %v4817_v24 = vcombine.high %v240_v10, %v244_v11  ;;  %v248_v26 = vld [vmem:[#allocation8 + $0x90] sm:$0xff] }
 0x196   :  { %3644 = vmatpush1.bf16.msra.mxu1 %v5238_v36  ;;  %3481 = vmatprep.subr.bf16.mxu0 %v5245_v37  ;;  %v5286_v36 = vcombine.low %v711_v30, %v715_v31  ;;  %v5293_v37 = vcombine.high %v718_v62, %v722_v63  ;;  %v252_v30 = vld [vmem:[#allocation8 + $0xb0] sm:$0xff]  ;;  %v249_v31 = vld [vmem:[#allocation8 + $0x98] sm:$0xff] }
 0x197   :  { %3645 = vmatprep.subr.bf16.mxu1 %v5247_v38  ;;  %v5295_v38 = vcombine.high %v719_v2, %v723_v3 }
 0x199   :  { %3482 = vmatpush1.bf16.msra.mxu0 %v5244_v43  ;;  %v5292_v43 = vcombine.low %v718_v62, %v722_v63  ;;  %v256_v63 = vld [vmem:[#allocation8 + $0xd0] sm:$0xff] }
 0x19a   :  { %3646 = vmatpush1.bf16.msra.mxu1 %v5246_v44  ;;  %3483 = vmatprep.subr.bf16.mxu0 %v5253_v45  ;;  %v5294_v44 = vcombine.low %v719_v2, %v723_v3  ;;  %v5301_v45 = vcombine.high %v726_v12, %v730_v17  ;;  %v260_v2 = vld [vmem:[#allocation8 + $0xf0] sm:$0xff]  ;;  %v257_v3 = vld [vmem:[#allocation8 + $0xd8] sm:$0xff] }
 0x19b   :  { %3647 = vmatprep.subr.bf16.mxu1 %v5255_v46  ;;  %v5303_v46 = vcombine.high %v727_v40, %v731_v41 }
 0x19d   :  { %3484 = vmatpush1.bf16.msra.mxu0 %v5252_v55  ;;  %v5300_v55 = vcombine.low %v726_v12, %v730_v17  ;;  %v264_v17 = vld [vmem:[#allocation8 + $0x110] sm:$0xff] }
 0x19e   :  { %3648 = vmatpush1.bf16.msra.mxu1 %v5254_v51  ;;  %3485 = vmatprep.subr.bf16.mxu0 %v5261_v56  ;;  %v5302_v51 = vcombine.low %v727_v40, %v731_v41  ;;  %v5309_v56 = vcombine.high %v734_v47, %v738_v48  ;;  %v268_v40 = vld [vmem:[#allocation8 + $0x130] sm:$0xff]  ;;  %v265_v41 = vld [vmem:[#allocation8 + $0x118] sm:$0xff] }
 0x19f   :  { %3649 = vmatprep.subr.bf16.mxu1 %v5263_v57  ;;  %v5311_v57 = vcombine.high %v735_v49, %v739_v53 }
 0x1a1   :  { %3486 = vmatpush1.bf16.msra.mxu0 %v5260_v1  ;;  %v5308_v1 = vcombine.low %v734_v47, %v738_v48  ;;  %v272_v47 = vld [vmem:[#allocation8 + $0x150] sm:$0xff] }
 0x1a2   :  { %3650 = vmatpush1.bf16.msra.mxu1 %v5262_v4  ;;  %3487 = vmatprep.subr.bf16.mxu0 %v5269_v5  ;;  %v5310_v4 = vcombine.low %v735_v49, %v739_v53  ;;  %v220_v5 = vmax.f32 %v5994_v29, 0.0  ;;  %v276_v48 = vld [vmem:[#allocation8 + $0x170] sm:$0xff]  ;;  %v273_v49 = vld [vmem:[#allocation8 + $0x158] sm:$0xff] }
 0x1a3   :  { %3651 = vmatprep.subr.bf16.mxu1 %v5271_v6  ;;  %v4809_v6 = vcombine.high %v232_v52, %v236_v58  ;;  %v277_v53 = vld [vmem:[#allocation8 + $0x178] sm:$0xff]  ;;  %v280_v52 = vld [vmem:[#allocation8 + $0x190] sm:$0xff] }
 0x1a4   :  { %v284_v58 = vld [vmem:[#allocation8 + $0x1b0] sm:$0xff] }
 0x1a5   :  { %3488 = vmatpush1.bf16.msra.mxu0 %v5268_v14  ;;  %v241_v14 = vld [vmem:[#allocation8 + $0x58] sm:$0xff] }
 0x1a6   :  { %3652 = vmatpush1.bf16.msra.mxu1 %v5270_v15  ;;  %3489 = vmatprep.subr.bf16.mxu0 %v5277_v16  ;;  %v245_v15 = vld [vmem:[#allocation8 + $0x78] sm:$0xff]  ;;  %v6019_v16 = vpack.c.bf16 %v220_v5, %v220_v5  ;;  %v4857_v5 = vcombine.high %v280_v52, %v284_v58 }
 0x1a7   :  { %3653 = vmatprep.subr.bf16.mxu1 %v5279_v18  ;;  %v4810_v18 = vcombine.low %v233_v60, %v237_v0  ;;  %v4819_v29 = vcombine.high %v241_v14, %v245_v15  ;;  %v281_v60 = vld [vmem:[#allocation8 + $0x198] sm:$0xff] }
 0x1a8   :  { %v285_v0 = vld [vmem:[#allocation8 + $0x1b8] sm:$0xff] }
 0x1a9   :  { %3490 = vmatpush1.bf16.msra.mxu0 %v5276_v32  ;;  %v253_v32 = vld [vmem:[#allocation8 + $0xb8] sm:$0xff] }
 0x1aa   :  { %3654 = vmatpush1.bf16.msra.mxu1 %v5278_v33  ;;  %3491 = vmatprep.subr.bf16.mxu0 %v5285_v59  ;;  %v4816_v33 = vcombine.low %v240_v10, %v244_v11  ;;  %v4818_v59 = vcombine.low %v241_v14, %v245_v15  ;;  %v4827_v62 = vcombine.high %v249_v31, %v253_v32  ;;  %v292_v10 = vld [vmem:[#allocation8 + $0x1f0] sm:$0xff]  ;;  %v289_v11 = vld [vmem:[#allocation8 + $0x1d8] sm:$0xff] }
 0x1ab   :  { %3655 = vmatprep.subr.bf16.mxu1 %v5287_v61  ;;  %v4825_v61 = vcombine.high %v248_v26, %v252_v30  ;;  %v4856_v14 = vcombine.low %v280_v52, %v284_v58  ;;  %v4858_v15 = vcombine.low %v281_v60, %v285_v0  ;;  %v332_v52 = vld [vmem:[#allocation8 + $0x330] sm:$0xff]  ;;  %v329_v58 = vld [vmem:[#allocation8 + $0x318] sm:$0xff] }
 0x1ad   :  { %3492 = vmatpush1.bf16.msra.mxu0 %v5284_v34  ;;  %v261_v34 = vld [vmem:[#allocation8 + $0xf8] sm:$0xff] }
 0x1ae   :  { %3656 = vmatpush1.bf16.msra.mxu1 %v5286_v36  ;;  %3493 = vmatprep.subr.bf16.mxu0 %v5293_v37  ;;  %v4824_v36 = vcombine.low %v248_v26, %v252_v30  ;;  %v4826_v37 = vcombine.low %v249_v31, %v253_v32  ;;  %v4835_v12 = vcombine.high %v257_v3, %v261_v34  ;;  %v296_v26 = vld [vmem:[#allocation8 + $0x210] sm:$0xff]  ;;  %v301_v31 = vld [vmem:[#allocation8 + $0x238] sm:$0xff] }
 0x1af   :  { %3657 = vmatprep.subr.bf16.mxu1 %v5295_v38  ;;  %v4833_v38 = vcombine.high %v256_v63, %v260_v2  ;;  %v300_v30 = vld [vmem:[#allocation8 + $0x230] sm:$0xff] }
 0x1b1   :  { %3494 = vmatpush1.bf16.msra.mxu0 %v5292_v43  ;;  %v269_v43 = vld [vmem:[#allocation8 + $0x138] sm:$0xff] }
 0x1b2   :  { %3658 = vmatpush1.bf16.msra.mxu1 %v5294_v44  ;;  %3495 = vmatprep.subr.bf16.mxu0 %v5301_v45  ;;  %v4834_v44 = vcombine.low %v257_v3, %v261_v34  ;;  %v4841_v45 = vcombine.high %v264_v17, %v268_v40  ;;  %v309_v3 = vld [vmem:[#allocation8 + $0x278] sm:$0xff]  ;;  %v4872_v34 = vcombine.low %v296_v26, %v300_v30 }
 0x1b3   :  { %3659 = vmatprep.subr.bf16.mxu1 %v5303_v46  ;;  %v4843_v46 = vcombine.high %v265_v41, %v269_v43 }
 0x1b5   :  { %3496 = vmatpush1.bf16.msra.mxu0 %v5300_v55  ;;  %v4840_v55 = vcombine.low %v264_v17, %v268_v40  ;;  %v316_v17 = vld [vmem:[#allocation8 + $0x2b0] sm:$0xff]  ;;  %v313_v40 = vld [vmem:[#allocation8 + $0x298] sm:$0xff] }
 0x1b6   :  { %3660 = vmatpush1.bf16.msra.mxu1 %v5302_v51  ;;  %3497 = vmatprep.subr.bf16.mxu0 %v5309_v56  ;;  %v4842_v51 = vcombine.low %v265_v41, %v269_v43  ;;  %v4849_v56 = vcombine.high %v272_v47, %v276_v48  ;;  %v317_v41 = vld [vmem:[#allocation8 + $0x2b8] sm:$0xff] }
 0x1b7   :  { %3661 = vmatprep.subr.bf16.mxu1 %v5311_v57  ;;  %v4851_v57 = vcombine.high %v273_v49, %v277_v53 }
 0x1b9   :  { %3498 = vmatpush1.bf16.msra.mxu0 %v5308_v1  ;;  %v4848_v1 = vcombine.low %v272_v47, %v276_v48  ;;  %v324_v47 = vld [vmem:[#allocation8 + $0x2f0] sm:$0xff]  ;;  %v321_v48 = vld [vmem:[#allocation8 + $0x2d8] sm:$0xff] }
 0x1ba   :  { %3662 = vmatpush1.bf16.msra.mxu1 %v5310_v4  ;;  %3672 = vmatprep.subr.bf16.mxu0 %v4809_v6  ;;  %v4850_v4 = vcombine.low %v273_v49, %v277_v53  ;;  %v4859_v6 = vcombine.high %v281_v60, %v285_v0  ;;  %v325_v49 = vld [vmem:[#allocation8 + $0x2f8] sm:$0xff] }
 0x1bb   :  { %3836 = vmatprep.subr.bf16.mxu1 %v4811_v9  ;;  %v288_v9 = vld [vmem:[#allocation8 + $0x1d0] sm:$0xff]  ;;  %v333_v60 = vld [vmem:[#allocation8 + $0x338] sm:$0xff] }
 0x1bc   :  { %3500 = vmatmul.mubr.bf16.vlgmr.msra.gmra.mrb[0].mxu0 %v6019_v16  ;;  %v4864_v32 = vcombine.low %v288_v9, %v292_v10 }
 0x1bd   :  { %3664 = vmatmul.mubr.bf16.vlgmr.msra.gmra.mrb[0].mxu1 %v6019_v16  ;;  %3673 = vmatpush1.bf16.msra.mxu0 %v4808_v13  ;;  %v293_v13 = vld [vmem:[#allocation8 + $0x1f8] sm:$0xff] }
 0x1be   :  { %3704 = vmatprep.mubr.bf16.mxu0 %v5973_v7  ;;  %3837 = vmatpush1.bf16.msra.mxu1 %v4810_v18  ;;  %v4865_v18 = vcombine.high %v288_v9, %v292_v10  ;;  %v340_v9 = vld [vmem:[#allocation8 + $0x370] sm:$0xff]  ;;  %v337_v10 = vld [vmem:[#allocation8 + $0x358] sm:$0xff] }
 0x1bf   :  { %3868 = vmatprep.mubr.bf16.mxu1 %v5973_v7  ;;  %3674 = vmatprep.subr.bf16.mxu0 %v4817_v24  ;;  %v4832_v7 = vcombine.low %v256_v63, %v260_v2  ;;  %v4867_v24 = vcombine.high %v289_v11, %v293_v13  ;;  %v308_v63 = vld [vmem:[#allocation8 + $0x270] sm:$0xff]  ;;  %v305_v2 = vld [vmem:[#allocation8 + $0x258] sm:$0xff] }
 0x1c0   :  { %3838 = vmatprep.subr.bf16.mxu1 %v4819_v29  ;;  %v297_v29 = vld [vmem:[#allocation8 + $0x218] sm:$0xff] }
 0x1c1   :  { %3675 = vmatpush1.bf16.msra.mxu0 %v4816_v33  ;;  %v4866_v33 = vcombine.low %v289_v11, %v293_v13  ;;  %v341_v11 = vld [vmem:[#allocation8 + $0x378] sm:$0xff] }
 0x1c2   :  { %3839 = vmatpush1.bf16.msra.mxu1 %v4818_v59  ;;  %3676 = vmatprep.subr.bf16.mxu0 %v4825_v61  ;;  %v4873_v59 = vcombine.high %v296_v26, %v300_v30  ;;  %v4875_v61 = vcombine.high %v297_v29, %v301_v31  ;;  %v348_v26 = vld [vmem:[#allocation8 + $0x3b0] sm:$0xff]  ;;  %v345_v30 = vld [vmem:[#allocation8 + $0x398] sm:$0xff] }
 0x1c3   :  { %3840 = vmatprep.subr.bf16.mxu1 %v4827_v62  ;;  %v304_v62 = vld [vmem:[#allocation8 + $0x250] sm:$0xff] }
 0x1c4   :  { %v4880_v43 = vcombine.low %v304_v62, %v308_v63 }
 0x1c5   :  { %3677 = vmatpush1.bf16.msra.mxu0 %v4824_v36  ;;  %v4874_v36 = vcombine.low %v297_v29, %v301_v31  ;;  %v349_v29 = vld [vmem:[#allocation8 + $0x3b8] sm:$0xff] }
 0x1c6   :  { %3841 = vmatpush1.bf16.msra.mxu1 %v4826_v37  ;;  %3678 = vmatprep.subr.bf16.mxu0 %v4833_v38  ;;  %v4881_v37 = vcombine.high %v304_v62, %v308_v63  ;;  %v4883_v38 = vcombine.high %v305_v2, %v309_v3  ;;  %v356_v62 = vld [vmem:[#allocation8 + $0x3f0] sm:$0xff]  ;;  %v353_v63 = vld [vmem:[#allocation8 + $0x3d8] sm:$0xff] }
 0x1c7   :  { %3842 = vmatprep.subr.bf16.mxu1 %v4835_v12  ;;  %v312_v12 = vld [vmem:[#allocation8 + $0x290] sm:$0xff] }
 0x1c8   :  { %v4888_v53 = vcombine.low %v312_v12, %v316_v17 }
 0x1c9   :  { %3679 = vmatpush1.bf16.msra.mxu0 %v4832_v7  ;;  %v4882_v7 = vcombine.low %v305_v2, %v309_v3  ;;  %v357_v2 = vld [vmem:[#allocation8 + $0x3f8] sm:$0xff] }
 0x1ca   :  { %3843 = vmatpush1.bf16.msra.mxu1 %v4834_v44  ;;  %3680 = vmatprep.subr.bf16.mxu0 %v4841_v45  ;;  %v4889_v44 = vcombine.high %v312_v12, %v316_v17  ;;  %v4891_v45 = vcombine.high %v313_v40, %v317_v41  ;;  %v364_v12 = vld [vmem:[#allocation8 + $0x430] sm:$0xff]  ;;  %v361_v17 = vld [vmem:[#allocation8 + $0x418] sm:$0xff] }
 0x1cb   :  { %3844 = vmatprep.subr.bf16.mxu1 %v4843_v46  ;;  %v320_v46 = vld [vmem:[#allocation8 + $0x2d0] sm:$0xff] }
 0x1cc   :  { %v4896_v0 = vcombine.low %v320_v46, %v324_v47 }
 0x1cd   :  { %3681 = vmatpush1.bf16.msra.mxu0 %v4840_v55  ;;  %v4890_v55 = vcombine.low %v313_v40, %v317_v41  ;;  %v365_v40 = vld [vmem:[#allocation8 + $0x438] sm:$0xff] }
 0x1ce   :  { %3845 = vmatpush1.bf16.msra.mxu1 %v4842_v51  ;;  %3682 = vmatprep.subr.bf16.mxu0 %v4849_v56  ;;  %v4897_v51 = vcombine.high %v320_v46, %v324_v47  ;;  %v4899_v56 = vcombine.high %v321_v48, %v325_v49  ;;  %v372_v46 = vld [vmem:[#allocation8 + $0x470] sm:$0xff] }
 0x1cf   :  { %3846 = vmatprep.subr.bf16.mxu1 %v4851_v57  ;;  %v328_v57 = vld [vmem:[#allocation8 + $0x310] sm:$0xff] }
 0x1d0   :  { %v4904_v13 = vcombine.low %v328_v57, %v332_v52 }
 0x1d1   :  { %3683 = vmatpush1.bf16.msra.mxu0 %v4848_v1  ;;  %v4898_v1 = vcombine.low %v321_v48, %v325_v49  ;;  %v369_v48 = vld [vmem:[#allocation8 + $0x458] sm:$0xff] }
 0x1d2   :  { %3847 = vmatpush1.bf16.msra.mxu1 %v4850_v4  ;;  %3684 = vmatprep.subr.bf16.mxu0 %v4857_v5  ;;  %v4905_v4 = vcombine.high %v328_v57, %v332_v52  ;;  %v4907_v5 = vcombine.high %v329_v58, %v333_v60  ;;  %v373_v49 = vld [vmem:[#allocation8 + $0x478] sm:$0xff] }
 0x1d3   :  { %3848 = vmatprep.subr.bf16.mxu1 %v4859_v6  ;;  %v336_v6 = vld [vmem:[#allocation8 + $0x350] sm:$0xff]  ;;  %v4947_v57 = vcombine.high %v369_v48, %v373_v49  ;;  %v377_v52 = vld [vmem:[#allocation8 + $0x498] sm:$0xff] }
 0x1d4   :  { %v4912_v31 = vcombine.low %v336_v6, %v340_v9 }
 0x1d5   :  { %3685 = vmatpush1.bf16.msra.mxu0 %v4856_v14  ;;  %v4906_v14 = vcombine.low %v329_v58, %v333_v60  ;;  %v381_v58 = vld [vmem:[#allocation8 + $0x4b8] sm:$0xff] }
 0x1d6   :  { %3849 = vmatpush1.bf16.msra.mxu1 %v4858_v15  ;;  %3686 = vmatprep.subr.bf16.mxu0 %v4865_v18  ;;  %v4913_v15 = vcombine.high %v336_v6, %v340_v9  ;;  %v4915_v18 = vcombine.high %v337_v10, %v341_v11  ;;  %v388_v6 = vld [vmem:[#allocation8 + $0x4f0] sm:$0xff]  ;;  %v385_v9 = vld [vmem:[#allocation8 + $0x4d8] sm:$0xff] }
 0x1d7   :  { %3850 = vmatprep.subr.bf16.mxu1 %v4867_v24  ;;  %v344_v24 = vld [vmem:[#allocation8 + $0x390] sm:$0xff] }
 0x1d8   :  { %v4920_v3 = vcombine.low %v344_v24, %v348_v26 }
 0x1d9   :  { %3687 = vmatpush1.bf16.msra.mxu0 %v4864_v32  ;;  %v4914_v32 = vcombine.low %v337_v10, %v341_v11  ;;  %v389_v10 = vld [vmem:[#allocation8 + $0x4f8] sm:$0xff] }
 0x1da   :  { %3851 = vmatpush1.bf16.msra.mxu1 %v4866_v33  ;;  %3688 = vmatprep.subr.bf16.mxu0 %v4873_v59  ;;  %v4921_v33 = vcombine.high %v344_v24, %v348_v26  ;;  %v4923_v59 = vcombine.high %v345_v30, %v349_v29  ;;  %v393_v24 = vld [vmem:[#allocation8 + $0x518] sm:$0xff] }
 0x1db   :  { %3852 = vmatprep.subr.bf16.mxu1 %v4875_v61  ;;  %v352_v61 = vld [vmem:[#allocation8 + $0x3d0] sm:$0xff]  ;;  %v397_v26 = vld [vmem:[#allocation8 + $0x538] sm:$0xff] }
 0x1dc   :  { %v4928_v41 = vcombine.low %v352_v61, %v356_v62 }
 0x1dd   :  { %3689 = vmatpush1.bf16.msra.mxu0 %v4872_v34  ;;  %v4922_v34 = vcombine.low %v345_v30, %v349_v29  ;;  %v4962_v30 = vcombine.low %v385_v9, %v389_v10 }
 0x1de   :  { %3853 = vmatpush1.bf16.msra.mxu1 %v4874_v36  ;;  %3690 = vmatprep.subr.bf16.mxu0 %v4881_v37  ;;  %v4929_v36 = vcombine.high %v352_v61, %v356_v62  ;;  %v4931_v37 = vcombine.high %v353_v63, %v357_v2  ;;  %v405_v61 = vld [vmem:[#allocation8 + $0x578] sm:$0xff] }
 0x1df   :  { %3854 = vmatprep.subr.bf16.mxu1 %v4883_v38  ;;  %v360_v38 = vld [vmem:[#allocation8 + $0x410] sm:$0xff] }
 0x1e0   :  { %v4936_v47 = vcombine.low %v360_v38, %v364_v12 }
 0x1e1   :  { %3691 = vmatpush1.bf16.msra.mxu0 %v4880_v43  ;;  %v4930_v43 = vcombine.low %v353_v63, %v357_v2  ;;  %v4970_v63 = vcombine.low %v393_v24, %v397_v26 }
 0x1e2   :  { %3855 = vmatpush1.bf16.msra.mxu1 %v4882_v7  ;;  %3692 = vmatprep.subr.bf16.mxu0 %v4889_v44  ;;  %v4937_v7 = vcombine.high %v360_v38, %v364_v12  ;;  %v4939_v44 = vcombine.high %v361_v17, %v365_v40  ;;  %v413_v38 = vld [vmem:[#allocation8 + $0x5b8] sm:$0xff] }
 0x1e3   :  { %3856 = vmatprep.subr.bf16.mxu1 %v4891_v45  ;;  %v368_v45 = vld [vmem:[#allocation8 + $0x450] sm:$0xff] }
 0x1e4   :  { %v4944_v60 = vcombine.low %v368_v45, %v372_v46 }
 0x1e5   :  { %3693 = vmatpush1.bf16.msra.mxu0 %v4888_v53  ;;  %v4938_v53 = vcombine.low %v361_v17, %v365_v40 }
 0x1e6   :  { %3857 = vmatpush1.bf16.msra.mxu1 %v4890_v55  ;;  %3694 = vmatprep.subr.bf16.mxu0 %v4897_v51  ;;  %v4945_v55 = vcombine.high %v368_v45, %v372_v46  ;;  %v376_v51 = vld [vmem:[#allocation8 + $0x490] sm:$0xff]  ;;  %v421_v45 = vld [vmem:[#allocation8 + $0x5f8] sm:$0xff] }
 0x1e7   :  { %3858 = vmatprep.subr.bf16.mxu1 %v4899_v56  ;;  %v380_v56 = vld [vmem:[#allocation8 + $0x4b0] sm:$0xff] }
 0x1e8   :  { %v4952_v11 = vcombine.low %v376_v51, %v380_v56 }
 0x1e9   :  { %3695 = vmatpush1.bf16.msra.mxu0 %v4896_v0  ;;  %v4946_v0 = vcombine.low %v369_v48, %v373_v49 }
 0x1ea   :  { %3859 = vmatpush1.bf16.msra.mxu1 %v4898_v1  ;;  %3696 = vmatprep.subr.bf16.mxu0 %v4905_v4  ;;  %v4953_v1 = vcombine.high %v376_v51, %v380_v56  ;;  %v4955_v4 = vcombine.high %v377_v52, %v381_v58  ;;  %v425_v51 = vld [vmem:[#allocation8 + $0x618] sm:$0xff] }
 0x1eb   :  { %3860 = vmatprep.subr.bf16.mxu1 %v4907_v5  ;;  %v384_v5 = vld [vmem:[#allocation8 + $0x4d0] sm:$0xff]  ;;  %v429_v56 = vld [vmem:[#allocation8 + $0x638] sm:$0xff] }
 0x1ed   :  { %3697 = vmatpush1.bf16.msra.mxu0 %v4904_v13  ;;  %v4961_v13 = vcombine.high %v384_v5, %v388_v6 }
 0x1ee   :  { %3861 = vmatpush1.bf16.msra.mxu1 %v4906_v14  ;;  %3698 = vmatprep.subr.bf16.mxu0 %v4913_v15  ;;  %v4963_v14 = vcombine.high %v385_v9, %v389_v10  ;;  %v392_v15 = vld [vmem:[#allocation8 + $0x510] sm:$0xff]  ;;  %v5002_v9 = vcombine.low %v425_v51, %v429_v56 }
 0x1ef   :  { %3862 = vmatprep.subr.bf16.mxu1 %v4915_v18  ;;  %v396_v18 = vld [vmem:[#allocation8 + $0x530] sm:$0xff] }
 0x1f0   :  { %v4969_v29 = vcombine.high %v392_v15, %v396_v18  ;;  %v4968_v62 = vcombine.low %v392_v15, %v396_v18  ;;  %v445_v15 = vld [vmem:[#allocation8 + $0x6b8] sm:$0xff] }
 0x1f1   :  { %3699 = vmatpush1.bf16.msra.mxu0 %v4912_v31  ;;  %v4971_v31 = vcombine.high %v393_v24, %v397_v26 }
 0x1f2   :  { %3863 = vmatpush1.bf16.msra.mxu1 %v4914_v32  ;;  %3700 = vmatprep.subr.bf16.mxu0 %v4921_v33  ;;  %v400_v32 = vld [vmem:[#allocation8 + $0x550] sm:$0xff] }
 0x1f3   :  { %3864 = vmatprep.subr.bf16.mxu1 %v4923_v59  ;;  %v404_v33 = vld [vmem:[#allocation8 + $0x570] sm:$0xff]  ;;  %v401_v59 = vld [vmem:[#allocation8 + $0x558] sm:$0xff] }
 0x1f4   :  { %v4977_v2 = vcombine.high %v400_v32, %v404_v33  ;;  %v4976_v12 = vcombine.low %v400_v32, %v404_v33  ;;  %v4978_v17 = vcombine.low %v401_v59, %v405_v61  ;;  %v453_v32 = vld [vmem:[#allocation8 + $0x6f8] sm:$0xff] }
 0x1f5   :  { %3701 = vmatpush1.bf16.msra.mxu0 %v4920_v3  ;;  %v4979_v3 = vcombine.high %v401_v59, %v405_v61 }
 0x1f6   :  { %3865 = vmatpush1.bf16.msra.mxu1 %v4922_v34  ;;  %3702 = vmatprep.subr.bf16.mxu0 %v4929_v36  ;;  %v408_v34 = vld [vmem:[#allocation8 + $0x590] sm:$0xff] }
 0x1f7   :  { %3866 = vmatprep.subr.bf16.mxu1 %v4931_v37  ;;  %v412_v36 = vld [vmem:[#allocation8 + $0x5b0] sm:$0xff]  ;;  %v409_v37 = vld [vmem:[#allocation8 + $0x598] sm:$0xff] }
 0x1f8   :  { %v4985_v40 = vcombine.high %v408_v34, %v412_v36  ;;  %v4984_v46 = vcombine.low %v408_v34, %v412_v36  ;;  %v461_v34 = vld [vmem:[#allocation8 + $0x738] sm:$0xff] }
 0x1f9   :  { %3703 = vmatpush1.bf16.msra.mxu0 %v4928_v41  ;;  %v4987_v41 = vcombine.high %v409_v37, %v413_v38 }
 0x1fa   :  { %3867 = vmatpush1.bf16.msra.mxu1 %v4930_v43  ;;  %3713 = vmatprep.subr.bf16.mxu0 %v4937_v7  ;;  %v416_v43 = vld [vmem:[#allocation8 + $0x5d0] sm:$0xff] }
 0x1fb   :  { %3877 = vmatprep.subr.bf16.mxu1 %v4939_v44  ;;  %v420_v7 = vld [vmem:[#allocation8 + $0x5f0] sm:$0xff]  ;;  %v417_v44 = vld [vmem:[#allocation8 + $0x5d8] sm:$0xff] }
 0x1fc   :  { %3705 = vmatmul.mubr.bf16.vlgmr.msra.gmra.mrb[4].mxu0 %v5975_v8  ;;  %v4993_v48 = vcombine.high %v416_v43, %v420_v7  ;;  %v4995_v49 = vcombine.high %v417_v44, %v421_v45 }
 0x1fd   :  { %3869 = vmatmul.mubr.bf16.vlgmr.msra.gmra.mrb[4].mxu1 %v5975_v8  ;;  %3714 = vmatpush1.bf16.msra.mxu0 %v4936_v47  ;;  %v4954_v8 = vcombine.low %v377_v52, %v381_v58  ;;  %v4986_v47 = vcombine.low %v409_v37, %v413_v38  ;;  %v4994_v52 = vcombine.low %v417_v44, %v421_v45 }
 0x1fe   :  { %3745 = vmatprep.mubr.bf16.mxu0 %v5986_v19  ;;  %3878 = vmatpush1.bf16.msra.mxu1 %v4938_v53  ;;  %v424_v53 = vld [vmem:[#allocation8 + $0x610] sm:$0xff] }
 0x1ff   :  { %3909 = vmatprep.mubr.bf16.mxu1 %v5986_v19  ;;  %3715 = vmatprep.subr.bf16.mxu0 %v4945_v55  ;;  %v4960_v19 = vcombine.low %v384_v5, %v388_v6  ;;  %v428_v55 = vld [vmem:[#allocation8 + $0x630] sm:$0xff]  ;;  %v437_v5 = vld [vmem:[#allocation8 + $0x678] sm:$0xff] }
 0x200   :  { %3879 = vmatprep.subr.bf16.mxu1 %v4947_v57  ;;  %v4992_v57 = vcombine.low %v416_v43, %v420_v7  ;;  %v5001_v58 = vcombine.high %v424_v53, %v428_v55  ;;  %v5000_v6 = vcombine.low %v424_v53, %v428_v55  ;;  %v469_v43 = vld [vmem:[#allocation8 + $0x778] sm:$0xff] }
 0x201   :  { %3716 = vmatpush1.bf16.msra.mxu0 %v4944_v60  ;;  %v5003_v60 = vcombine.high %v425_v51, %v429_v56  ;;  %v477_v53 = vld [vmem:[#allocation8 + $0x7b8] sm:$0xff] }
 0x202   :  { %3880 = vmatpush1.bf16.msra.mxu1 %v4946_v0  ;;  %3717 = vmatprep.subr.bf16.mxu0 %v4953_v1  ;;  %v432_v0 = vld [vmem:[#allocation8 + $0x650] sm:$0xff] }
 0x203   :  { %3881 = vmatprep.subr.bf16.mxu1 %v4955_v4  ;;  %v436_v1 = vld [vmem:[#allocation8 + $0x670] sm:$0xff]  ;;  %v433_v4 = vld [vmem:[#allocation8 + $0x658] sm:$0xff] }
 0x204   :  { %v5009_v10 = vcombine.high %v432_v0, %v436_v1  ;;  %v5008_v18 = vcombine.low %v432_v0, %v436_v1  ;;  %v5010_v24 = vcombine.low %v433_v4, %v437_v5  ;;  %v485_v0 = vld [vmem:[#allocation8 + $0x7f8] sm:$0xff] }
 0x205   :  { %3718 = vmatpush1.bf16.msra.mxu0 %v4952_v11  ;;  %v5011_v11 = vcombine.high %v433_v4, %v437_v5 }
 0x206   :  { %3882 = vmatpush1.bf16.msra.mxu1 %v4954_v8  ;;  %3719 = vmatprep.subr.bf16.mxu0 %v4961_v13  ;;  %v440_v8 = vld [vmem:[#allocation8 + $0x690] sm:$0xff] }
 0x207   :  { %3883 = vmatprep.subr.bf16.mxu1 %v4963_v14  ;;  %v444_v13 = vld [vmem:[#allocation8 + $0x6b0] sm:$0xff]  ;;  %v441_v14 = vld [vmem:[#allocation8 + $0x698] sm:$0xff] }
 0x208   :  { %v5017_v26 = vcombine.high %v440_v8, %v444_v13  ;;  %v5016_v33 = vcombine.low %v440_v8, %v444_v13  ;;  %v5018_v59 = vcombine.low %v441_v14, %v445_v15  ;;  %v493_v8 = vld [vmem:[#allocation8 + $0x838] sm:$0xff] }
 0x209   :  { %3720 = vmatpush1.bf16.msra.mxu0 %v4960_v19  ;;  %v5019_v19 = vcombine.high %v441_v14, %v445_v15 }
 0x20a   :  { %3884 = vmatpush1.bf16.msra.mxu1 %v4962_v30  ;;  %3721 = vmatprep.subr.bf16.mxu0 %v4969_v29  ;;  %v448_v30 = vld [vmem:[#allocation8 + $0x6d0] sm:$0xff] }
 0x20b   :  { %3885 = vmatprep.subr.bf16.mxu1 %v4971_v31  ;;  %v452_v29 = vld [vmem:[#allocation8 + $0x6f0] sm:$0xff]  ;;  %v449_v31 = vld [vmem:[#allocation8 + $0x6d8] sm:$0xff] }
 0x20c   :  { %v5025_v61 = vcombine.high %v448_v30, %v452_v29  ;;  %v5024_v36 = vcombine.low %v448_v30, %v452_v29  ;;  %v5026_v37 = vcombine.low %v449_v31, %v453_v32  ;;  %v497_v30 = vld [vmem:[#allocation8 + $0x858] sm:$0xff] }
 0x20d   :  { %3722 = vmatpush1.bf16.msra.mxu0 %v4968_v62  ;;  %v5027_v62 = vcombine.high %v449_v31, %v453_v32  ;;  %v501_v29 = vld [vmem:[#allocation8 + $0x878] sm:$0xff] }
 0x20e   :  { %3886 = vmatpush1.bf16.msra.mxu1 %v4970_v63  ;;  %3723 = vmatprep.subr.bf16.mxu0 %v4977_v2  ;;  %v456_v63 = vld [vmem:[#allocation8 + $0x710] sm:$0xff] }
 0x20f   :  { %3887 = vmatprep.subr.bf16.mxu1 %v4979_v3  ;;  %v460_v2 = vld [vmem:[#allocation8 + $0x730] sm:$0xff]  ;;  %v457_v3 = vld [vmem:[#allocation8 + $0x718] sm:$0xff] }
 0x210   :  { %v5033_v38 = vcombine.high %v456_v63, %v460_v2  ;;  %v5032_v7 = vcombine.low %v456_v63, %v460_v2  ;;  %v5034_v44 = vcombine.low %v457_v3, %v461_v34  ;;  %v509_v63 = vld [vmem:[#allocation8 + $0x8b8] sm:$0xff] }
 0x211   :  { %3724 = vmatpush1.bf16.msra.mxu0 %v4976_v12  ;;  %v5035_v12 = vcombine.high %v457_v3, %v461_v34  ;;  %v5074_v3 = vcombine.low %v497_v30, %v501_v29 }
 0x212   :  { %3888 = vmatpush1.bf16.msra.mxu1 %v4978_v17  ;;  %3725 = vmatprep.subr.bf16.mxu0 %v4985_v40  ;;  %v464_v17 = vld [vmem:[#allocation8 + $0x750] sm:$0xff] }
 0x213   :  { %3889 = vmatprep.subr.bf16.mxu1 %v4987_v41  ;;  %v468_v40 = vld [vmem:[#allocation8 + $0x770] sm:$0xff]  ;;  %v465_v41 = vld [vmem:[#allocation8 + $0x758] sm:$0xff] }
 0x214   :  { %v5041_v45 = vcombine.high %v464_v17, %v468_v40  ;;  %v5040_v55 = vcombine.low %v464_v17, %v468_v40  ;;  %v5042_v51 = vcombine.low %v465_v41, %v469_v43  ;;  %v517_v17 = vld [vmem:[#allocation8 + $0x8f8] sm:$0xff] }
 0x215   :  { %3726 = vmatpush1.bf16.msra.mxu0 %v4984_v46  ;;  %v5043_v46 = vcombine.high %v465_v41, %v469_v43 }
 0x216   :  { %3890 = vmatpush1.bf16.msra.mxu1 %v4986_v47  ;;  %3727 = vmatprep.subr.bf16.mxu0 %v4993_v48  ;;  %v472_v47 = vld [vmem:[#allocation8 + $0x790] sm:$0xff] }
 0x217   :  { %3891 = vmatprep.subr.bf16.mxu1 %v4995_v49  ;;  %v476_v48 = vld [vmem:[#allocation8 + $0x7b0] sm:$0xff]  ;;  %v473_v49 = vld [vmem:[#allocation8 + $0x798] sm:$0xff] }
 0x218   :  { %v5049_v56 = vcombine.high %v472_v47, %v476_v48  ;;  %v5048_v1 = vcombine.low %v472_v47, %v476_v48  ;;  %v5050_v4 = vcombine.low %v473_v49, %v477_v53 }
 0x219   :  { %3728 = vmatpush1.bf16.msra.mxu0 %v4992_v57  ;;  %v5051_v57 = vcombine.high %v473_v49, %v477_v53  ;;  %v528_v53 = vld [vmem:[#allocation8 + $0x950] sm:$0xff] }
 0x21a   :  { %3892 = vmatpush1.bf16.msra.mxu1 %v4994_v52  ;;  %3729 = vmatprep.subr.bf16.mxu0 %v5001_v58  ;;  %v480_v52 = vld [vmem:[#allocation8 + $0x7d0] sm:$0xff] }
 0x21b   :  { %3893 = vmatprep.subr.bf16.mxu1 %v5003_v60  ;;  %v484_v58 = vld [vmem:[#allocation8 + $0x7f0] sm:$0xff]  ;;  %v481_v60 = vld [vmem:[#allocation8 + $0x7d8] sm:$0xff] }
 0x21c   :  { %v5057_v5 = vcombine.high %v480_v52, %v484_v58  ;;  %v5056_v13 = vcombine.low %v480_v52, %v484_v58  ;;  %v5058_v14 = vcombine.low %v481_v60, %v485_v0 }
 0x21d   :  { %3730 = vmatpush1.bf16.msra.mxu0 %v5000_v6  ;;  %v5059_v6 = vcombine.high %v481_v60, %v485_v0  ;;  %v536_v0 = vld [vmem:[#allocation8 + $0x990] sm:$0xff] }
 0x21e   :  { %3894 = vmatpush1.bf16.msra.mxu1 %v5002_v9  ;;  %3731 = vmatprep.subr.bf16.mxu0 %v5009_v10  ;;  %v488_v9 = vld [vmem:[#allocation8 + $0x810] sm:$0xff] }
 0x21f   :  { %3895 = vmatprep.subr.bf16.mxu1 %v5011_v11  ;;  %v492_v10 = vld [vmem:[#allocation8 + $0x830] sm:$0xff]  ;;  %v489_v11 = vld [vmem:[#allocation8 + $0x818] sm:$0xff] }
 0x220   :  { %v5065_v15 = vcombine.high %v488_v9, %v492_v10  ;;  %v5066_v31 = vcombine.low %v489_v11, %v493_v8 }
 0x221   :  { %3732 = vmatpush1.bf16.msra.mxu0 %v5008_v18  ;;  %v5067_v18 = vcombine.high %v489_v11, %v493_v8  ;;  %v544_v8 = vld [vmem:[#allocation8 + $0x9d0] sm:$0xff] }
 0x222   :  { %3896 = vmatpush1.bf16.msra.mxu1 %v5010_v24  ;;  %3733 = vmatprep.subr.bf16.mxu0 %v5017_v26  ;;  %v496_v24 = vld [vmem:[#allocation8 + $0x850] sm:$0xff] }
 0x223   :  { %3897 = vmatprep.subr.bf16.mxu1 %v5019_v19  ;;  %v500_v26 = vld [vmem:[#allocation8 + $0x870] sm:$0xff]  ;;  %v5064_v19 = vcombine.low %v488_v9, %v492_v10 }
 0x224   :  { %v5073_v32 = vcombine.high %v496_v24, %v500_v26  ;;  %v5072_v2 = vcombine.low %v496_v24, %v500_v26 }
 0x225   :  { %3734 = vmatpush1.bf16.msra.mxu0 %v5016_v33  ;;  %v504_v33 = vld [vmem:[#allocation8 + $0x890] sm:$0xff] }
 0x226   :  { %3898 = vmatpush1.bf16.msra.mxu1 %v5018_v59  ;;  %3735 = vmatprep.subr.bf16.mxu0 %v5025_v61  ;;  %v508_v59 = vld [vmem:[#allocation8 + $0x8b0] sm:$0xff]  ;;  %v5075_v61 = vcombine.high %v497_v30, %v501_v29 }
 0x227   :  { %3899 = vmatprep.subr.bf16.mxu1 %v5027_v62  ;;  %v505_v62 = vld [vmem:[#allocation8 + $0x898] sm:$0xff]  ;;  %v5081_v34 = vcombine.high %v504_v33, %v508_v59  ;;  %v5080_v40 = vcombine.low %v504_v33, %v508_v59  ;;  %v552_v30 = vld [vmem:[#allocation8 + $0xa10] sm:$0xff] }
 0x228   :  { %v556_v29 = vld [vmem:[#allocation8 + $0xa30] sm:$0xff] }
 0x229   :  { %3736 = vmatpush1.bf16.msra.mxu0 %v5024_v36  ;;  %v5083_v36 = vcombine.high %v505_v62, %v509_v63 }
 0x22a   :  { %3900 = vmatpush1.bf16.msra.mxu1 %v5026_v37  ;;  %3737 = vmatprep.subr.bf16.mxu0 %v5033_v38  ;;  %v512_v37 = vld [vmem:[#allocation8 + $0x8d0] sm:$0xff] }
 0x22b   :  { %3901 = vmatprep.subr.bf16.mxu1 %v5035_v12  ;;  %v516_v38 = vld [vmem:[#allocation8 + $0x8f0] sm:$0xff]  ;;  %v513_v12 = vld [vmem:[#allocation8 + $0x8d8] sm:$0xff] }
 0x22c   :  { %v5089_v41 = vcombine.high %v512_v37, %v516_v38  ;;  %v5091_v43 = vcombine.high %v513_v12, %v517_v17  ;;  %v5090_v47 = vcombine.low %v513_v12, %v517_v17  ;;  %v568_v17 = vld [vmem:[#allocation8 + $0xa90] sm:$0xff] }
 0x22d   :  { %3738 = vmatpush1.bf16.msra.mxu0 %v5032_v7  ;;  %v520_v7 = vld [vmem:[#allocation8 + $0x910] sm:$0xff] }
 0x22e   :  { %3902 = vmatpush1.bf16.msra.mxu1 %v5034_v44  ;;  %3739 = vmatprep.subr.bf16.mxu0 %v5041_v45  ;;  %v524_v44 = vld [vmem:[#allocation8 + $0x930] sm:$0xff]  ;;  %v521_v45 = vld [vmem:[#allocation8 + $0x918] sm:$0xff] }
 0x22f   :  { %3903 = vmatprep.subr.bf16.mxu1 %v5043_v46  ;;  %v525_v46 = vld [vmem:[#allocation8 + $0x938] sm:$0xff]  ;;  %v5097_v48 = vcombine.high %v520_v7, %v524_v44 }
 0x230   :  { %v5099_v49 = vcombine.high %v521_v45, %v525_v46  ;;  %v5098_v52 = vcombine.low %v521_v45, %v525_v46  ;;  %v576_v46 = vld [vmem:[#allocation8 + $0xad0] sm:$0xff] }
 0x231   :  { %3740 = vmatpush1.bf16.msra.mxu0 %v5040_v55  ;;  %v532_v55 = vld [vmem:[#allocation8 + $0x970] sm:$0xff] }
 0x232   :  { %3904 = vmatpush1.bf16.msra.mxu1 %v5042_v51  ;;  %3741 = vmatprep.subr.bf16.mxu0 %v5049_v56  ;;  %v529_v51 = vld [vmem:[#allocation8 + $0x958] sm:$0xff]  ;;  %v5105_v58 = vcombine.high %v528_v53, %v532_v55 }
 0x233   :  { %3905 = vmatprep.subr.bf16.mxu1 %v5051_v57  ;;  %v533_v56 = vld [vmem:[#allocation8 + $0x978] sm:$0xff]  ;;  %v5096_v57 = vcombine.low %v520_v7, %v524_v44 }
 0x234   :  { %v5107_v60 = vcombine.high %v529_v51, %v533_v56  ;;  %v5106_v9 = vcombine.low %v529_v51, %v533_v56  ;;  %v584_v56 = vld [vmem:[#allocation8 + $0xb10] sm:$0xff] }
 0x235   :  { %3742 = vmatpush1.bf16.msra.mxu0 %v5048_v1  ;;  %v540_v1 = vld [vmem:[#allocation8 + $0x9b0] sm:$0xff] }
 0x236   :  { %3906 = vmatpush1.bf16.msra.mxu1 %v5050_v4  ;;  %3743 = vmatprep.subr.bf16.mxu0 %v5057_v5  ;;  %v537_v4 = vld [vmem:[#allocation8 + $0x998] sm:$0xff]  ;;  %v5113_v10 = vcombine.high %v536_v0, %v540_v1 }
 0x237   :  { %3907 = vmatprep.subr.bf16.mxu1 %v5059_v6  ;;  %v541_v5 = vld [vmem:[#allocation8 + $0x9b8] sm:$0xff]  ;;  %v5104_v6 = vcombine.low %v528_v53, %v532_v55 }
 0x238   :  { %v5115_v11 = vcombine.high %v537_v4, %v541_v5  ;;  %v5114_v24 = vcombine.low %v537_v4, %v541_v5  ;;  %v592_v5 = vld [vmem:[#allocation8 + $0xb50] sm:$0xff] }
 0x239   :  { %3744 = vmatpush1.bf16.msra.mxu0 %v5056_v13  ;;  %v548_v13 = vld [vmem:[#allocation8 + $0x9f0] sm:$0xff] }
 0x23a   :  { %3908 = vmatpush1.bf16.msra.mxu1 %v5058_v14  ;;  %3754 = vmatprep.subr.bf16.mxu0 %v5065_v15  ;;  %v545_v14 = vld [vmem:[#allocation8 + $0x9d8] sm:$0xff]  ;;  %v5121_v26 = vcombine.high %v544_v8, %v548_v13  ;;  %v5120_v33 = vcombine.low %v544_v8, %v548_v13 }
 0x23b   :  { %3918 = vmatprep.subr.bf16.mxu1 %v5067_v18  ;;  %v549_v15 = vld [vmem:[#allocation8 + $0x9f8] sm:$0xff]  ;;  %v5112_v18 = vcombine.low %v536_v0, %v540_v1 }
 0x23c   :  { %3746 = vmatmul.mubr.bf16.vlgmr.msra.gmra.mrb[4].mxu0 %v6000_v50  ;;  %v5122_v59 = vcombine.low %v545_v14, %v549_v15 }
 0x23d   :  { %3910 = vmatmul.mubr.bf16.vlgmr.msra.gmra.mrb[4].mxu1 %v6000_v50  ;;  %3755 = vmatpush1.bf16.msra.mxu0 %v5064_v19  ;;  %v5082_v50 = vcombine.low %v505_v62, %v509_v63  ;;  %v5123_v19 = vcombine.high %v545_v14, %v549_v15  ;;  %v560_v63 = vld [vmem:[#allocation8 + $0xa50] sm:$0xff] }
 0x23e   :  { %3786 = vmatprep.mubr.bf16.mxu0 %v6002_v54  ;;  %3919 = vmatpush1.bf16.msra.mxu1 %v5066_v31  ;;  %v553_v31 = vld [vmem:[#allocation8 + $0xa18] sm:$0xff]  ;;  %v600_v15 = vld [vmem:[#allocation8 + $0xb90] sm:$0xff] }
 0x23f   :  { %3950 = vmatprep.mubr.bf16.mxu1 %v6002_v54  ;;  %3756 = vmatprep.subr.bf16.mxu0 %v5073_v32  ;;  %v5088_v54 = vcombine.low %v512_v37, %v516_v38  ;;  %v557_v32 = vld [vmem:[#allocation8 + $0xa38] sm:$0xff] }
 0x240   :  { %3920 = vmatprep.subr.bf16.mxu1 %v5075_v61  ;;  %v5129_v61 = vcombine.high %v552_v30, %v556_v29  ;;  %v5131_v62 = vcombine.high %v553_v31, %v557_v32  ;;  %v5130_v37 = vcombine.low %v553_v31, %v557_v32  ;;  %v608_v32 = vld [vmem:[#allocation8 + $0xbd0] sm:$0xff] }
 0x241   :  { %3757 = vmatpush1.bf16.msra.mxu0 %v5072_v2  ;;  %v564_v2 = vld [vmem:[#allocation8 + $0xa70] sm:$0xff] }
 0x242   :  { %3921 = vmatpush1.bf16.msra.mxu1 %v5074_v3  ;;  %3758 = vmatprep.subr.bf16.mxu0 %v5081_v34  ;;  %v561_v3 = vld [vmem:[#allocation8 + $0xa58] sm:$0xff]  ;;  %v5137_v38 = vcombine.high %v560_v63, %v564_v2 }
 0x243   :  { %3922 = vmatprep.subr.bf16.mxu1 %v5083_v36  ;;  %v565_v34 = vld [vmem:[#allocation8 + $0xa78] sm:$0xff]  ;;  %v5128_v36 = vcombine.low %v552_v30, %v556_v29 }
 0x244   :  { %v5139_v12 = vcombine.high %v561_v3, %v565_v34  ;;  %v5138_v7 = vcombine.low %v561_v3, %v565_v34  ;;  %v616_v34 = vld [vmem:[#allocation8 + $0xc10] sm:$0xff] }
 0x245   :  { %3759 = vmatpush1.bf16.msra.mxu0 %v5080_v40  ;;  %v572_v40 = vld [vmem:[#allocation8 + $0xab0] sm:$0xff] }
 0x246   :  { %3923 = vmatpush1.bf16.msra.mxu1 %v5082_v50  ;;  %3760 = vmatprep.subr.bf16.mxu0 %v5089_v41  ;;  %v569_v50 = vld [vmem:[#allocation8 + $0xa98] sm:$0xff]  ;;  %v5145_v44 = vcombine.high %v568_v17, %v572_v40 }
 0x247   :  { %3924 = vmatprep.subr.bf16.mxu1 %v5091_v43  ;;  %v573_v41 = vld [vmem:[#allocation8 + $0xab8] sm:$0xff]  ;;  %v5136_v43 = vcombine.low %v560_v63, %v564_v2 }
 0x248   :  { %v5147_v45 = vcombine.high %v569_v50, %v573_v41  ;;  %v5146_v53 = vcombine.low %v569_v50, %v573_v41  ;;  %v624_v41 = vld [vmem:[#allocation8 + $0xc50] sm:$0xff] }
 0x249   :  { %3761 = vmatpush1.bf16.msra.mxu0 %v5088_v54  ;;  %v580_v54 = vld [vmem:[#allocation8 + $0xaf0] sm:$0xff] }
 0x24a   :  { %3925 = vmatpush1.bf16.msra.mxu1 %v5090_v47  ;;  %3762 = vmatprep.subr.bf16.mxu0 %v5097_v48  ;;  %v577_v47 = vld [vmem:[#allocation8 + $0xad8] sm:$0xff]  ;;  %v5153_v55 = vcombine.high %v576_v46, %v580_v54 }
 0x24b   :  { %3926 = vmatprep.subr.bf16.mxu1 %v5099_v49  ;;  %v581_v48 = vld [vmem:[#allocation8 + $0xaf8] sm:$0xff]  ;;  %v5144_v49 = vcombine.low %v568_v17, %v572_v40 }
 0x24c   :  { %v5155_v51 = vcombine.high %v577_v47, %v581_v48  ;;  %v5154_v0 = vcombine.low %v577_v47, %v581_v48  ;;  %v632_v47 = vld [vmem:[#allocation8 + $0xc90] sm:$0xff] }
 0x24d   :  { %3763 = vmatpush1.bf16.msra.mxu0 %v5096_v57  ;;  %v588_v57 = vld [vmem:[#allocation8 + $0xb30] sm:$0xff] }
 0x24e   :  { %3927 = vmatpush1.bf16.msra.mxu1 %v5098_v52  ;;  %3764 = vmatprep.subr.bf16.mxu0 %v5105_v58  ;;  %v585_v52 = vld [vmem:[#allocation8 + $0xb18] sm:$0xff]  ;;  %v5161_v1 = vcombine.high %v584_v56, %v588_v57  ;;  %v636_v48 = vld [vmem:[#allocation8 + $0xcb0] sm:$0xff] }
 0x24f   :  { %3928 = vmatprep.subr.bf16.mxu1 %v5107_v60  ;;  %v589_v58 = vld [vmem:[#allocation8 + $0xb38] sm:$0xff]  ;;  %v5152_v60 = vcombine.low %v576_v46, %v580_v54 }
 0x250   :  { %v5163_v4 = vcombine.high %v585_v52, %v589_v58  ;;  %v5162_v8 = vcombine.low %v585_v52, %v589_v58  ;;  %v640_v58 = vld [vmem:[#allocation8 + $0xcd0] sm:$0xff] }
 0x251   :  { %3765 = vmatpush1.bf16.msra.mxu0 %v5104_v6  ;;  %v596_v6 = vld [vmem:[#allocation8 + $0xb70] sm:$0xff] }
 0x252   :  { %3929 = vmatpush1.bf16.msra.mxu1 %v5106_v9  ;;  %3766 = vmatprep.subr.bf16.mxu0 %v5113_v10  ;;  %v593_v9 = vld [vmem:[#allocation8 + $0xb58] sm:$0xff]  ;;  %v5169_v13 = vcombine.high %v592_v5, %v596_v6 }
 0x253   :  { %3930 = vmatprep.subr.bf16.mxu1 %v5115_v11  ;;  %v597_v10 = vld [vmem:[#allocation8 + $0xb78] sm:$0xff]  ;;  %v5160_v11 = vcombine.low %v584_v56, %v588_v57  ;;  %v5209_v57 = vcombine.high %v632_v47, %v636_v48 }
 0x254   :  { %v5171_v14 = vcombine.high %v593_v9, %v597_v10  ;;  %v5170_v30 = vcombine.low %v593_v9, %v597_v10  ;;  %v648_v9 = vld [vmem:[#allocation8 + $0xd10] sm:$0xff] }
 0x255   :  { %3767 = vmatpush1.bf16.msra.mxu0 %v5112_v18  ;;  %v604_v18 = vld [vmem:[#allocation8 + $0xbb0] sm:$0xff] }
 0x256   :  { %3931 = vmatpush1.bf16.msra.mxu1 %v5114_v24  ;;  %3768 = vmatprep.subr.bf16.mxu0 %v5121_v26  ;;  %v601_v24 = vld [vmem:[#allocation8 + $0xb98] sm:$0xff]  ;;  %v5177_v29 = vcombine.high %v600_v15, %v604_v18  ;;  %v652_v10 = vld [vmem:[#allocation8 + $0xd30] sm:$0xff] }
 0x257   :  { %3932 = vmatprep.subr.bf16.mxu1 %v5123_v19  ;;  %v605_v26 = vld [vmem:[#allocation8 + $0xbb8] sm:$0xff]  ;;  %v5168_v19 = vcombine.low %v592_v5, %v596_v6 }
 0x258   :  { %v5179_v31 = vcombine.high %v601_v24, %v605_v26  ;;  %v5178_v63 = vcombine.low %v601_v24, %v605_v26  ;;  %v660_v24 = vld [vmem:[#allocation8 + $0xd70] sm:$0xff]  ;;  %v657_v26 = vld [vmem:[#allocation8 + $0xd58] sm:$0xff] }
 0x259   :  { %3769 = vmatpush1.bf16.msra.mxu0 %v5120_v33  ;;  %v612_v33 = vld [vmem:[#allocation8 + $0xbf0] sm:$0xff] }
 0x25a   :  { %3933 = vmatpush1.bf16.msra.mxu1 %v5122_v59  ;;  %3770 = vmatprep.subr.bf16.mxu0 %v5129_v61  ;;  %v609_v59 = vld [vmem:[#allocation8 + $0xbd8] sm:$0xff]  ;;  %v5185_v2 = vcombine.high %v608_v32, %v612_v33 }
 0x25b   :  { %3934 = vmatprep.subr.bf16.mxu1 %v5131_v62  ;;  %v613_v61 = vld [vmem:[#allocation8 + $0xbf8] sm:$0xff]  ;;  %v5176_v62 = vcombine.low %v600_v15, %v604_v18  ;;  %v656_v18 = vld [vmem:[#allocation8 + $0xd50] sm:$0xff] }
 0x25c   :  { %v5187_v3 = vcombine.high %v609_v59, %v613_v61  ;;  %v5186_v17 = vcombine.low %v609_v59, %v613_v61  ;;  %v668_v59 = vld [vmem:[#allocation8 + $0xdb0] sm:$0xff]  ;;  %v665_v61 = vld [vmem:[#allocation8 + $0xd98] sm:$0xff] }
 0x25d   :  { %3771 = vmatpush1.bf16.msra.mxu0 %v5128_v36  ;;  %v620_v36 = vld [vmem:[#allocation8 + $0xc30] sm:$0xff] }
 0x25e   :  { %3935 = vmatpush1.bf16.msra.mxu1 %v5130_v37  ;;  %3772 = vmatprep.subr.bf16.mxu0 %v5137_v38  ;;  %v617_v37 = vld [vmem:[#allocation8 + $0xc18] sm:$0xff]  ;;  %v5193_v40 = vcombine.high %v616_v34, %v620_v36 }
 0x25f   :  { %3936 = vmatprep.subr.bf16.mxu1 %v5139_v12  ;;  %v621_v38 = vld [vmem:[#allocation8 + $0xc38] sm:$0xff]  ;;  %v5184_v12 = vcombine.low %v608_v32, %v612_v33  ;;  %v664_v33 = vld [vmem:[#allocation8 + $0xd90] sm:$0xff] }
 0x260   :  { %v5195_v50 = vcombine.high %v617_v37, %v621_v38  ;;  %v5194_v46 = vcombine.low %v617_v37, %v621_v38  ;;  %v672_v37 = vld [vmem:[#allocation8 + $0xdd0] sm:$0xff] }
 0x261   :  { %3773 = vmatpush1.bf16.msra.mxu0 %v5136_v43  ;;  %v628_v43 = vld [vmem:[#allocation8 + $0xc70] sm:$0xff] }
 0x262   :  { %3937 = vmatpush1.bf16.msra.mxu1 %v5138_v7  ;;  %3774 = vmatprep.subr.bf16.mxu0 %v5145_v44  ;;  %v5192_v7 = vcombine.low %v616_v34, %v620_v36  ;;  %v625_v44 = vld [vmem:[#allocation8 + $0xc58] sm:$0xff]  ;;  %v5201_v54 = vcombine.high %v624_v41, %v628_v43  ;;  %v676_v38 = vld [vmem:[#allocation8 + $0xdf0] sm:$0xff] }
 0x263   :  { %3938 = vmatprep.subr.bf16.mxu1 %v5147_v45  ;;  %v629_v45 = vld [vmem:[#allocation8 + $0xc78] sm:$0xff] }
 0x264   :  { %v5202_v56 = vcombine.low %v625_v44, %v629_v45 }
 0x265   :  { %3775 = vmatpush1.bf16.msra.mxu0 %v5144_v49  ;;  %v5203_v49 = vcombine.high %v625_v44, %v629_v45 }
 0x266   :  { %3939 = vmatpush1.bf16.msra.mxu1 %v5146_v53  ;;  %3776 = vmatprep.subr.bf16.mxu0 %v5153_v55  ;;  %v633_v53 = vld [vmem:[#allocation8 + $0xc98] sm:$0xff] }
 0x267   :  { %3940 = vmatprep.subr.bf16.mxu1 %v5155_v51  ;;  %v637_v55 = vld [vmem:[#allocation8 + $0xcb8] sm:$0xff]  ;;  %v5200_v51 = vcombine.low %v624_v41, %v628_v43 }
 0x268   :  { %v5211_v52 = vcombine.high %v633_v53, %v637_v55 }
 0x269   :  { %3777 = vmatpush1.bf16.msra.mxu0 %v5152_v60  ;;  %v644_v60 = vld [vmem:[#allocation8 + $0xcf0] sm:$0xff] }
 0x26a   :  { %3941 = vmatpush1.bf16.msra.mxu1 %v5154_v0  ;;  %3778 = vmatprep.subr.bf16.mxu0 %v5161_v1  ;;  %v641_v0 = vld [vmem:[#allocation8 + $0xcd8] sm:$0xff]  ;;  %v5217_v5 = vcombine.high %v640_v58, %v644_v60 }
 0x26b   :  { %3942 = vmatprep.subr.bf16.mxu1 %v5163_v4  ;;  %v645_v1 = vld [vmem:[#allocation8 + $0xcf8] sm:$0xff]  ;;  %v5208_v4 = vcombine.low %v632_v47, %v636_v48 }
 0x26c   :  { %v5219_v6 = vcombine.high %v641_v0, %v645_v1 }
 0x26d   :  { %3779 = vmatpush1.bf16.msra.mxu0 %v5160_v11  ;;  %v649_v11 = vld [vmem:[#allocation8 + $0xd18] sm:$0xff] }
 0x26e   :  { %3943 = vmatpush1.bf16.msra.mxu1 %v5162_v8  ;;  %3780 = vmatprep.subr.bf16.mxu0 %v5169_v13  ;;  %v653_v8 = vld [vmem:[#allocation8 + $0xd38] sm:$0xff]  ;;  %v5218_v13 = vcombine.low %v641_v0, %v645_v1  ;;  %v692_v0 = vld [vmem:[#allocation8 + $0xe70] sm:$0xff] }
 0x26f   :  { %3944 = vmatprep.subr.bf16.mxu1 %v5171_v14  ;;  %v5225_v14 = vcombine.high %v648_v9, %v652_v10  ;;  %v5227_v15 = vcombine.high %v649_v11, %v653_v8  ;;  %v689_v1 = vld [vmem:[#allocation8 + $0xe58] sm:$0xff] }
 0x271   :  { %3781 = vmatpush1.bf16.msra.mxu0 %v5168_v19  ;;  %v661_v19 = vld [vmem:[#allocation8 + $0xd78] sm:$0xff] }
 0x272   :  { %3945 = vmatpush1.bf16.msra.mxu1 %v5170_v30  ;;  %3782 = vmatprep.subr.bf16.mxu0 %v5177_v29  ;;  %v5224_v30 = vcombine.low %v648_v9, %v652_v10  ;;  %v5226_v29 = vcombine.low %v649_v11, %v653_v8  ;;  %v5235_v32 = vcombine.high %v657_v26, %v661_v19  ;;  %v696_v10 = vld [vmem:[#allocation8 + $0xe90] sm:$0xff]  ;;  %v697_v8 = vld [vmem:[#allocation8 + $0xe98] sm:$0xff] }
 0x273   :  { %3946 = vmatprep.subr.bf16.mxu1 %v5179_v31  ;;  %v5233_v31 = vcombine.high %v656_v18, %v660_v24  ;;  %v700_v11 = vld [vmem:[#allocation8 + $0xeb0] sm:$0xff] }
 0x275   :  { %3783 = vmatpush1.bf16.msra.mxu0 %v5176_v62  ;;  %v669_v62 = vld [vmem:[#allocation8 + $0xdb8] sm:$0xff] }
 0x276   :  { %3947 = vmatpush1.bf16.msra.mxu1 %v5178_v63  ;;  %3784 = vmatprep.subr.bf16.mxu0 %v5185_v2  ;;  %v5232_v63 = vcombine.low %v656_v18, %v660_v24  ;;  %v5234_v2 = vcombine.low %v657_v26, %v661_v19  ;;  %v5243_v36 = vcombine.high %v665_v61, %v669_v62  ;;  %v704_v24 = vld [vmem:[#allocation8 + $0xed0] sm:$0xff]  ;;  %v705_v19 = vld [vmem:[#allocation8 + $0xed8] sm:$0xff] }
 0x277   :  { %3948 = vmatprep.subr.bf16.mxu1 %v5187_v3  ;;  %v5241_v3 = vcombine.high %v664_v33, %v668_v59  ;;  %v708_v26 = vld [vmem:[#allocation8 + $0xef0] sm:$0xff] }
 0x279   :  { %3785 = vmatpush1.bf16.msra.mxu0 %v5184_v12 }
 0x27a   :  { %3949 = vmatpush1.bf16.msra.mxu1 %v5186_v17  ;;  %3795 = vmatprep.subr.bf16.mxu0 %v5193_v40  ;;  %v673_v40 = vld [vmem:[#allocation8 + $0xdd8] sm:$0xff] }
 0x27b   :  { %3959 = vmatprep.subr.bf16.mxu1 %v5195_v50  ;;  %v677_v50 = vld [vmem:[#allocation8 + $0xdf8] sm:$0xff] }
 0x27c   :  { %3787 = vmatmul.mubr.bf16.vlgmr.msra.gmra.mrb[4].mxu0 %v6010_v35  ;;  %v5251_v48 = vcombine.high %v673_v40, %v677_v50 }
 0x27d   :  { %3951 = vmatmul.mubr.bf16.vlgmr.msra.gmra.mrb[4].mxu1 %v6010_v35  ;;  %3796 = vmatpush1.bf16.msra.mxu0 %v5192_v7  ;;  %v5210_v35 = vcombine.low %v633_v53, %v637_v55  ;;  %v5240_v7 = vcombine.low %v664_v33, %v668_v59  ;;  %v684_v53 = vld [vmem:[#allocation8 + $0xe30] sm:$0xff]  ;;  %v681_v55 = vld [vmem:[#allocation8 + $0xe18] sm:$0xff] }
 0x27e   :  { %3827 = vmatprep.mubr.bf16.mxu0 %v6013_v39  ;;  %3960 = vmatpush1.bf16.msra.mxu1 %v5194_v46  ;;  %v5242_v46 = vcombine.low %v665_v61, %v669_v62  ;;  %v712_v59 = vld [vmem:[#allocation8 + $0xf10] sm:$0xff]  ;;  %v713_v62 = vld [vmem:[#allocation8 + $0xf18] sm:$0xff] }
 0x27f   :  { %3991 = vmatprep.mubr.bf16.mxu1 %v6013_v39  ;;  %3797 = vmatprep.subr.bf16.mxu0 %v5201_v54  ;;  %v5216_v39 = vcombine.low %v640_v58, %v644_v60  ;;  %v5249_v54 = vcombine.high %v672_v37, %v676_v38  ;;  %v688_v60 = vld [vmem:[#allocation8 + $0xe50] sm:$0xff] }
 0x280   :  { %3961 = vmatprep.subr.bf16.mxu1 %v5203_v49  ;;  %v680_v49 = vld [vmem:[#allocation8 + $0xe10] sm:$0xff] }
 0x281   :  { %3798 = vmatpush1.bf16.msra.mxu0 %v5200_v51  ;;  %v685_v51 = vld [vmem:[#allocation8 + $0xe38] sm:$0xff]  ;;  %v716_v61 = vld [vmem:[#allocation8 + $0xf30] sm:$0xff] }
 0x282   :  { %3962 = vmatpush1.bf16.msra.mxu1 %v5202_v56  ;;  %3799 = vmatprep.subr.bf16.mxu0 %v5209_v57  ;;  %v5248_v56 = vcombine.low %v672_v37, %v676_v38  ;;  %v5250_v57 = vcombine.low %v673_v40, %v677_v50  ;;  %v5259_v58 = vcombine.high %v681_v55, %v685_v51  ;;  %v720_v38 = vld [vmem:[#allocation8 + $0xf50] sm:$0xff]  ;;  %v721_v50 = vld [vmem:[#allocation8 + $0xf58] sm:$0xff] }
 0x283   :  { %3963 = vmatprep.subr.bf16.mxu1 %v5211_v52  ;;  %v5257_v52 = vcombine.high %v680_v49, %v684_v53  ;;  %v724_v40 = vld [vmem:[#allocation8 + $0xf70] sm:$0xff] }
 0x285   :  { %3800 = vmatpush1.bf16.msra.mxu0 %v5208_v4  ;;  %v693_v4 = vld [vmem:[#allocation8 + $0xe78] sm:$0xff] }
 0x286   :  { %3964 = vmatpush1.bf16.msra.mxu1 %v5210_v35  ;;  %3801 = vmatprep.subr.bf16.mxu0 %v5217_v5  ;;  %v5256_v35 = vcombine.low %v680_v49, %v684_v53  ;;  %v5258_v5 = vcombine.low %v681_v55, %v685_v51  ;;  %v5267_v9 = vcombine.high %v689_v1, %v693_v4  ;;  %v733_v49 = vld [vmem:[#allocation8 + $0xfb8] sm:$0xff]  ;;  %v6045_v53 = vld [vmem:[#allocation9] sm:$0xff] }
 0x287   :  { %3965 = vmatprep.subr.bf16.mxu1 %v5219_v6  ;;  %v5265_v6 = vcombine.high %v688_v60, %v692_v0  ;;  %v5296_v55 = vcombine.low %v720_v38, %v724_v40 }
 0x289   :  { %3802 = vmatpush1.bf16.msra.mxu0 %v5216_v39  ;;  %v701_v39 = vld [vmem:[#allocation8 + $0xeb8] sm:$0xff] }
 0x28a   :  { %3966 = vmatpush1.bf16.msra.mxu1 %v5218_v13  ;;  %3803 = vmatprep.subr.bf16.mxu0 %v5225_v14  ;;  %v5264_v13 = vcombine.low %v688_v60, %v692_v0  ;;  %v5266_v14 = vcombine.low %v689_v1, %v693_v4  ;;  %v5275_v18 = vcombine.high %v697_v8, %v701_v39  ;;  %v737_v0 = vld [vmem:[#allocation8 + $0xfd8] sm:$0xff] }
 0x28b   :  { %3967 = vmatprep.subr.bf16.mxu1 %v5227_v15  ;;  %v5273_v15 = vcombine.high %v696_v10, %v700_v11  ;;  %v751_v60 = vrot.slane %v6045_v53, %v5940_v21  ;;  %v741_v1 = vld [vmem:[#allocation8 + $0xff8] sm:$0xff]  ;;  %v759_v4 = vrot.slane %v6045_v53, %v5942_v22  ;;  %v5547_v22 = vld [vmem:[%s6279_s5 + $0x40] sm:$0xff]  }
 0x28c   :  { %v5314_v21 = vcombine.low %v737_v0, %v741_v1 }
 0x28d   :  { %3804 = vmatpush1.bf16.msra.mxu0 %v5224_v30  ;;  %v709_v30 = vld [vmem:[#allocation8 + $0xef8] sm:$0xff] }
 0x28e   :  { %3968 = vmatpush1.bf16.msra.mxu1 %v5226_v29  ;;  %3805 = vmatprep.subr.bf16.mxu0 %v5233_v31  ;;  %v5272_v29 = vcombine.low %v696_v10, %v700_v11  ;;  %v5274_v31 = vcombine.low %v697_v8, %v701_v39  ;;  %v5283_v33 = vcombine.high %v705_v19, %v709_v30  ;;  %v5548_v39 = vld [vmem:[%s6279_s5 + $0xc0] sm:$0xff]  }
 0x28f   :  { %v6037_v34 = vpop.f32.mrb[0].mxu0  ;;  %3969 = vmatprep.subr.bf16.mxu1 %v5235_v32  ;;  %v5281_v32 = vcombine.high %v704_v24, %v708_v26 }
 0x290   :  { %v6039_v12 = vpop.f32.mrb[0].mxu1  ;;  %v6041_v17 = vpop.f32.mrb[1].mxu0 }
 0x291   :  { %v6043_v41 = vpop.f32.mrb[1].mxu1  ;;  %v3505_v43 = vpop.f32.mrb[2].mxu0  ;;  %3806 = vmatpush1.bf16.msra.mxu0 %v5232_v63  ;;  %v717_v63 = vld [vmem:[#allocation8 + $0xf38] sm:$0xff]  ;;  %v5479_v10 = vadd.f32 %v6041_v17, %v751_v60  ;;  %v5549_v17 = vld [vmem:[%s6279_s5] sm:$0xff]  }
 0x292   :  { %v3669_v44 = vpop.f32.mrb[2].mxu1  ;;  %3970 = vmatpush1.bf16.msra.mxu1 %v5234_v2  ;;  %v3506_v45 = vpop.f32.mrb[3].mxu0  ;;  %3807 = vmatprep.subr.bf16.mxu0 %v5241_v3  ;;  %v5280_v2 = vcombine.low %v704_v24, %v708_v26  ;;  %v5282_v3 = vcombine.low %v705_v19, %v709_v30  ;;  %v5291_v37 = vcombine.high %v713_v62, %v717_v63  ;;  %v725_v43 = vld [vmem:[#allocation8 + $0xf78] sm:$0xff]  ;;  %v5582_v60 = vld [vmem:[%s6279_s5 + $0x180] sm:$0xff]  }
 0x293   :  { %v3670_v47 = vpop.f32.mrb[3].mxu1  ;;  %3971 = vmatprep.subr.bf16.mxu1 %v5243_v36  ;;  %v5289_v36 = vcombine.high %v712_v59, %v716_v61  ;;  %v5290_v44 = vcombine.low %v713_v62, %v717_v63  ;;  %v5297_v45 = vcombine.high %v720_v38, %v724_v40  ;;  %v5298_v51 = vcombine.low %v721_v50, %v725_v43  ;;  %v5552_v24 = vld [vmem:[%s6279_s5 + $0xc8] sm:$0xff]   ;;  %v5562_v62 = vld [vmem:[%s6279_s5 + $0x98] sm:$0xff]   ;;  %v5563_v63 = vld [vmem:[%s6279_s5 + $0x60] sm:$0xff]  }
 0x294   :  { %v732_v47 = vld [vmem:[#allocation8 + $0xfb0] sm:$0xff]  ;;  %v5481_v11 = vadd.f32 %v6043_v41, %v759_v4 }
 0x295   :  { %3808 = vmatpush1.bf16.msra.mxu0 %v5240_v7  ;;  %v5288_v7 = vcombine.low %v712_v59, %v716_v61  ;;  %v5550_v41 = vld [vmem:[%s6279_s5 + $0x80] sm:$0xff]   ;;  %v5553_v19 = vld [vmem:[%s6279_s5 + $0x8] sm:$0xff]   ;;  %v5560_v59 = vld [vmem:[%s6279_s5 + $0xd8] sm:$0xff]  }
 0x296   :  { %3972 = vmatpush1.bf16.msra.mxu1 %v5242_v46  ;;  %3809 = vmatprep.subr.bf16.mxu0 %v5249_v54  ;;  %v5299_v46 = vcombine.high %v721_v50, %v725_v43  ;;  %v728_v54 = vld [vmem:[#allocation8 + $0xf90] sm:$0xff]  ;;  %v5561_v61 = vld [vmem:[%s6279_s5 + $0x18] sm:$0xff]   ;;  %v747_v50 = vrot.slane %v6045_v53, %v5938_v20 }
 0x297   :  { %3973 = vmatprep.subr.bf16.mxu1 %v5251_v48  ;;  %v729_v48 = vld [vmem:[#allocation8 + $0xf98] sm:$0xff] }
 0x298   :  { %v5554_v30 = vld [vmem:[%s6279_s5 + $0x88] sm:$0xff]  }
 0x299   :  { %3810 = vmatpush1.bf16.msra.mxu0 %v5248_v56  ;;  %v5305_v56 = vcombine.high %v728_v54, %v732_v47  ;;  %v5568_v38 = vld [vmem:[%s6279_s5 + $0xe8] sm:$0xff]  }
 0x29a   :  { %3974 = vmatpush1.bf16.msra.mxu1 %v5250_v57  ;;  %3811 = vmatprep.subr.bf16.mxu0 %v5257_v52  ;;  %v5307_v57 = vcombine.high %v729_v48, %v733_v49  ;;  %v736_v52 = vld [vmem:[#allocation8 + $0xfd0] sm:$0xff] }
 0x29b   :  { %3975 = vmatprep.subr.bf16.mxu1 %v5259_v58  ;;  %v740_v58 = vld [vmem:[#allocation8 + $0xff0] sm:$0xff] }
 0x29c   :  { %v5312_v8 = vcombine.low %v736_v52, %v740_v58  ;;  %v5569_v40 = vld [vmem:[%s6279_s5 + $0x28] sm:$0xff]  }
 0x29d   :  { %3812 = vmatpush1.bf16.msra.mxu0 %v5256_v35  ;;  %v5304_v35 = vcombine.low %v728_v54, %v732_v47  ;;  %v5570_v43 = vld [vmem:[%s6279_s5 + $0xa8] sm:$0xff]   ;;  %v5478_v54 = vadd.f32 %v6037_v34, %v747_v50  ;;  %v5574_v47 = vld [vmem:[%s6279_s5 + $0xb0] sm:$0xff]   ;;  %v5577_v34 = vld [vmem:[%s6279_s5 + $0x38] sm:$0xff]  }
 0x29e   :  { %3976 = vmatpush1.bf16.msra.mxu1 %v5258_v5  ;;  %3813 = vmatprep.subr.bf16.mxu0 %v5265_v6  ;;  %v5306_v5 = vcombine.low %v729_v48, %v733_v49  ;;  %v5313_v6 = vcombine.high %v736_v52, %v740_v58  ;;  %v5576_v49 = vld [vmem:[%s6279_s5 + $0xf8] sm:$0xff]   ;;  %v5581_v52 = vld [vmem:[%s6279_s5 + $0x100] sm:$0xff]   ;;  %v5584_v4 = vld [vmem:[%s6279_s5 + $0x1c8] sm:$0xff]  }
 0x29f   :  { %3977 = vmatprep.subr.bf16.mxu1 %v5267_v9  ;;  %v5315_v9 = vcombine.high %v737_v0, %v741_v1  ;;  %v5583_v0 = vld [vmem:[%s6279_s5 + $0x148] sm:$0xff]  }
 0x2a1   :  { %3814 = vmatpush1.bf16.msra.mxu0 %v5264_v13  ;;  %v4001_v13 = vmax.f32 %v5479_v10, 0.0  ;;  %v5589_v10 = vld [vmem:[%s6279_s5 + $0x110] sm:$0xff]  }
 0x2a2   :  { %3978 = vmatpush1.bf16.msra.mxu1 %v5266_v14  ;;  %3815 = vmatprep.subr.bf16.mxu0 %v5273_v15  ;;  %v4003_v14 = vmax.f32 %v5481_v11, 0.0  ;;  %v5551_v15 = vld [vmem:[%s6279_s5 + $0x48] sm:$0xff]   ;;  %v5590_v11 = vld [vmem:[%s6279_s5 + $0x190] sm:$0xff]  }
 0x2a3   :  { %3979 = vmatprep.subr.bf16.mxu1 %v5275_v18  ;;  %v4009_v18 = vpack.c.bf16 %v4001_v13, %v4001_v13  ;;  %v5595_v13 = vld [vmem:[%s6279_s5 + $0x160] sm:$0xff]  }
 0x2a4   :  { %v4011_v26 = vpack.c.bf16 %v4003_v14, %v4003_v14  ;;  %v5596_v14 = vld [vmem:[%s6279_s5 + $0x1e0] sm:$0xff]  }
 0x2a5   :  { %3816 = vmatpush1.bf16.msra.mxu0 %v5272_v29  ;;  %v5555_v29 = vld [vmem:[%s6279_s5 + $0x50] sm:$0xff]  }
 0x2a6   :  { %3980 = vmatpush1.bf16.msra.mxu1 %v5274_v31  ;;  %3817 = vmatprep.subr.bf16.mxu0 %v5281_v32  ;;  %v5557_v31 = vld [vmem:[%s6279_s5 + $0x10] sm:$0xff]  }
 0x2a7   :  { %3981 = vmatprep.subr.bf16.mxu1 %v5283_v33  ;;  %v5558_v32 = vld [vmem:[%s6279_s5 + $0x90] sm:$0xff]   ;;  %v5559_v33 = vld [vmem:[%s6279_s5 + $0x58] sm:$0xff]  }
 0x2a9   :  { %3818 = vmatpush1.bf16.msra.mxu0 %v5280_v2  ;;  %v5564_v2 = vld [vmem:[%s6279_s5 + $0xe0] sm:$0xff]  }
 0x2aa   :  { %3982 = vmatpush1.bf16.msra.mxu1 %v5282_v3  ;;  %3819 = vmatprep.subr.bf16.mxu0 %v5289_v36  ;;  %v5565_v3 = vld [vmem:[%s6279_s5 + $0x20] sm:$0xff]  }
 0x2ab   :  { %3983 = vmatprep.subr.bf16.mxu1 %v5291_v37  ;;  %v5566_v36 = vld [vmem:[%s6279_s5 + $0xa0] sm:$0xff]   ;;  %v5567_v37 = vld [vmem:[%s6279_s5 + $0x68] sm:$0xff]  }
 0x2ad   :  { %3820 = vmatpush1.bf16.msra.mxu0 %v5288_v7  ;;  %v5571_v7 = vld [vmem:[%s6279_s5 + $0x70] sm:$0xff]  }
 0x2ae   :  { %3984 = vmatpush1.bf16.msra.mxu1 %v5290_v44  ;;  %3821 = vmatprep.subr.bf16.mxu0 %v5297_v45  ;;  %v755_v44 = vrot.slane %v6045_v53, %v5944_v23  ;;  %v5572_v45 = vld [vmem:[%s6279_s5 + $0xf0] sm:$0xff]   ;;  %v5575_v23 = vld [vmem:[%s6279_s5 + $0x78] sm:$0xff]  }
 0x2af   :  { %3985 = vmatprep.subr.bf16.mxu1 %v5299_v46  ;;  %v5573_v46 = vld [vmem:[%s6279_s5 + $0x30] sm:$0xff]  }
 0x2b0   :  { %v5480_v48 = vadd.f32 %v6039_v12, %v755_v44  ;;  %v5579_v12 = vld [vmem:[%s6279_s5 + $0x140] sm:$0xff]  }
 0x2b1   :  { %3822 = vmatpush1.bf16.msra.mxu0 %v5296_v55  ;;  %v4000_v55 = vmax.f32 %v5478_v54, 0.0 }
 0x2b2   :  { %3986 = vmatpush1.bf16.msra.mxu1 %v5298_v51  ;;  %3823 = vmatprep.subr.bf16.mxu0 %v5305_v56  ;;  %v5578_v51 = vld [vmem:[%s6279_s5 + $0xb8] sm:$0xff]   ;;  %v4002_v56 = vmax.f32 %v5480_v48, 0.0 }
 0x2b3   :  { %3987 = vmatprep.subr.bf16.mxu1 %v5307_v57  ;;  %v5580_v57 = vld [vmem:[%s6279_s5 + $0x1c0] sm:$0xff]   ;;  %v4008_v58 = vpack.c.bf16 %v4000_v55, %v4000_v55  ;;  %v5316_v55 = vld [vmem:[#allocation11] ss:$0 sm:$0xff] }
 0x2b4   :  { %v4010_v1 = vpack.c.bf16 %v4002_v56, %v4002_v56 }
 0x2b5   :  { %3824 = vmatpush1.bf16.msra.mxu0 %v5304_v35  ;;  %v5585_v35 = vld [vmem:[%s6279_s5 + $0x108] sm:$0xff]  }
 0x2b6   :  { %3988 = vmatpush1.bf16.msra.mxu1 %v5306_v5  ;;  %3825 = vmatprep.subr.bf16.mxu0 %v5313_v6  ;;  %v5586_v5 = vld [vmem:[%s6279_s5 + $0x188] sm:$0xff]   ;;  %v5587_v6 = vld [vmem:[%s6279_s5 + $0x150] sm:$0xff]  }
 0x2b7   :  { %3989 = vmatprep.subr.bf16.mxu1 %v5315_v9  ;;  %v5588_v9 = vld [vmem:[%s6279_s5 + $0x1d0] sm:$0xff]  }
 0x2b9   :  { %3826 = vmatpush1.bf16.msra.mxu0 %v5312_v8  ;;  %v5591_v8 = vld [vmem:[%s6279_s5 + $0x158] sm:$0xff]  }
 0x2ba   :  { %3990 = vmatpush1.bf16.msra.mxu1 %v5314_v21  ;;  %5383 = vmatprep.subr.bf16.mxu0 %v5547_v22  ;;  %v5592_v21 = vld [vmem:[%s6279_s5 + $0x1d8] sm:$0xff]  }
 0x2bb   :  { %5405 = vmatprep.subr.bf16.mxu1 %v5548_v39  ;;  %v5593_v22 = vld [vmem:[%s6279_s5 + $0x118] sm:$0xff]  }
 0x2bc   :  { %3828 = vmatmul.mubr.bf16.vlgmr.msra.gmra.mrb[4].mxu0 %v6019_v16  ;;  %v5594_v39 = vld [vmem:[%s6279_s5 + $0x198] sm:$0xff]  }
 0x2bd   :  { %3992 = vmatmul.mubr.bf16.vlgmr.msra.gmra.mrb[4].mxu1 %v6019_v16  ;;  %5384 = vmatpush3.bf16.msra.mxu0 %v5549_v17  ;;  %v5556_v16 = vld [vmem:[%s6279_s5 + $0xd0] sm:$0xff]   ;;  %v5597_v17 = vld [vmem:[%s6279_s5 + $0x120] sm:$0xff]  }
 0x2be   :  { %4567 = vmatprep.mubr.bf16.mxu0 %v4009_v18  ;;  %5406 = vmatpush3.bf16.msra.mxu1 %v5550_v41  ;;  %v5598_v41 = vld [vmem:[%s6279_s5 + $0x1a0] sm:$0xff]   ;;  %v5600_v18 = vld [vmem:[%s6279_s5 + $0x1e8] sm:$0xff]  }
 0x2bf   :  { %4607 = vmatprep.mubr.bf16.mxu1 %v4011_v26  ;;  %5385 = vmatprep.subr.bf16.mxu0 %v5551_v15  ;;  %v5599_v15 = vld [vmem:[%s6279_s5 + $0x168] sm:$0xff]  }
 0x2c0   :  { %5407 = vmatprep.subr.bf16.mxu1 %v5552_v24  ;;  %v5601_v24 = vld [vmem:[%s6279_s5 + $0x128] sm:$0xff]  }
 0x2c1   :  { %5386 = vmatpush3.bf16.msra.mxu0 %v5553_v19  ;;  %v5602_v26 = vld [vmem:[%s6279_s5 + $0x1a8] sm:$0xff]   ;;  %v5603_v19 = vld [vmem:[%s6279_s5 + $0x170] sm:$0xff]  }
 0x2c2   :  { %5408 = vmatpush3.bf16.msra.mxu1 %v5554_v30  ;;  %5387 = vmatprep.subr.bf16.mxu0 %v5555_v29  ;;  %v5604_v30 = vld [vmem:[%s6279_s5 + $0x1f0] sm:$0xff]  }
 0x2c3   :  { %5409 = vmatprep.subr.bf16.mxu1 %v5556_v16  ;;  %v5605_v29 = vld [vmem:[%s6279_s5 + $0x130] sm:$0xff]  }
 0x2c4   :  { %v5606_v16 = vld [vmem:[%s6279_s5 + $0x1b0] sm:$0xff]  }
 0x2c5   :  { %5388 = vmatpush3.bf16.msra.mxu0 %v5557_v31  ;;  %v5607_v31 = vld [vmem:[%s6279_s5 + $0x178] sm:$0xff]  }
 0x2c6   :  { %5410 = vmatpush3.bf16.msra.mxu1 %v5558_v32  ;;  %5389 = vmatprep.subr.bf16.mxu0 %v5559_v33  ;;  %v5608_v32 = vld [vmem:[%s6279_s5 + $0x1f8] sm:$0xff]  }
 0x2c7   :  { %5411 = vmatprep.subr.bf16.mxu1 %v5560_v59  ;;  %v5609_v33 = vld [vmem:[%s6279_s5 + $0x138] sm:$0xff]  }
 0x2c8   :  { %v5610_v59 = vld [vmem:[%s6279_s5 + $0x1b8] sm:$0xff]   ;;  %s5786_s5 = smov [#allocation14]  }
 0x2c9   :  { %5390 = vmatpush3.bf16.msra.mxu0 %v5561_v61  ;;  %v763_v61 = vrot.slane %v6045_v53, %v5948_v27  ;;  %s4792_s3 = sshll.u32 %s5786_s5, 4  ;;  %s4793_s3 = int_to_ptr.vmem [resolvable:$true] %s4792_s3 }
 0x2ca   :  { %5412 = vmatpush3.bf16.msra.mxu1 %v5562_v62  ;;  %5391 = vmatprep.subr.bf16.mxu0 %v5563_v63  ;;  %v771_v62 = vrot.slane %v6045_v53, %v5964_v42  ;;  %v767_v63 = vrot.slane %v6045_v53, %v5946_v25  ;;  %s5743_s16 = scalar_lea.vmem %s4793_s3, 16  ;;  %s5747_s23 = scalar_lea.vmem %s4793_s3, 32 }
 0x2cb   :  { %5413 = vmatprep.subr.bf16.mxu1 %v5564_v2  ;;  %v775_v2 = vrot.slane %v6045_v53, %v5950_v28  ;;  %p5744_p6 = scmp.ne.s32.totalorder %s4793_s3, %s5743_s16  ;;  %p5748_p7 = scmp.lt.s32.totalorder %s4793_s3, %s4793_s3 }
 0x2cc   :  { %p5749_p8 = scmp.lt.s32.totalorder %s5747_s23, %s5743_s16 }
 0x2cd   :  { %5392 = vmatpush3.bf16.msra.mxu0 %v5565_v3 }
 0x2ce   :  { %5414 = vmatpush3.bf16.msra.mxu1 %v5566_v36  ;;  %5393 = vmatprep.subr.bf16.mxu0 %v5567_v37  ;;  %p5750_p9 = por %p5749_p8, %p5748_p7 }
 0x2cf   :  { %5415 = vmatprep.subr.bf16.mxu1 %v5568_v38 }
 0x2d0   :  { %p5751_p10 = pnand %p5750_p9, %p5744_p6 }
 0x2d1   :  { %5394 = vmatpush3.bf16.msra.mxu0 %v5569_v40 }
 0x2d2   :  { %5416 = vmatpush3.bf16.msra.mxu1 %v5570_v43  ;;  %5395 = vmatprep.subr.bf16.mxu0 %v5571_v7 }
 0x2d3   :  { %5417 = vmatprep.subr.bf16.mxu1 %v5572_v45 }
 0x2d5   :  { %5396 = vmatpush3.bf16.msra.mxu0 %v5573_v46 }
 0x2d6   :  { %5418 = vmatpush3.bf16.msra.mxu1 %v5574_v47  ;;  %5397 = vmatprep.subr.bf16.mxu0 %v5575_v23 }
 0x2d7   :  { %5419 = vmatprep.subr.bf16.mxu1 %v5576_v49 }
 0x2d9   :  { %5398 = vmatpush3.bf16.msra.mxu0 %v5577_v34 }
 0x2da   :  { %5420 = vmatpush3.bf16.msra.mxu1 %v5578_v51  ;;  %5427 = vmatprep.subr.bf16.mxu0 %v5579_v12 }
 0x2db   :  { %5449 = vmatprep.subr.bf16.mxu1 %v5580_v57 }
 0x2dc   :  { %4568 = vmatmul.mubr.bf16.vlgmr.msra.gmra.mrb[8].mxu0 %v4008_v58 }
 0x2dd   :  { %4608 = vmatmul.mubr.bf16.vlgmr.msra.gmra.mrb[8].mxu1 %v4010_v1  ;;  %5428 = vmatpush3.bf16.msra.mxu0 %v5581_v52 }
 0x2de   :  { %5450 = vmatpush3.bf16.msra.mxu1 %v5582_v60  ;;  %5429 = vmatprep.subr.bf16.mxu0 %v5583_v0 }
 0x2df   :  { %5451 = vmatprep.subr.bf16.mxu1 %v5584_v4 }
 0x2e1   :  { %5430 = vmatpush3.bf16.msra.mxu0 %v5585_v35  ;;  %v5784_v35 = vmov 0.0  }
 0x2e2   :  { %5452 = vmatpush3.bf16.msra.mxu1 %v5586_v5  ;;  %5431 = vmatprep.subr.bf16.mxu0 %v5587_v6 }
 0x2e3   :  { %5453 = vmatprep.subr.bf16.mxu1 %v5588_v9 }
 0x2e5   :  { %5432 = vmatpush3.bf16.msra.mxu0 %v5589_v10 }
 0x2e6   :  { %5454 = vmatpush3.bf16.msra.mxu1 %v5590_v11  ;;  %5433 = vmatprep.subr.bf16.mxu0 %v5591_v8 }
 0x2e7   :  { %5455 = vmatprep.subr.bf16.mxu1 %v5592_v21 }
 0x2e9   :  { %5434 = vmatpush3.bf16.msra.mxu0 %v5593_v22 }
 0x2ea   :  { %5456 = vmatpush3.bf16.msra.mxu1 %v5594_v39  ;;  %5435 = vmatprep.subr.bf16.mxu0 %v5595_v13 }
 0x2eb   :  { %5457 = vmatprep.subr.bf16.mxu1 %v5596_v14 }
 0x2ed   :  { %5436 = vmatpush3.bf16.msra.mxu0 %v5597_v17 }
 0x2ee   :  { %5458 = vmatpush3.bf16.msra.mxu1 %v5598_v41  ;;  %5437 = vmatprep.subr.bf16.mxu0 %v5599_v15  ;;  %v4696_v15 = vld [vmem:[#allocation12] sm:$0x1] }
 0x2ef   :  { %5459 = vmatprep.subr.bf16.mxu1 %v5600_v18  ;;  %v4701_v18 = vpop.permute.xlu0 %4700 }
 0x2f1   :  { %5438 = vmatpush3.bf16.msra.mxu0 %v5601_v24  ;;  %v4706_v24 = vrot.slane %v4701_v18, %v5938_v20 }
 0x2f2   :  { %5460 = vmatpush3.bf16.msra.mxu1 %v5602_v26  ;;  %5439 = vmatprep.subr.bf16.mxu0 %v5603_v19 }
 0x2f3   :  { %5461 = vmatprep.subr.bf16.mxu1 %v5604_v30 }
 0x2f5   :  { %5440 = vmatpush3.bf16.msra.mxu0 %v5605_v29 }
 0x2f6   :  { %5462 = vmatpush3.bf16.msra.mxu1 %v5606_v16  ;;  %5441 = vmatprep.subr.bf16.mxu0 %v5607_v31 }
 0x2f7   :  { %5463 = vmatprep.subr.bf16.mxu1 %v5608_v32 }
 0x2f9   :  { %5442 = vmatpush3.bf16.msra.mxu0 %v5609_v33 }
 0x2fa   :  { %5464 = vmatpush3.bf16.msra.mxu1 %v5610_v59  ;;  %5473 = vmatprep.subr.mxu0 %v5784_v35 }
 0x38f   :  { %v3829_v3 = vpop.f32.mrb[4].mxu0 }
 0x390   :  { %v5482_v36 = vadd.f32 %v3829_v3, %v763_v61  ;;  %v3993_v37 = vpop.f32.mrb[4].mxu1  ;;  %v3831_v38 = vpop.f32.mrb[5].mxu0 }
 0x391   :  { %v5484_v40 = vadd.f32 %v3993_v37, %v771_v62  ;;  %v5483_v50 = vadd.f32 %v3831_v38, %v767_v63  ;;  %v3995_v43 = vpop.f32.mrb[5].mxu1  ;;  %v3833_v7 = vpop.f32.mrb[6].mxu0 }
 0x392   :  { %v4004_v44 = vmax.f32 %v5482_v36, 0.0  ;;  %v5485_v45 = vadd.f32 %v3995_v43, %v775_v2  ;;  %v3997_v27 = vpop.f32.mrb[6].mxu1  ;;  %v3834_v46 = vpop.f32.mrb[7].mxu0 }
 0x393   :  { %v4006_v54 = vmax.f32 %v5484_v40, 0.0  ;;  %v4005_v42 = vmax.f32 %v5483_v50, 0.0  ;;  %v3998_v47 = vpop.f32.mrb[7].mxu1 }
 0x394   :  { %v4007_v23 = vmax.f32 %v5485_v45, 0.0  ;;  %v4012_v48 = vpack.c.bf16 %v4004_v44, %v4004_v44 }
 0x395   :  { %v4013_v25 = vpack.c.bf16 %v4005_v42, %v4005_v42  ;;  %v4014_v28 = vpack.c.bf16 %v4006_v54, %v4006_v54 }
 0x396   :  { %v4015_v49 = vpack.c.bf16 %v4007_v23, %v4007_v23 }
 0x397   :  { %4647 = vmatprep.mubr.bf16.mxu0 %v4013_v25 }
 0x398   :  { %4687 = vmatprep.mubr.bf16.mxu1 %v4015_v49  ;;  %4648 = vmatmul.mubr.bf16.vlgmr.msra.gmra.mrb[12].mxu0 %v4012_v48 }
 0x399   :  { %4688 = vmatmul.mubr.bf16.vlgmr.msra.gmra.mrb[12].mxu1 %v4014_v28  ;;  %5475 = vmatprep.mubr.msk.f32.mxu0 %vm5785_vm0, %v5784_v35 }
 0x3af   :  { %v5399_v53 = vpop.f32.mrb[8].mxu0 }
 0x3b0   :  { %v5421_v34 = vpop.f32.mrb[8].mxu1  ;;  %v5400_v51 = vpop.f32.mrb[9].mxu0 }
 0x3b1   :  { %v5401_v12 = vadd.f32 %v5400_v51, %v5399_v53  ;;  %v5422_v56 = vpop.f32.mrb[9].mxu1  ;;  %v5402_v57 = vpop.f32.mrb[10].mxu0 }
 0x3b2   :  { %v5423_v52 = vadd.f32 %v5422_v56, %v5421_v34  ;;  %v5424_v58 = vpop.f32.mrb[10].mxu1  ;;  %v5403_v60 = vpop.f32.mrb[11].mxu0 }
 0x3b3   :  { %v4570_v0 = vadd.f32 %v5401_v12, %v5316_v55  ;;  %v5425_v1 = vpop.f32.mrb[11].mxu1 }
 0x3b5   :  { %v4610_v4 = vadd.f32 %v5423_v52, %v4570_v0 }
 0x46b   :  { %v5443_v5 = vpop.f32.mrb[12].mxu0 }
 0x46c   :  { %v5465_v6 = vpop.f32.mrb[12].mxu1  ;;  %v5444_v9 = vpop.f32.mrb[13].mxu0 }
 0x46d   :  { %v5445_v10 = vadd.f32 %v5444_v9, %v5443_v5  ;;  %v5466_v11 = vpop.f32.mrb[13].mxu1  ;;  %v5446_v8 = vpop.f32.mrb[14].mxu0 }
 0x46e   :  { %v5467_v21 = vadd.f32 %v5466_v11, %v5465_v6  ;;  %v5468_v22 = vpop.f32.mrb[14].mxu1  ;;  %v5447_v39 = vpop.f32.mrb[15].mxu0 }
 0x46f   :  { %v4650_v13 = vadd.f32 %v5445_v10, %v4610_v4  ;;  %v5469_v14 = vpop.f32.mrb[15].mxu1 }
 0x471   :  { %v4690_v17 = vadd.f32 %v5467_v21, %v4650_v13 }
 0x473   :  { %v4695_v41 = vmax.f32 %v4690_v17, 0.0 }
 0x475   :  { %5474 = vmatpush3.xpose.msk.msra.mxu0 %vm4707_vm1, %v4695_v41 }
 0x478   :  { %5476 = vmatmul.mubr.msk.f32.vlgmr.msra.gmra.mrb[16].mxu0 %vm4707_vm1, %v4696_v15 }
 0x54b   :  { %v4780_v26 = vpop.f32.mrb[16].mxu0 }
 0x54c   :  { %v4781_v19 = vadd.f32 %v4780_v26, %v4706_v24  ;;  %v5477_v30 = vpop.f32.mrb[17].mxu0 }
 0x54e   :  { %4785 = vst.msk [vmem:[#allocation14] sm:$0x1] %vm4784_vm2, %v4781_v19 }
 0x54f   :  { %5754 = shalt.err (!%p5751_p10)
}
 0x550   :  { %s5755_s26 = scalar_lea.hbm %s6283_s9, 16 }
 0x551   :  { %p5756_p11 = scmp.ne.s32.totalorder %s6283_s9, %s5755_s26  ;;  %p5759_p12 = scmp.lt.u32.totalorder %s5755_s26, %s6283_s9 }
 0x553   :  { %p5761_p13 = pnand %p5759_p12, %p5756_p11 }
 0x555   :  { %5764 = shalt.err (!%p5761_p13)
}
 0x556   :  { %4795 = dma.vmem_to_hbm [thread:$0]  %s4793_s3, 16, %s6283_s9, [#allocation5]  }
 0x557   :  { %5773 = dma.done.wait [#allocation5], 16  }
 0x558   :  { %5774 = vsyncadd [#allocation5], 4294967280 }
 0x559   :  { %4799 = vsyncpa [#allocation4], 1 }
 0x55a   :  { %4800 = vsyncpa [#allocation7], 1 }
 0x55b   :  { %4801 = vsyncpa [#allocation10], 1 }
 0x55c   :  { %4802 = vsyncpa [#allocation13], 1 }
 0x55d   :  { %4803 = vsyncpa [#allocation5], 1 }

</bundles_post_ra>
